<compile_context>
chip_gen: v6e
topology: v6e:2x2x1
jax: 0.10.0
libtpu: 0.0.40
codegen_flags: <defaults>
</compile_context>

<pallas_src>
import functools

import numpy as np
import jax
import jax.numpy as jnp
from jax import lax
from jax.experimental import pallas as pl
from jax.experimental.pallas import tpu as pltpu


def _conv_ps_relu_kernel(xp_ref, w_ref, b_ref, o_ref, *, TH, W, C_in, C_out, R):
    """One (batch n, row-tile h) grid step.

    xp_ref: (1, H+2, W+2, C_in)   zero-padded NHWC image of batch n (bf16), resident
                                  across the inner row-tile axis.
    w_ref : (9*C_in, C_out)       im2col weight matrix (bf16); rows ordered (dy, dx, cin),
                                  columns ordered (i, j, c_ps)  [pixel-shuffle fold].
    b_ref : (1, C_out)            conv bias (f32), same column order.
    o_ref : (1, TH, R, W, R*C_ps) pixel-shuffle-folded output tile (f32), lane-dense
                                  (last dim = R*C_ps = 128).
    """
    h0 = pl.multiple_of(pl.program_id(1) * TH, TH)

    # Build the lane-dense im2col LHS once per tile: K = 9*C_in = 576 (vs 9 x K=64).
    taps = []
    for dy in range(3):
        for dx in range(3):
            taps.append(xp_ref[:, pl.ds(h0 + dy, TH), pl.ds(dx, W), :])  # (1, TH, W, C_in)
    lhs = jnp.concatenate(taps, axis=-1)              # (1, TH, W, 9*C_in)
    lhs = lhs.reshape(TH * W, 9 * C_in)

    # Single deep MXU matmul with f32 accumulation; bias + ReLU in f32.
    y = jnp.dot(lhs, w_ref[...], preferred_element_type=jnp.float32)   # (TH*W, C_out)
    y = jnp.maximum(y + b_ref[...], 0.0)
    y = y.reshape(TH, W, C_out)

    # Pixel-shuffle fold: output channels are ordered (i, j, c_ps), so the i-th
    # 128-wide (lane-aligned) slice is exactly the (j, c_ps) slab of output row i.
    lanes = C_out // R                                # r * C_ps = 128
    for i in range(R):
        o_ref[0, :, i, :, :] = y[:, :, i * lanes:(i + 1) * lanes].astype(o_ref.dtype)


def _pick_row_tile(H, W, target_rows=2048):
    """Largest divisor TH of H with TH*W <= target_rows (fallback TH=1, always valid)."""
    best = 1
    for th in range(1, H + 1):
        if H % th == 0 and th * W <= target_rows:
            best = th
    return best


def _vmem_limit_bytes(Hp, Wp, C_in, TH, W, C_out, K):
    bf16 = 2
    xp_blk = Hp * Wp * C_in * bf16
    w_blk = K * C_out * bf16
    b_blk = C_out * 4
    out_blk = TH * W * C_out * 4
    lhs_tmp = TH * W * K * bf16
    y_tmp = TH * W * C_out * 4
    need = 2 * (xp_blk + w_blk + b_blk + out_blk) + lhs_tmp + 3 * y_tmp + (2 << 20)
    # Floor at the 32 MiB scoped default, cap at 64 MiB (v7x physical VMEM).
    return int(min(64 << 20, max(32 << 20, need)))


def upsample_block(x, weight, bias, *, upscale=2, compute_dtype=jnp.bfloat16):
    """x: (N, C_in, H, W) f32; weight: (C_out, C_in, 3, 3); bias: (C_out,).

    Returns ReLU(PixelShuffle(upscale)(Conv2d_3x3_s1_p1(x))) in NCHW, f32.
    """
    N, C_in, H, W = x.shape
    C_out = weight.shape[0]
    r = upscale
    assert C_out % (r * r) == 0
    C_ps = C_out // (r * r)

    # --- layout plumbing: NCHW -> NHWC, zero-pad H/W by 1, cast to bf16 ---------------
    x_nhwc = jnp.transpose(x, (0, 2, 3, 1))
    xp = jnp.pad(x_nhwc, ((0, 0), (1, 1), (1, 1), (0, 0))).astype(compute_dtype)
    Hp, Wp = H + 2, W + 2

    # --- pixel-shuffle fold: permute output channels from c*r*r + i*r + j to (i, j, c) -
    w_ps = weight.reshape(C_ps, r, r, C_in, 3, 3)
    w_ps = jnp.transpose(w_ps, (1, 2, 0, 3, 4, 5)).reshape(C_out, C_in, 3, 3)
    b_ps = jnp.transpose(bias.reshape(C_ps, r, r), (1, 2, 0)).reshape(C_out)

    # --- im2col weight matrix: rows ordered (dy, dx, cin) -> K = 9*C_in ----------------
    K = 9 * C_in
    w_mat = jnp.transpose(w_ps, (2, 3, 1, 0)).reshape(K, C_out).astype(compute_dtype)
    b2 = b_ps.reshape(1, C_out).astype(jnp.float32)

    TH = _pick_row_tile(H, W)
    HT = H // TH
    lanes = r * C_ps  # 128 for the SRGAN block

    kernel = functools.partial(_conv_ps_relu_kernel,
                               TH=TH, W=W, C_in=C_in, C_out=C_out, R=r)

    y5 = pl.pallas_call(
        kernel,
        out_shape=jax.ShapeDtypeStruct((N, H, r, W, lanes), jnp.float32),
        grid_spec=pltpu.PrefetchScalarGridSpec(
            num_scalar_prefetch=0,
            grid=(N, HT),
            in_specs=[
                # Whole padded image of batch n; constant across the inner h axis,
                # so it is DMA'd once per batch and reused by every row tile.
                pl.BlockSpec((1, Hp, Wp, C_in), lambda n, h: (n, 0, 0, 0)),
                pl.BlockSpec((K, C_out), lambda n, h: (0, 0)),
                pl.BlockSpec((1, C_out), lambda n, h: (0, 0)),
            ],
            out_specs=pl.BlockSpec((1, TH, r, W, lanes), lambda n, h: (n, h, 0, 0, 0)),
        ),
        compiler_params=pltpu.CompilerParams(
            dimension_semantics=("parallel", "parallel"),
            vmem_limit_bytes=_vmem_limit_bytes(Hp, Wp, C_in, TH, W, C_out, K),
        ),
    )(xp, w_mat, b2)

    # --- PixelShuffle is now a pure metadata reshape (channel order (i, j, c_ps)) ------
    out_nhwc = y5.reshape(N, H * r, W * r, C_ps)
    # TODO(synk): if the downstream consumer accepts NHWC, return out_nhwc directly.
    return jnp.transpose(out_nhwc, (0, 3, 1, 2))


def _reference(x, weight, bias, *, upscale=2, compute_dtype=jnp.bfloat16):
    # Same bf16 rounding of matmul inputs as the kernel, f32 everywhere else, so the
    # only difference vs the Pallas path is f32 accumulation order.
    xb = x.astype(compute_dtype).astype(jnp.float32)
    wb = weight.astype(compute_dtype).astype(jnp.float32)
    y = lax.conv_general_dilated(
        xb, wb, window_strides=(1, 1), padding=((1, 1), (1, 1)),
        dimension_numbers=("NCHW", "OIHW", "NCHW"),
        precision=lax.Precision.HIGHEST)
    y = y + bias.reshape(1, -1, 1, 1)
    # PixelShuffle(upscale), PyTorch semantics.
    N, C, H, W = y.shape
    r = upscale
    y = y.reshape(N, C // (r * r), r, r, H, W)
    y = jnp.transpose(y, (0, 1, 4, 2, 5, 3)).reshape(N, C // (r * r), H * r, W * r)
    return jnp.maximum(y, 0.0)


if __name__ == "__main__":
    # Shapes implied by the module: Conv2d(64 -> 256, 3x3), PixelShuffle(2).
    N, C_in, H, W = 2, 64, 16, 16
    C_out = 256

    key = jax.random.PRNGKey(0)
    kx, kw, kb = jax.random.split(key, 3)
    x = jax.random.normal(kx, (N, C_in, H, W), dtype=jnp.float32)
    # Deterministic synthetic parameters (scale ~ 1/sqrt(fan_in) like nn.Conv2d init).
    weight = jax.random.normal(kw, (C_out, C_in, 3, 3), dtype=jnp.float32) * 0.04
    bias = jax.random.normal(kb, (C_out,), dtype=jnp.float32) * 0.04

    out = upsample_block(x, weight, bias)
    out = jax.block_until_ready(out)
    assert out.shape == (N, C_out // 4, 2 * H, 2 * W)

    ref = _reference(x, weight, bias)
    np.testing.assert_allclose(np.asarray(out), np.asarray(ref), rtol=1e-4, atol=1e-4)

    print("KERNEL_OK")
</pallas_src>

<mosaic_0001>
module attributes {stable_mosaic.version = 11 : i64} {
  func.func @_conv_ps_relu_kernel(%arg0: i32, %arg1: i32, %arg2: memref<1x18x18x64xbf16, #tpu.memory_space<vmem>>, %arg3: memref<576x256xbf16, #tpu.memory_space<vmem>>, %arg4: memref<1x256xf32, #tpu.memory_space<vmem>>, %arg5: memref<1x16x2x16x128xf32, #tpu.memory_space<vmem>>) attributes {dimension_semantics = [#tpu.dimension_semantics<parallel>, #tpu.dimension_semantics<parallel>], iteration_bounds = array<i64: 2, 1>, scalar_prefetch = 0 : i64, scratch_operands = 0 : i64, tpu.core_type = #tpu.core_type<tc>, window_params = [{transform_indices = @transform_0, window_bounds = array<i64: 1, 18, 18, 64>}, {pipeline_mode = #tpu.pipeline_mode<synchronous>, transform_indices = @transform_1, window_bounds = array<i64: 576, 256>}, {pipeline_mode = #tpu.pipeline_mode<synchronous>, transform_indices = @transform_2, window_bounds = array<i64: 1, 256>}, {transform_indices = @transform_3, window_bounds = array<i64: 1, 16, 2, 16, 128>}]} {
    %c16_i32 = arith.constant 16 : i32
    %0 = arith.muli %arg1, %c16_i32 : i32
    %1 = tpu.assume_multiple %0, 16 : i32
    %c0_i32 = arith.constant 0 : i32
    %2 = arith.addi %1, %c0_i32 : i32
    %c0 = arith.constant 0 : index
    %3 = arith.index_cast %2 : i32 to index
    %c0_0 = arith.constant 0 : index
    %c0_1 = arith.constant 0 : index
    %4 = vector.load %arg2[%c0, %3, %c0_0, %c0_1] : memref<1x18x18x64xbf16, #tpu.memory_space<vmem>>, vector<1x16x16x64xbf16>
    %c0_i32_2 = arith.constant 0 : i32
    %5 = arith.addi %1, %c0_i32_2 : i32
    %c0_3 = arith.constant 0 : index
    %6 = arith.index_cast %5 : i32 to index
    %c1 = arith.constant 1 : index
    %c0_4 = arith.constant 0 : index
    %7 = vector.load %arg2[%c0_3, %6, %c1, %c0_4] : memref<1x18x18x64xbf16, #tpu.memory_space<vmem>>, vector<1x16x16x64xbf16>
    %c0_i32_5 = arith.constant 0 : i32
    %8 = arith.addi %1, %c0_i32_5 : i32
    %c0_6 = arith.constant 0 : index
    %9 = arith.index_cast %8 : i32 to index
    %c2 = arith.constant 2 : index
    %c0_7 = arith.constant 0 : index
    %10 = vector.load %arg2[%c0_6, %9, %c2, %c0_7] : memref<1x18x18x64xbf16, #tpu.memory_space<vmem>>, vector<1x16x16x64xbf16>
    %c1_i32 = arith.constant 1 : i32
    %11 = arith.addi %1, %c1_i32 : i32
    %c0_8 = arith.constant 0 : index
    %12 = arith.index_cast %11 : i32 to index
    %c0_9 = arith.constant 0 : index
    %c0_10 = arith.constant 0 : index
    %13 = vector.load %arg2[%c0_8, %12, %c0_9, %c0_10] : memref<1x18x18x64xbf16, #tpu.memory_space<vmem>>, vector<1x16x16x64xbf16>
    %c1_i32_11 = arith.constant 1 : i32
    %14 = arith.addi %1, %c1_i32_11 : i32
    %c0_12 = arith.constant 0 : index
    %15 = arith.index_cast %14 : i32 to index
    %c1_13 = arith.constant 1 : index
    %c0_14 = arith.constant 0 : index
    %16 = vector.load %arg2[%c0_12, %15, %c1_13, %c0_14] : memref<1x18x18x64xbf16, #tpu.memory_space<vmem>>, vector<1x16x16x64xbf16>
    %c1_i32_15 = arith.constant 1 : i32
    %17 = arith.addi %1, %c1_i32_15 : i32
    %c0_16 = arith.constant 0 : index
    %18 = arith.index_cast %17 : i32 to index
    %c2_17 = arith.constant 2 : index
    %c0_18 = arith.constant 0 : index
    %19 = vector.load %arg2[%c0_16, %18, %c2_17, %c0_18] : memref<1x18x18x64xbf16, #tpu.memory_space<vmem>>, vector<1x16x16x64xbf16>
    %c2_i32 = arith.constant 2 : i32
    %20 = arith.addi %1, %c2_i32 : i32
    %c0_19 = arith.constant 0 : index
    %21 = arith.index_cast %20 : i32 to index
    %c0_20 = arith.constant 0 : index
    %c0_21 = arith.constant 0 : index
    %22 = vector.load %arg2[%c0_19, %21, %c0_20, %c0_21] : memref<1x18x18x64xbf16, #tpu.memory_space<vmem>>, vector<1x16x16x64xbf16>
    %c2_i32_22 = arith.constant 2 : i32
    %23 = arith.addi %1, %c2_i32_22 : i32
    %c0_23 = arith.constant 0 : index
    %24 = arith.index_cast %23 : i32 to index
    %c1_24 = arith.constant 1 : index
    %c0_25 = arith.constant 0 : index
    %25 = vector.load %arg2[%c0_23, %24, %c1_24, %c0_25] : memref<1x18x18x64xbf16, #tpu.memory_space<vmem>>, vector<1x16x16x64xbf16>
    %c2_i32_26 = arith.constant 2 : i32
    %26 = arith.addi %1, %c2_i32_26 : i32
    %c0_27 = arith.constant 0 : index
    %27 = arith.index_cast %26 : i32 to index
    %c2_28 = arith.constant 2 : index
    %c0_29 = arith.constant 0 : index
    %28 = vector.load %arg2[%c0_27, %27, %c2_28, %c0_29] : memref<1x18x18x64xbf16, #tpu.memory_space<vmem>>, vector<1x16x16x64xbf16>
    %29 = tpu.concatenate %4, %7, %10, %13, %16, %19, %22, %25, %28 in 3 : vector<1x16x16x64xbf16>, vector<1x16x16x64xbf16>, vector<1x16x16x64xbf16>, vector<1x16x16x64xbf16>, vector<1x16x16x64xbf16>, vector<1x16x16x64xbf16>, vector<1x16x16x64xbf16>, vector<1x16x16x64xbf16>, vector<1x16x16x64xbf16> -> vector<1x16x16x576xbf16>
    %30 = vector.shape_cast %29 : vector<1x16x16x576xbf16> to vector<256x576xbf16>
    %c0_30 = arith.constant 0 : index
    %c0_31 = arith.constant 0 : index
    %31 = vector.load %arg3[%c0_30, %c0_31] : memref<576x256xbf16, #tpu.memory_space<vmem>>, vector<576x256xbf16>
    %cst = arith.constant dense<0.000000e+00> : vector<256x256xf32>
    %32 = tpu.matmul %30, %31, %cst {dimension_numbers = #tpu.dot_dimension_numbers<[1], [0], [0], [1], [0, 0, 1, 1], [], []>} : vector<256x576xbf16>, vector<576x256xbf16>, vector<256x256xf32> -> vector<256x256xf32>
    %c0_32 = arith.constant 0 : index
    %c0_33 = arith.constant 0 : index
    %33 = vector.load %arg4[%c0_32, %c0_33] : memref<1x256xf32, #tpu.memory_space<vmem>>, vector<1x256xf32>
    %34 = vector.broadcast %33 : vector<1x256xf32> to vector<256x256xf32>
    %35 = arith.addf %32, %34 : vector<256x256xf32>
    %cst_34 = arith.constant 0.000000e+00 : f32
    %36 = vector.broadcast %cst_34 : f32 to vector<256x256xf32>
    %37 = arith.maximumf %35, %36 : vector<256x256xf32>
    %38 = vector.shape_cast %37 : vector<256x256xf32> to vector<16x16x256xf32>
    %39 = vector.extract_strided_slice %38 {offsets = [0, 0, 0], sizes = [16, 16, 128], strides = [1, 1, 1]} : vector<16x16x256xf32> to vector<16x16x128xf32>
    %c0_35 = arith.constant 0 : index
    %c0_36 = arith.constant 0 : index
    %c0_37 = arith.constant 0 : index
    %c0_38 = arith.constant 0 : index
    %c0_39 = arith.constant 0 : index
    %40 = vector.load %arg5[%c0_35, %c0_36, %c0_37, %c0_38, %c0_39] : memref<1x16x2x16x128xf32, #tpu.memory_space<vmem>>, vector<1x16x1x16x128xf32>
    %41 = vector.shape_cast %40 : vector<1x16x1x16x128xf32> to vector<16x16x128xf32>
    %42 = vector.shape_cast %39 : vector<16x16x128xf32> to vector<1x16x1x16x128xf32>
    tpu.vector_store %arg5[%c0_35, %c0_36, %c0_37, %c0_38, %c0_39], %42 {strides = array<i32>} : memref<1x16x2x16x128xf32, #tpu.memory_space<vmem>>, vector<1x16x1x16x128xf32>,
    %43 = vector.extract_strided_slice %38 {offsets = [0, 0, 128], sizes = [16, 16, 128], strides = [1, 1, 1]} : vector<16x16x256xf32> to vector<16x16x128xf32>
    %c0_40 = arith.constant 0 : index
    %c0_41 = arith.constant 0 : index
    %c1_42 = arith.constant 1 : index
    %c0_43 = arith.constant 0 : index
    %c0_44 = arith.constant 0 : index
    %44 = vector.load %arg5[%c0_40, %c0_41, %c1_42, %c0_43, %c0_44] : memref<1x16x2x16x128xf32, #tpu.memory_space<vmem>>, vector<1x16x1x16x128xf32>
    %45 = vector.shape_cast %44 : vector<1x16x1x16x128xf32> to vector<16x16x128xf32>
    %46 = vector.shape_cast %43 : vector<16x16x128xf32> to vector<1x16x1x16x128xf32>
    tpu.vector_store %arg5[%c0_40, %c0_41, %c1_42, %c0_43, %c0_44], %46 {strides = array<i32>} : memref<1x16x2x16x128xf32, #tpu.memory_space<vmem>>, vector<1x16x1x16x128xf32>,
    return
  }
  func.func @transform_0(%arg0: i32, %arg1: i32) -> (i32, i32, i32, i32) {
    %c0_i32 = arith.constant 0 : i32
    %c0_i32_0 = arith.constant 0 : i32
    %c0_i32_1 = arith.constant 0 : i32
    %c0_i32_2 = arith.constant 0 : i32
    return %arg0, %c0_i32, %c0_i32_0, %c0_i32_1 : i32, i32, i32, i32
  }
  func.func @transform_1(%arg0: i32, %arg1: i32) -> (i32, i32) {
    %c0_i32 = arith.constant 0 : i32
    %c0_i32_0 = arith.constant 0 : i32
    %c0_i32_1 = arith.constant 0 : i32
    return %c0_i32, %c0_i32_0 : i32, i32
  }
  func.func @transform_2(%arg0: i32, %arg1: i32) -> (i32, i32) {
    %c0_i32 = arith.constant 0 : i32
    %c0_i32_0 = arith.constant 0 : i32
    %c0_i32_1 = arith.constant 0 : i32
    return %c0_i32, %c0_i32_0 : i32, i32
  }
  func.func @transform_3(%arg0: i32, %arg1: i32) -> (i32, i32, i32, i32, i32) {
    %c0_i32 = arith.constant 0 : i32
    %c0_i32_0 = arith.constant 0 : i32
    %c0_i32_1 = arith.constant 0 : i32
    %c0_i32_2 = arith.constant 0 : i32
    return %arg0, %arg1, %c0_i32, %c0_i32_0, %c0_i32_1 : i32, i32, i32, i32, i32
  }
}

</mosaic_0001>

<bundles_post_ra>
// kernel: tpu_custom_call.1
= control target key start
LH: loop header
LB: loop body
LE: loop exit
PB: predicated region body
PF: predicated region fallthrough
CT: control target
= control target key end

     0   :  { %8 = vsyncpa [#allocation3], 0  ;;  %s5888_s0 = inlined_call_operand.vmem [shape: bf16[2,18,18,64], index: 0, kind: input, shape index: {}]   ;;  %s5889_s1 = inlined_call_operand.vmem [shape: bf16[576,256], index: 1, kind: input, shape index: {}]   ;;  %s5890_s2 = inlined_call_operand.vmem [shape: f32[1,256], index: 2, kind: input, shape index: {}]   ;;  %s5891_s3 = inlined_call_operand.hbm [shape: f32[2,16,2,16,128], index: 3, kind: output, shape index: {}]  }
   0x1   :  { %10 = vsyncpa [#allocation3 + $0x1], 0  ;;  %s4210_s12 = smov 0   ;;  %s4212_s13 = smov 0  }
   0x2   :  { %s4214_s14 = smov 0   ;;  %s4216_s15 = smov 0  }
   0x3   :  { %s4218_s16 = smov 0   ;;  %s4220_s17 = smov 0  }
   0x4 LB: > { %s3292_s18 = sadd.s32 4294967295, %s4183_s17   ;;  %s3293_s19 = sadd.s32 4294967294, %s4183_s17   ;;  %s4183_s17 = sphi %s4220_s17, %s16_s17   ;;  %s4179_s16 = sphi %s4218_s16, %s6030_s16   ;;  %s4175_s15 = sphi %s4216_s15, %s6029_s15   ;;  %s4171_s14 = sphi %s4214_s14, %s6028_s14   ;;  %s4167_s13 = sphi %s4212_s13, %s6027_s13   ;;  %s4163_s12 = sphi %s4210_s12, %s6026_s12  }
   0x5   : > { %s28_s20 = sadd.s32 1, %s4179_s16  ;;  %s105_s21 = sadd.s32 1, %s4171_s14 }
   0x6   : > { %p30_p0 = scmp.ge.s32.totalorder %s28_s20, 2  ;;  %p115_p1 = scmp.ne.s32.totalorder %s4171_s14, %s4167_s13 }
   0x7   : > { %p116_p2 = scmp.eq.s32.totalorder %s3292_s18, 1  ;;  %p121_p3 = scmp.ne.s32.totalorder %s4167_s13, %s4163_s12 }
   0x8   : > { %s6032_s20 = smov (%p30_p0, %s28_s20), 0  ;;  %p122_p5 = scmp.eq.s32.totalorder %s3293_s19, 1 }
   0x9   : > { %p4250_p4 = por %p116_p2, %p115_p1  ;;  %s100_s23 = ssub.s32 %s4179_s16, %s6032_s20 }
   0xa   : > { %p3296_p6 = scmp.ge.s32.totalorder %s4183_s17, 1  ;;  %p103_p7 = scmp.eq.s32.totalorder %s100_s23, 0 }
   0xb   : > { %p4257_p8 = por %p122_p5, %p121_p3  ;;  %p154_p9 = scmp.lt.s32.totalorder %s4183_s17, 3 }
   0xc   : > { %s4263_s25 = scalar_select %p103_p7, %s4171_s14, %s105_s21  }
   0xd   : > { %p155_p10 = pnand %p3296_p6, %p154_p9 }
   0xf   : > { %158 = sbr.rel (%p155_p10) target bundleno = 563 (0x233), region = 32 }
  0x14   : > { %p178_p11 = scmp.lt.s32.totalorder %s4175_s15, 1  ;;  %v3845_v0 = vld [vmem:[%s5889_s1 + $0x74] ss:$8 sps:$4 sm:$0xff]   ;;  %v3847_v1 = vld [vmem:[%s5889_s1 + $0x70] ss:$8 sps:$4 sm:$0xff]   ;;  %s4185_s28 = smov 64  }
  0x15   : > { %v3852_v2 = vld [vmem:[%s5889_s1 + $0x64] ss:$8 sps:$4 sm:$0xff]   ;;  %3697 = vmatprep.subr.bf16.mxu1 %v3845_v0  ;;  %2484 = vmatprep.subr.bf16.mxu0 %v3845_v0  ;;  %v3854_v3 = vld [vmem:[%s5889_s1 + $0x60] ss:$8 sps:$4 sm:$0xff]   ;;  %v3859_v4 = vld [vmem:[%s5889_s1 + $0x54] ss:$8 sps:$4 sm:$0xff]  }
  0x16   : > { %s179_s30 = scalar_select %p178_p11, %s4175_s15, 1  ;;  %3713 = vmatpush1.bf16.msra.mxu1 %v3847_v1  ;;  %2485 = vmatpush1.bf16.msra.mxu0 %v3847_v1  ;;  %v3861_v7 = vld [vmem:[%s5889_s1 + $0x50] ss:$8 sps:$4 sm:$0xff]   ;;  %v3862_v11 = vld [vmem:[%s5889_s1 + $0x44] ss:$8 sps:$4 sm:$0xff]   ;;  %vm790_vm1 = vcmask 1046528  }
  0x17   : > { %3698 = vmatprep.subr.bf16.mxu1 %v3852_v2  ;;  %2486 = vmatprep.subr.bf16.mxu0 %v3852_v2  ;;  %vm517_vm0 = vsmask.f32 7424  ;;  %v3866_v19 = vld [vmem:[%s5889_s1 + $0x40] ss:$8 sps:$4 sm:$0xff]   ;;  %v3868_v25 = vld [vmem:[%s5889_s1 + $0x34] ss:$8 sps:$4 sm:$0xff]  }
  0x18   : > { %s3729_s6 = smul.u32 216, %s179_s30  ;;  %v3870_v29 = vld [vmem:[%s5889_s1 + $0x30] ss:$8 sps:$4 sm:$0xff]   ;;  %vm1767_vm2 = vcmask 523264   ;;  %s175_s11 = sand.u32 1, %s4167_s13  }
  0x19   : > { %s3297_s18 = sshll.u32 %s175_s11, 9  ;;  %s3696_s23 = sshll.u32 %s4175_s15, 13 }
  0x1a   : > { %s4285_s19 = scalar_lea.vmem %s5888_s0, %s3729_s6  ;;  %3714 = vmatpush1.bf16.msra.mxu1 %v3854_v3  ;;  %2487 = vmatpush1.bf16.msra.mxu0 %v3854_v3  ;;  %s5650_s21 = scalar_lea.vmem [#allocation2], %s3297_s18 }
  0x1b   : > { %v3315_v5 = vld [vmem:[%s4285_s19 + $0x6c] sm:$0xf]  ;;  %v3316_v6 = vld [vmem:[%s4285_s19 + $0x70] sm:$0xf]  ;;  %v205_v13 = vld [vmem:[%s4285_s19 + $0x60] sm:$0xf]  ;;  %3699 = vmatprep.subr.bf16.mxu1 %v3859_v4  ;;  %2488 = vmatprep.subr.bf16.mxu0 %v3859_v4  ;;  %s5835_s30 = scalar_lea.hbm %s5891_s3, %s3696_s23 }
  0x1c   : > { %v4292_v8 = vcombine.low %v3315_v5, %v3316_v6  ;;  %v3299_v9 = vld [vmem:[%s4285_s19 + $0xc] sm:$0xf]  ;;  %v4296_v10 = vld [vmem:[%s4285_s19 + $0x10] sm:$0xf]  ;;  %v206_v14 = vld [vmem:[%s4285_s19 + $0x64] sm:$0xf] }
  0x1d   : > { %v4302_v12 = vcombine.low %v3299_v9, %v4296_v10  ;;  %v4308_v15 = vcombine.low %v205_v13, %v206_v14  ;;  %v3794_v16 = vld [vmem:[%s4285_s19 + $0x68] ss:$0 sps:$4 sm:$0x11]   ;;  %v189_v17 = vld [vmem:[%s4285_s19] sm:$0xf]  ;;  %s3209_s26 = sshll.u32 %s5650_s21, 4  ;;  %s5837_s26 = int_to_ptr.vmem [resolvable:$true] %s3209_s26 }
  0x1e   : > { %935 = vrot.lane.b32.xlu0 %v4292_v8, %s4185_s28  ;;  %v190_v18 = vld [vmem:[%s4285_s19 + $0x4] sm:$0xf]  ;;  %v622_v22 = vshll.u32 %v3794_v16, 16  ;;  %3715 = vmatpush1.bf16.msra.mxu1 %v3861_v7  ;;  %v3796_v24 = vld [vmem:[%s4285_s19 + $0x8] ss:$0 sps:$4 sm:$0x11]  }
  0x1f   : > { %919 = vrot.lane.b32.xlu1 %v4302_v12, %s4185_s28  ;;  %v615_v20 = vshrl.u32 %v4308_v15, 16  ;;  %v617_v21 = vshll.u32 %v4308_v15, 16  ;;  %2489 = vmatpush1.bf16.msra.mxu0 %v3861_v7  ;;  %v4320_v23 = vcombine.low %v189_v17, %v190_v18  ;;  %v3317_v28 = vld [vmem:[%s4285_s19 + $0x78] sm:$0xf]  ;;  %v526_v32 = vshll.u32 %v3796_v24, 16  ;;  %s5843_s15 = scalar_lea.sflag [#allocation3], %s175_s11 }
  0x20   : > { %3700 = vmatprep.subr.bf16.mxu1 %v3862_v11  ;;  %2490 = vmatprep.subr.bf16.mxu0 %v3862_v11  ;;  %v624_v27 = vrot.slane %v622_v22, 1  ;;  %v207_v33 = vld [vmem:[%s4285_s19 + $0x6c] sm:$0xf]  ;;  %v3318_v35 = vld [vmem:[%s4285_s19 + $0x7c] sm:$0xf]  ;;  %s4107_s4 = scalar_lea.vmem %s5837_s26, 8192 }
  0x21   : > { %v619_v26 = vrot.slane %v617_v21, 1  ;;  %v519_v30 = vshrl.u32 %v4320_v23, 16  ;;  %v521_v31 = vshll.u32 %v4320_v23, 16  ;;  %v208_v36 = vld [vmem:[%s4285_s19 + $0x70] sm:$0xf]  ;;  %v528_v38 = vrot.slane %v526_v32, 1  ;;  %p4108_p12 = scmp.ne.s32.totalorder %s5837_s26, %s4107_s4 }
  0x22   : > { %3716 = vmatpush1.bf16.msra.mxu1 %v3866_v19  ;;  %v4336_v40 = vcombine.low %v207_v33, %v208_v36  ;;  %v3800_v41 = vld [vmem:[%s4285_s19 + $0x74] ss:$0 sps:$4 sm:$0x11]   ;;  %v3301_v42 = vld [vmem:[%s4285_s19 + $0x18] sm:$0xf]  ;;  %v4344_v45 = vcombine.low %v3317_v28, %v3318_v35  ;;  %s4187_s5 = smov [#allocation2]  }
  0x23   : > { %v620_v34 = vor.u32 %v619_v26, %v615_v20  ;;  %2491 = vmatpush1.bf16.msra.mxu0 %v3866_v19  ;;  %v523_v37 = vrot.slane %v521_v31, 1  ;;  %3701 = vmatprep.subr.bf16.mxu1 %v3868_v25  ;;  %v4341_v43 = vld [vmem:[%s4285_s19 + $0x1c] sm:$0xf]  ;;  %v191_v46 = vld [vmem:[%s4285_s19 + $0xc] sm:$0xf]  ;;  %v634_v50 = vshll.u32 %v3800_v41, 16  ;;  %p4109_p13 = pnand %p4108_p12, %p4250_p4 }
  0x24   : > { %2492 = vmatprep.subr.bf16.mxu0 %v3868_v25  ;;  %v192_v47 = vld [vmem:[%s4285_s19 + $0x10] sm:$0xf]  ;;  %v627_v48 = vshrl.u32 %v4336_v40, 16  ;;  %v629_v49 = vshll.u32 %v4336_v40, 16  ;;  %v3319_v56 = vld [vmem:[%s4285_s19 + $0x84] sm:$0xf]  ;;  %v4360_v58 = vcombine.low %v3301_v42, %v4341_v43 }
  0x25   : > { %v625_v39 = vsel %vm517_vm0, %v620_v34, %v624_v27  ;;  %v524_v44 = vor.u32 %v523_v37, %v519_v30  ;;  %v4351_v52 = vcombine.low %v191_v46, %v192_v47  ;;  %v3804_v53 = vld [vmem:[%s4285_s19 + $0x14] ss:$0 sps:$4 sm:$0x11]   ;;  %v636_v55 = vrot.slane %v634_v50, 1  ;;  %v3320_v57 = vld [vmem:[%s4285_s19 + $0x88] sm:$0xf]  ;;  %p4110_p0 = pneg %p4109_p13 }
  0x26   : > { %726 = vrot.lane.b32.xlu0 %v625_v39, %s4185_s28  ;;  %3717 = vmatpush1.bf16.msra.mxu1 %v3870_v29  ;;  %v631_v54 = vrot.slane %v629_v49, 1  ;;  %v538_v61 = vshll.u32 %v3804_v53, 16  ;;  %v209_v62 = vld [vmem:[%s4285_s19 + $0x78] sm:$0xf]  ;;  %v210_v0 = vld [vmem:[%s4285_s19 + $0x7c] sm:$0xf]  ;;  %v4370_v6 = vcombine.low %v3319_v56, %v3320_v57 }
  0x27   : > { %2493 = vmatpush1.bf16.msra.mxu0 %v3870_v29  ;;  %v529_v51 = vsel %vm517_vm0, %v524_v44, %v528_v38  ;;  %v531_v59 = vshrl.u32 %v4351_v52, 16  ;;  %v533_v60 = vshll.u32 %v4351_v52, 16  ;;  %v4366_v3 = vcombine.low %v209_v62, %v210_v0  ;;  %v3808_v4 = vld [vmem:[%s4285_s19 + $0x80] ss:$0 sps:$4 sm:$0x11]   ;;  %s4111_s6 = sshll.u32 %s4187_s5, 4  ;;  %s4112_s6 = int_to_ptr.vmem [resolvable:$false] %s4111_s6 }
  0x28   : > { %710 = vrot.lane.b32.xlu1 %v529_v51, %s4185_s28  ;;  %v632_v63 = vor.u32 %v631_v54, %v627_v48  ;;  %v540_v2 = vrot.slane %v538_v61, 1  ;;  %v3303_v7 = vld [vmem:[%s4285_s19 + $0x24] sm:$0xf]  ;;  %v4374_v9 = vld [vmem:[%s4285_s19 + $0x28] sm:$0xf]  ;;  %v646_v16 = vshll.u32 %v3808_v4, 16  ;;  %p4114_p1 = scmp.lt.s32.totalorder %s5837_s26, %s4112_s6 }
  0x29   : > { %v535_v1 = vrot.slane %v533_v60, 1  ;;  %v639_v13 = vshrl.u32 %v4366_v3, 16  ;;  %v641_v14 = vshll.u32 %v4366_v3, 16  ;;  %v193_v17 = vld [vmem:[%s4285_s19 + $0x18] sm:$0xf]  ;;  %v4388_v25 = vcombine.low %v3303_v7, %v4374_v9  ;;  %s4113_s7 = scalar_lea.vmem %s4112_s6, 16384 }
  0x2a   : > { %937 = vrot.lane.b32.xlu0 %v4344_v45, %s4185_s28  ;;  %v637_v5 = vsel %vm517_vm0, %v632_v63, %v636_v55  ;;  %v194_v18 = vld [vmem:[%s4285_s19 + $0x1c] sm:$0xf]  ;;  %v648_v21 = vrot.slane %v646_v16, 1  ;;  %v3812_v24 = vld [vmem:[%s4285_s19 + $0x20] ss:$0 sps:$4 sm:$0x11]   ;;  %p4115_p2 = scmp.lt.s32.totalorder %s4113_s7, %s4107_s4 }
  0x2b   : > { %v536_v11 = vor.u32 %v535_v1, %v531_v59  ;;  %v643_v20 = vrot.slane %v641_v14, 1  ;;  %v4384_v22 = vcombine.low %v193_v17, %v194_v18  ;;  %v550_v29 = vshll.u32 %v3812_v24, 16  ;;  %v3321_v30 = vld [vmem:[%s4285_s19 + $0x90] sm:$0xf]  ;;  %v3322_v31 = vld [vmem:[%s4285_s19 + $0x94] sm:$0xf] }
  0x2c   : > { %728 = vrot.lane.b32.xlu1 %v637_v5, %s4185_s28  ;;  %v211_v32 = vld [vmem:[%s4285_s19 + $0x84] sm:$0xf]  ;;  %v212_v33 = vld [vmem:[%s4285_s19 + $0x88] sm:$0xf]  ;;  %v4406_v41 = vcombine.low %v3321_v30, %v3322_v31  ;;  %v3305_v46 = vld [vmem:[%s4285_s19 + $0x30] sm:$0xf]  ;;  %p4116_p3 = por %p4115_p2, %p4114_p1 }
  0x2d   : > { %v541_v19 = vsel %vm517_vm0, %v536_v11, %v540_v2  ;;  %v644_v26 = vor.u32 %v643_v20, %v639_v13  ;;  %v543_v27 = vshrl.u32 %v4384_v22, 16  ;;  %v545_v28 = vshll.u32 %v4384_v22, 16  ;;  %v3816_v38 = vld [vmem:[%s4285_s19 + $0x8c] ss:$0 sps:$4 sm:$0x11]  }
  0x2e   : > { %921 = vrot.lane.b32.xlu0 %v4360_v58, %s4185_s28  ;;  %v552_v36 = vrot.slane %v550_v29, 1  ;;  %v4400_v37 = vcombine.low %v211_v32, %v212_v33  ;;  %v4412_v47 = vld [vmem:[%s4285_s19 + $0x34] sm:$0xf]  ;;  %v658_v48 = vshll.u32 %v3816_v38, 16  ;;  %v195_v49 = vld [vmem:[%s4285_s19 + $0x24] sm:$0xf]  ;;  %p4117_p5 = pnand %p4116_p3, %p4110_p0 }
  0x2f   : > { %v649_v34 = vsel %vm517_vm0, %v644_v26, %v648_v21  ;;  %v547_v35 = vrot.slane %v545_v28, 1  ;;  %v196_v50 = vld [vmem:[%s4285_s19 + $0x28] sm:$0xf]  ;;  %v3820_v55 = vld [vmem:[%s4285_s19 + $0x2c] ss:$0 sps:$4 sm:$0x11]   ;;  %v4421_v57 = vcombine.low %v3305_v46, %v4412_v47 }
  0x30   : > { %712 = vrot.lane.b32.xlu1 %v541_v19, %s4185_s28  ;;  %v651_v42 = vshrl.u32 %v4400_v37, 16  ;;  %v653_v44 = vshll.u32 %v4400_v37, 16  ;;  %v4417_v54 = vcombine.low %v195_v49, %v196_v50  ;;  %v660_v56 = vrot.slane %v658_v48, 1  ;;  %v3323_v63 = vld [vmem:[%s4285_s19 + $0x9c] sm:$0xf] }
  0x31   : > { %v548_v39 = vor.u32 %v547_v35, %v543_v27  ;;  %5927 = vst [vmem:[#allocation5_spill] sm:$0xff] %v4421_v57  ;;  %v562_v62 = vshll.u32 %v3820_v55, 16  ;;  %v3324_v0 = vld [vmem:[%s4285_s19 + $0xa0] sm:$0xf]  ;;  %v213_v1 = vld [vmem:[%s4285_s19 + $0x90] sm:$0xf] }
  0x32   : > { %939 = vrot.lane.b32.xlu0 %v4370_v6, %s4185_s28  ;;  %v655_v53 = vrot.slane %v653_v44, 1  ;;  %v555_v60 = vshrl.u32 %v4417_v54, 16  ;;  %v557_v61 = vshll.u32 %v4417_v54, 16  ;;  %v214_v7 = vld [vmem:[%s4285_s19 + $0x94] sm:$0xf]  ;;  %v4439_v16 = vcombine.low %v3323_v63, %v3324_v0 }
  0x33   : > { %v553_v51 = vsel %vm517_vm0, %v548_v39, %v552_v36  ;;  %v564_v5 = vrot.slane %v562_v62, 1  ;;  %v4433_v11 = vcombine.low %v213_v1, %v214_v7  ;;  %v3824_v13 = vld [vmem:[%s4285_s19 + $0x98] ss:$0 sps:$4 sm:$0x11]   ;;  %v3307_v17 = vld [vmem:[%s4285_s19 + $0x3c] sm:$0xf] }
  0x34   : > { %730 = vrot.lane.b32.xlu1 %v649_v34, %s4185_s28  ;;  %v656_v59 = vor.u32 %v655_v53, %v651_v42  ;;  %v559_v4 = vrot.slane %v557_v61, 1  ;;  %v670_v20 = vshll.u32 %v3824_v13, 16  ;;  %v4445_v21 = vld [vmem:[%s4285_s19 + $0x40] sm:$0xf]  ;;  %v197_v26 = vld [vmem:[%s4285_s19 + $0x30] sm:$0xf] }
  0x35   : > { %v663_v18 = vshrl.u32 %v4433_v11, 16  ;;  %v665_v19 = vshll.u32 %v4433_v11, 16  ;;  %v198_v27 = vld [vmem:[%s4285_s19 + $0x34] sm:$0xf]  ;;  %v4457_v32 = vcombine.low %v3307_v17, %v4445_v21  ;;  %v3325_v33 = vld [vmem:[%s4285_s19 + $0xa8] sm:$0xf] }
  0x36   : > { %923 = vrot.lane.b32.xlu0 %v4388_v25, %s4185_s28  ;;  %v661_v2 = vsel %vm517_vm0, %v656_v59, %v660_v56  ;;  %v560_v14 = vor.u32 %v559_v4, %v555_v60  ;;  %v672_v29 = vrot.slane %v670_v20, 1  ;;  %v4450_v30 = vcombine.low %v197_v26, %v198_v27  ;;  %v3828_v31 = vld [vmem:[%s4285_s19 + $0x38] ss:$0 sps:$4 sm:$0x11]   ;;  %v3326_v39 = vld [vmem:[%s4285_s19 + $0xac] sm:$0xf] }
  0x37   : > { %v667_v28 = vrot.slane %v665_v19, 1  ;;  %5928 = vst [vmem:[#allocation6_spill] sm:$0xff] %v4457_v32  ;;  %v574_v38 = vshll.u32 %v3828_v31, 16  ;;  %v215_v42 = vld [vmem:[%s4285_s19 + $0x9c] sm:$0xf] }
  0x38   : > { %714 = vrot.lane.b32.xlu1 %v553_v51, %s4185_s28  ;;  %v565_v24 = vsel %vm517_vm0, %v560_v14, %v564_v5  ;;  %v567_v35 = vshrl.u32 %v4450_v30, 16  ;;  %v569_v36 = vshll.u32 %v4450_v30, 16  ;;  %v216_v44 = vld [vmem:[%s4285_s19 + $0xa0] sm:$0xf]  ;;  %v4471_v51 = vcombine.low %v3325_v33, %v3326_v39  ;;  %v3309_v60 = vld [vmem:[%s4285_s19 + $0x48] sm:$0xf] }
  0x39   : > { %v668_v34 = vor.u32 %v667_v28, %v663_v18  ;;  %v576_v49 = vrot.slane %v574_v38, 1  ;;  %v4466_v50 = vcombine.low %v215_v42, %v216_v44  ;;  %v3832_v53 = vld [vmem:[%s4285_s19 + $0xa4] ss:$0 sps:$4 sm:$0x11]   ;;  %v4478_v61 = vld [vmem:[%s4285_s19 + $0x4c] sm:$0xf] }
  0x3a   : > { %941 = vrot.lane.b32.xlu0 %v4406_v41, %s4185_s28  ;;  %v571_v48 = vrot.slane %v569_v36, 1  ;;  %v682_v62 = vshll.u32 %v3832_v53, 16  ;;  %v199_v63 = vld [vmem:[%s4285_s19 + $0x3c] sm:$0xf]  ;;  %v200_v0 = vld [vmem:[%s4285_s19 + $0x40] sm:$0xf]  ;;  %v4490_v13 = vcombine.low %v3309_v60, %v4478_v61 }
  0x3b   : > { %v673_v46 = vsel %vm517_vm0, %v668_v34, %v672_v29  ;;  %v675_v56 = vshrl.u32 %v4466_v50, 16  ;;  %v677_v59 = vshll.u32 %v4466_v50, 16  ;;  %v4483_v4 = vcombine.low %v199_v63, %v200_v0  ;;  %v3836_v5 = vld [vmem:[%s4285_s19 + $0x44] ss:$0 sps:$4 sm:$0x11]  }
  0x3c   : > { %732 = vrot.lane.b32.xlu1 %v661_v2, %s4185_s28  ;;  %v572_v55 = vor.u32 %v571_v48, %v567_v35  ;;  %v684_v7 = vrot.slane %v682_v62, 1  ;;  %5929 = vst [vmem:[#allocation7_spill] sm:$0xff] %v4490_v13  ;;  %v3327_v14 = vld [vmem:[%s4285_s19 + $0xb4] sm:$0xf]  ;;  %v586_v20 = vshll.u32 %v3836_v5, 16 }
  0x3d   : > { %v679_v2 = vrot.slane %v677_v59, 1  ;;  %v579_v18 = vshrl.u32 %v4483_v4, 16  ;;  %v581_v19 = vshll.u32 %v4483_v4, 16  ;;  %v217_v26 = vld [vmem:[%s4285_s19 + $0xa8] sm:$0xf] }
  0x3e   : > { %925 = vrot.lane.b32.xlu0 %v4421_v57, %s4185_s28  ;;  %v577_v1 = vsel %vm517_vm0, %v572_v55, %v576_v49  ;;  %v588_v29 = vrot.slane %v586_v20, 1  ;;  %v218_v31 = vld [vmem:[%s4285_s19 + $0xac] sm:$0xf]  ;;  %v3840_v35 = vld [vmem:[%s4285_s19 + $0xb0] ss:$0 sps:$4 sm:$0x11]  }
  0x3f   : > { %v680_v17 = vor.u32 %v679_v2, %v675_v56  ;;  %v583_v28 = vrot.slane %v581_v19, 1  ;;  %v4504_v34 = vcombine.low %v217_v26, %v218_v31  ;;  %v3311_v38 = vld [vmem:[%s4285_s19 + $0x54] sm:$0xf]  ;;  %v4509_v39 = vld [vmem:[%s4285_s19 + $0x58] sm:$0xf] }
  0x40   : > { %716 = vrot.lane.b32.xlu1 %v565_v24, %s4185_s28  ;;  %v3328_v24 = vld [vmem:[%s4285_s19 + $0xb8] sm:$0xf]  ;;  %v201_v48 = vld [vmem:[%s4285_s19 + $0x48] sm:$0xf]  ;;  %v202_v53 = vld [vmem:[%s4285_s19 + $0x4c] sm:$0xf]  ;;  %v4521_v60 = vcombine.low %v3311_v38, %v4509_v39 }
  0x41   : > { %v685_v27 = vsel %vm517_vm0, %v680_v17, %v684_v7  ;;  %v4502_v33 = vcombine.low %v3327_v14, %v3328_v24  ;;  %v584_v36 = vor.u32 %v583_v28, %v579_v18  ;;  %v687_v42 = vshrl.u32 %v4504_v34, 16  ;;  %v3329_v55 = vld [vmem:[%s4285_s19 + $0xc0] sm:$0xf]  ;;  %v3844_v63 = vld [vmem:[%s4285_s19 + $0x50] ss:$0 sps:$4 sm:$0x11]  }
  0x42   : > { %943 = vrot.lane.b32.xlu0 %v4439_v16, %s4185_s28  ;;  %v689_v44 = vshll.u32 %v4504_v34, 16  ;;  %5930 = vst [vmem:[#allocation8_spill] sm:$0xff] %v4521_v60  ;;  %v4523_v62 = vcombine.low %v201_v48, %v202_v53  ;;  %v3330_v0 = vld [vmem:[%s4285_s19 + $0xc4] sm:$0xf]  ;;  %v598_v14 = vshll.u32 %v3844_v63, 16 }
  0x43   : > { %v589_v49 = vsel %vm517_vm0, %v584_v36, %v588_v29  ;;  %v219_v17 = vld [vmem:[%s4285_s19 + $0xb4] sm:$0xf]  ;;  %v4531_v18 = vcombine.low %v3329_v55, %v3330_v0  ;;  %v220_v19 = vld [vmem:[%s4285_s19 + $0xb8] sm:$0xf]  ;;  %v3313_v29 = vld [vmem:[%s4285_s19 + $0x60] sm:$0xf] }
  0x44   : > { %734 = vrot.lane.b32.xlu1 %v673_v46, %s4185_s28  ;;  %v694_v46 = vshll.u32 %v3840_v35, 16  ;;  %v691_v56 = vrot.slane %v689_v44, 1  ;;  %v591_v5 = vshrl.u32 %v4523_v62, 16  ;;  %v593_v7 = vshll.u32 %v4523_v62, 16  ;;  %v4543_v31 = vld [vmem:[%s4285_s19 + $0x64] sm:$0xf] }
  0x45   : > { %v600_v26 = vrot.slane %v598_v14, 1  ;;  %v3851_v28 = vld [vmem:[%s4285_s19 + $0xbc] ss:$0 sps:$4 sm:$0x11]   ;;  %v4550_v48 = vcombine.low %v3313_v29, %v4543_v31  ;;  %v204_v53 = vld [vmem:[%s4285_s19 + $0x58] sm:$0xf] }
  0x46   : > { %927 = vrot.lane.b32.xlu0 %v4457_v32, %s4185_s28  ;;  %v696_v59 = vrot.slane %v694_v46, 1  ;;  %v692_v2 = vor.u32 %v691_v56, %v687_v42  ;;  %v595_v24 = vrot.slane %v593_v7, 1  ;;  %v706_v42 = vshll.u32 %v3851_v28, 16  ;;  %v3348_v46 = vld [vmem:[%s4285_s19 + $0x18] sm:$0xe] }
  0x47   : > { %5932 = vst [vmem:[#allocation10_spill] sm:$0xff] %v4550_v48  ;;  %v3363_v0 = vld [vmem:[%s4285_s19 + $0x18] sm:$0xf]  ;;  %v3364_v14 = vld [vmem:[%s4285_s19 + $0x1c] sm:$0xf] }
  0x48   : > { %718 = vrot.lane.b32.xlu1 %v577_v1, %s4185_s28  ;;  %v3347_v1 = vld [vmem:[%s4285_s19 + $0xc] sm:$0xe]  ;;  %v697_v20 = vsel %vm517_vm0, %v692_v2, %v696_v59  ;;  %v596_v35 = vor.u32 %v595_v24, %v591_v5  ;;  %v708_v59 = vrot.slane %v706_v42, 1  ;;  %v3349_v29 = vld [vmem:[%s4285_s19 + $0x24] sm:$0xe] }
  0x49   : > { %v3507_v44 = vcombine.low %v3347_v1, %v4296_v10  ;;  %v3858_v10 = vld [vmem:[%s4285_s19 + $0x5c] ss:$0 sps:$4 sm:$0x11]   ;;  %v3508_v1 = vcombine.low %v3348_v46, %v4341_v43  ;;  %v3867_v43 = vld [vmem:[%s4285_s19 + $0x14] ss:$0 sps:$4 sm:$0x11]  }
  0x4a   : > { %945 = vrot.lane.b32.xlu0 %v4471_v51, %s4185_s28  ;;  %v601_v55 = vsel %vm517_vm0, %v596_v35, %v600_v26  ;;  %v4053_v57 = vld [vmem:[%s4285_s19 + $0x94] sm:$0xf] }
  0x4b   : > { %v1239_v24 = vrot.slane %v3507_v44, 1  ;;  %v3871_v44 = vld [vmem:[%s5889_s1 + $0x24] ss:$8 sps:$4 sm:$0xff]  }
  0x4c   : > { %736 = vrot.lane.b32.xlu1 %v685_v27, %s4185_s28  ;;  %v4537_v27 = vcombine.low %v219_v17, %v220_v19  ;;  %v610_v17 = vshll.u32 %v3858_v10, 16  ;;  %v4566_v19 = vcombine.low %v3363_v0, %v3364_v14  ;;  %3702 = vmatprep.subr.bf16.mxu1 %v3871_v44  ;;  %v3874_v14 = vld [vmem:[%s4285_s19 + $0x2c] ss:$0 sps:$4 sm:$0x11]  }
  0x4d   : > { %2494 = vmatprep.subr.bf16.mxu0 %v3871_v44 }
  0x4e   : > { %929 = vrot.lane.b32.xlu0 %v4490_v13, %s4185_s28  ;;  %5931 = vst [vmem:[#allocation9_spill] sm:$0xff] %v4537_v27  ;;  %v699_v36 = vshrl.u32 %v4537_v27, 16  ;;  %v701_v38 = vshll.u32 %v4537_v27, 16  ;;  %5934 = vst [vmem:[#allocation12_spill] sm:$0xff] %v4566_v19  ;;  %v612_v35 = vrot.slane %v610_v17, 1 }
  0x4f   : > { %v3350_v17 = vld [vmem:[%s4285_s19 + $0x30] sm:$0xe]  ;;  %v4058_v27 = vld [vmem:[%s4285_s19 + $0xa0] sm:$0xf] }
  0x50   : > { %720 = vrot.lane.b32.xlu1 %v589_v49, %s4185_s28  ;;  %v203_v49 = vld [vmem:[%s4285_s19 + $0x54] sm:$0xf]  ;;  %v703_v56 = vrot.slane %v701_v38, 1  ;;  %v1450_v38 = vshll.u32 %v4566_v19, 16 }
  0x51   : > { %v4557_v63 = vcombine.low %v203_v49, %v204_v53  ;;  %v1240_v49 = vrot.slane %v3867_v43, 1  ;;  %v3365_v53 = vld [vmem:[%s4285_s19 + $0x24] sm:$0xf]  ;;  %v3509_v43 = vcombine.low %v3349_v29, %v4374_v9 }
  0x52   : > { %947 = vrot.lane.b32.xlu0 %v4502_v33, %s4185_s28  ;;  %v704_v2 = vor.u32 %v703_v56, %v699_v36  ;;  %v1448_v36 = vshrl.u32 %v4566_v19, 16  ;;  %v1242_v56 = vrot.slane %v3508_v1, 1  ;;  %v3880_v9 = vld [vmem:[%s5889_s1 + $0x4] ss:$8 sps:$4 sm:$0xff]  }
  0x53   : > { %5933 = vst [vmem:[#allocation11_spill] sm:$0xff] %v4557_v63  ;;  %v603_v5 = vshrl.u32 %v4557_v63, 16  ;;  %v605_v7 = vshll.u32 %v4557_v63, 16  ;;  %v4930_v63 = vld [vmem:[%s4285_s19 + $0xac] sm:$0xf] }
  0x54   : > { %738 = vrot.lane.b32.xlu1 %v697_v20, %s4185_s28  ;;  %v3865_v20 = vld [vmem:[%s4285_s19 + $0x20] ss:$0 sps:$4 sm:$0x11]   ;;  %v709_v26 = vsel %vm517_vm0, %v704_v2, %v708_v59  ;;  %v1452_v59 = vrot.slane %v1450_v38, 1  ;;  %v1241_v38 = vsel %vm790_vm1, %v1239_v24, %v1240_v49  ;;  %v3367_v24 = vld [vmem:[%s4285_s19 + $0x30] sm:$0xf] }
  0x55   : > { %v607_v28 = vrot.slane %v605_v7, 1  ;;  %v1455_v42 = vshll.u32 %v3865_v20, 16  ;;  %v3875_v2 = vld [vmem:[%s5889_s1 + $0x20] ss:$8 sps:$4 sm:$0xff]   ;;  %v3368_v49 = vld [vmem:[%s4285_s19 + $0x34] sm:$0xf] }
  0x56   : > { %931 = vrot.lane.b32.xlu0 %v4521_v60, %s4185_s28  ;;  %v1453_v1 = vor.u32 %v1452_v59, %v1448_v36  ;;  %3718 = vmatpush1.bf16.msra.mxu1 %v3875_v2  ;;  %v3879_v36 = vld [vmem:[%s5889_s1 + $0x10] ss:$8 sps:$4 sm:$0xff]   ;;  %v4611_v59 = vcombine.low %v3367_v24, %v3368_v49  ;;  %v3889_v24 = vld [vmem:[%s5889_s1 + $0xe4] ss:$8 sps:$4 sm:$0xff]   ;;  %5948 = vst [vmem:[#allocation26_spill] sm:$0xff] %v4930_v63 }
  0x57   : > { %v608_v46 = vor.u32 %v607_v28, %v603_v5  ;;  %v1457_v0 = vrot.slane %v1455_v42, 1  ;;  %v3351_v5 = vld [vmem:[%s4285_s19 + $0x3c] sm:$0xe]  ;;  %v3876_v28 = vld [vmem:[%s4285_s19 + $0x20] ss:$0 sps:$4 sm:$0x11]   ;;  %2495 = vmatpush1.bf16.msra.mxu0 %v3875_v2 }
  0x58   : > { %722 = vrot.lane.b32.xlu1 %v601_v55, %s4185_s28  ;;  %v3366_v55 = vld [vmem:[%s4285_s19 + $0x28] sm:$0xf]  ;;  %v1467_v42 = vshll.u32 %v3874_v14, 16  ;;  %5936 = vst [vmem:[#allocation14_spill] sm:$0xff] %v4611_v59  ;;  %v3511_v14 = vcombine.low %v3351_v5, %v4445_v21 }
  0x59   : > { %v4582_v10 = vcombine.low %v3365_v53, %v3366_v55  ;;  %v613_v7 = vsel %vm517_vm0, %v608_v46, %v612_v35  ;;  %v3877_v35 = vld [vmem:[%s5889_s1 + $0x14] ss:$8 sps:$4 sm:$0xff]   ;;  %v1458_v44 = vsel %vm517_vm0, %v1453_v1, %v1457_v0  ;;  %v1243_v53 = vrot.slane %v3876_v28, 1  ;;  %v3883_v0 = vld [vmem:[%s4285_s19 + $0x38] ss:$0 sps:$4 sm:$0x11]  }
  0x5a   : > { %949 = vrot.lane.b32.xlu0 %v4531_v18, %s4185_s28  ;;  %v1469_v29 = vrot.slane %v1467_v42, 1  ;;  %3703 = vmatprep.subr.bf16.mxu1 %v3877_v35  ;;  %v3884_v2 = vld [vmem:[%s5889_s1] ss:$8 sps:$4 sm:$0xff]   ;;  %v1474_v42 = vshll.u32 %v4611_v59, 16  ;;  %v1251_v49 = vrot.slane %v3511_v14, 1 }
  0x5b   : > { %5935 = vst [vmem:[#allocation13_spill] sm:$0xff] %v4582_v10  ;;  %v1460_v20 = vshrl.u32 %v4582_v10, 16  ;;  %2496 = vmatprep.subr.bf16.mxu0 %v3877_v35  ;;  %v1244_v1 = vsel %vm790_vm1, %v1242_v56, %v1243_v53  ;;  %3719 = vmatpush1.bf16.msra.mxu1 %v3879_v36  ;;  %v1479_v35 = vshll.u32 %v3883_v0, 16  ;;  %v3888_v56 = vld [vmem:[%s5889_s1 + $0xf0] ss:$8 sps:$4 sm:$0xff]  }
  0x5c   : > { %740 = vrot.lane.b32.xlu1 %v709_v26, %s4185_s28  ;;  %v1462_v26 = vshll.u32 %v4582_v10, 16  ;;  %2497 = vmatpush1.bf16.msra.mxu0 %v3879_v36  ;;  %v3370_v36 = vld [vmem:[%s4285_s19 + $0x40] sm:$0xf]  ;;  %v3892_v53 = vld [vmem:[%s4285_s19 + $0x44] ss:$0 sps:$4 sm:$0x11]  }
  0x5d   : > { %3704 = vmatprep.subr.bf16.mxu1 %v3880_v9  ;;  %2498 = vmatprep.subr.bf16.mxu0 %v3880_v9  ;;  %v1481_v5 = vrot.slane %v1479_v35, 1  ;;  %v3372_v35 = vld [vmem:[%s4285_s19 + $0x4c] sm:$0xf] }
  0x5e   : > { %933 = vrot.lane.b32.xlu0 %v4550_v48, %s4185_s28  ;;  %v1464_v46 = vrot.slane %v1462_v26, 1  ;;  %v3885_v26 = vld [vmem:[%s4285_s19 + $0x2c] ss:$0 sps:$4 sm:$0x11]  }
  0x5f   : > { %v1246_v21 = vrot.slane %v3885_v26, 1  ;;  %3720 = vmatpush1.bf16.msra.mxu1 %v3884_v2  ;;  %v3352_v26 = vld [vmem:[%s4285_s19 + $0x48] sm:$0xe]  ;;  %v3942_v48 = vld [vmem:[%s4285_s19 + $0x80] ss:$0 sps:$4 sm:$0x11]  }
  0x60   : > { %724 = vrot.lane.b32.xlu1 %v613_v7, %s4185_s28  ;;  %v1465_v55 = vor.u32 %v1464_v46, %v1460_v20  ;;  %v3510_v7 = vcombine.low %v3350_v17, %v4412_v47  ;;  %v1245_v20 = vrot.slane %v3509_v43, 1  ;;  %v3886_v47 = vld [vmem:[%s5889_s1 + $0xf4] ss:$8 sps:$4 sm:$0xff]   ;;  %v1476_v17 = vrot.slane %v1474_v42, 1  ;;  %2499 = vmatpush1.bf16.msra.mxu0 %v3884_v2 }
  0x61   : > { %v3369_v43 = vld [vmem:[%s4285_s19 + $0x3c] sm:$0xf]  ;;  %3705 = vmatprep.subr.bf16.mxu1 %v3886_v47  ;;  %2500 = vmatprep.subr.bf16.mxu0 %v3886_v47  ;;  %v3894_v2 = vld [vmem:[%s4285_s19 + $0x38] ss:$0 sps:$4 sm:$0x11]  }
  0x62   : > { %1639 = vrot.lane.b32.xlu0 %v1458_v44, %s4185_s28  ;;  %v1470_v28 = vsel %vm517_vm0, %v1465_v55, %v1469_v29  ;;  %v1247_v44 = vsel %vm790_vm1, %v1245_v20, %v1246_v21  ;;  %v4635_v46 = vcombine.low %v3369_v43, %v3370_v36  ;;  %v1248_v29 = vrot.slane %v3510_v7, 1  ;;  %v3371_v7 = vld [vmem:[%s4285_s19 + $0x48] sm:$0xf]  ;;  %v3901_v21 = vld [vmem:[%s4285_s19 + $0x50] ss:$0 sps:$4 sm:$0x11]  }
  0x63   : > { %3721 = vmatpush2.bf16.msra.mxu1 %v3888_v56  ;;  %v1249_v42 = vrot.slane %v3894_v2, 1  ;;  %v4653_v47 = vcombine.low %v3371_v7, %v3372_v35  ;;  %v3895_v36 = vld [vmem:[%s5889_s1 + $0xd4] ss:$8 sps:$4 sm:$0xff]   ;;  %v3374_v7 = vld [vmem:[%s4285_s19 + $0x58] sm:$0xf] }
  0x64   : > { %1287 = vrot.lane.b32.xlu1 %v1241_v38, %s4185_s28  ;;  %v1472_v38 = vshrl.u32 %v4611_v59, 16  ;;  %5937 = vst [vmem:[#allocation15_spill] sm:$0xff] %v4635_v46  ;;  %v1484_v55 = vshrl.u32 %v4635_v46, 16  ;;  %v1486_v0 = vshll.u32 %v4635_v46, 16  ;;  %2501 = vmatpush2.bf16.msra.mxu0 %v3888_v56 }
  0x65   : > { %3706 = vmatprep.subr.bf16.mxu1 %v3889_v24  ;;  %5938 = vst [vmem:[#allocation16_spill] sm:$0xff] %v4653_v47  ;;  %2502 = vmatprep.subr.bf16.mxu0 %v3889_v24  ;;  %v1250_v43 = vsel %vm790_vm1, %v1248_v29, %v1249_v42  ;;  %v1496_v56 = vshrl.u32 %v4653_v47, 16  ;;  %v3897_v29 = vld [vmem:[%s5889_s1 + $0xd0] ss:$8 sps:$4 sm:$0xff]  }
  0x66   : > { %1641 = vrot.lane.b32.xlu0 %v1470_v28, %s4185_s28  ;;  %v1477_v9 = vor.u32 %v1476_v17, %v1472_v38  ;;  %v3893_v28 = vld [vmem:[%s5889_s1 + $0xe0] ss:$8 sps:$4 sm:$0xff]   ;;  %v1488_v14 = vrot.slane %v1486_v0, 1  ;;  %v3353_v17 = vld [vmem:[%s4285_s19 + $0x54] sm:$0xe] }
  0x67   : > { %v3903_v0 = vld [vmem:[%s4285_s19 + $0x44] ss:$0 sps:$4 sm:$0x11]   ;;  %3722 = vmatpush2.bf16.msra.mxu1 %v3893_v28 }
  0x68   : > { %1289 = vrot.lane.b32.xlu1 %v1244_v1, %s4185_s28  ;;  %v1491_v1 = vshll.u32 %v3892_v53, 16  ;;  %v1482_v20 = vsel %vm517_vm0, %v1477_v9, %v1481_v5  ;;  %v1489_v5 = vor.u32 %v1488_v14, %v1484_v55  ;;  %v1498_v53 = vshll.u32 %v4653_v47, 16  ;;  %v3373_v55 = vld [vmem:[%s4285_s19 + $0x54] sm:$0xf]  ;;  %2503 = vmatpush2.bf16.msra.mxu0 %v3893_v28 }
  0x69   : > { %v1503_v9 = vshll.u32 %v3901_v21, 16  ;;  %3707 = vmatprep.subr.bf16.mxu1 %v3895_v36  ;;  %2504 = vmatprep.subr.bf16.mxu0 %v3895_v36  ;;  %v4677_v14 = vcombine.low %v3373_v55, %v3374_v7  ;;  %v3354_v36 = vld [vmem:[%s4285_s19 + $0x60] sm:$0xe]  ;;  %v3376_v55 = vld [vmem:[%s4285_s19 + $0x64] sm:$0xf] }
  0x6a   : > { %1643 = vrot.lane.b32.xlu0 %v1482_v20, %s4185_s28  ;;  %v1493_v38 = vrot.slane %v1491_v1, 1  ;;  %v3513_v1 = vcombine.low %v3353_v17, %v4509_v39  ;;  %v1500_v2 = vrot.slane %v1498_v53, 1  ;;  %v1252_v20 = vrot.slane %v3903_v0, 1  ;;  %v3902_v39 = vld [vmem:[%s5889_s1 + $0xc0] ss:$8 sps:$4 sm:$0xff]  }
  0x6b   : > { %5939 = vst [vmem:[#allocation17_spill] sm:$0xff] %v4677_v14  ;;  %3723 = vmatpush2.bf16.msra.mxu1 %v3897_v29  ;;  %v1508_v21 = vshrl.u32 %v4677_v14, 16  ;;  %v1510_v17 = vshll.u32 %v4677_v14, 16 }
  0x6c   : > { %1291 = vrot.lane.b32.xlu1 %v1247_v44, %s4185_s28  ;;  %v3512_v44 = vcombine.low %v3352_v26, %v4478_v61  ;;  %v1494_v24 = vsel %vm517_vm0, %v1489_v5, %v1493_v38  ;;  %v3898_v61 = vld [vmem:[%s5889_s1 + $0xc4] ss:$8 sps:$4 sm:$0xff]   ;;  %v1505_v26 = vrot.slane %v1503_v9, 1  ;;  %v3910_v38 = vld [vmem:[%s4285_s19 + $0x5c] ss:$0 sps:$4 sm:$0x11]   ;;  %v1501_v42 = vor.u32 %v1500_v2, %v1496_v56  ;;  %2505 = vmatpush2.bf16.msra.mxu0 %v3897_v29 }
  0x6d   : > { %v1253_v35 = vsel %vm790_vm1, %v1251_v49, %v1252_v20  ;;  %v1515_v5 = vshll.u32 %v3910_v38, 16  ;;  %3708 = vmatprep.subr.bf16.mxu1 %v3898_v61  ;;  %v3904_v49 = vld [vmem:[%s5889_s1 + $0xb4] ss:$8 sps:$4 sm:$0xff]   ;;  %v1257_v53 = vrot.slane %v3513_v1, 1  ;;  %2506 = vmatprep.subr.bf16.mxu0 %v3898_v61  ;;  %v1512_v9 = vrot.slane %v1510_v17, 1 }
  0x6e   : > { %1645 = vrot.lane.b32.xlu0 %v1494_v24, %s4185_s28  ;;  %v1254_v28 = vrot.slane %v3512_v44, 1  ;;  %v1506_v56 = vsel %vm517_vm0, %v1501_v42, %v1505_v26  ;;  %v3375_v44 = vld [vmem:[%s4285_s19 + $0x60] sm:$0xf]  ;;  %v3919_v29 = vld [vmem:[%s4285_s19 + $0x68] ss:$0 sps:$4 sm:$0x11]  }
  0x6f   : > { %v1517_v0 = vrot.slane %v1515_v5, 1  ;;  %v4696_v2 = vcombine.low %v3375_v44, %v3376_v55  ;;  %3724 = vmatpush2.bf16.msra.mxu1 %v3902_v39  ;;  %v3906_v26 = vld [vmem:[%s5889_s1 + $0xb0] ss:$8 sps:$4 sm:$0xff]   ;;  %v3907_v1 = vld [vmem:[%s5889_s1 + $0xa4] ss:$8 sps:$4 sm:$0xff]   ;;  %v1513_v20 = vor.u32 %v1512_v9, %v1508_v21  ;;  %v1527_v42 = vshll.u32 %v3919_v29, 16 }
  0x70   : > { %1293 = vrot.lane.b32.xlu1 %v1250_v43, %s4185_s28  ;;  %v3912_v43 = vld [vmem:[%s4285_s19 + $0x50] ss:$0 sps:$4 sm:$0x11]   ;;  %2507 = vmatpush2.bf16.msra.mxu0 %v3902_v39  ;;  %v3355_v17 = vld [vmem:[%s4285_s19 + $0x6c] sm:$0xe]  ;;  %v3514_v5 = vcombine.low %v3354_v36, %v4543_v31 }
  0x71   : > { %v1255_v24 = vrot.slane %v3912_v43, 1  ;;  %5940 = vst [vmem:[#allocation18_spill] sm:$0xff] %v4696_v2  ;;  %3709 = vmatprep.subr.bf16.mxu1 %v3904_v49  ;;  %v1520_v7 = vshrl.u32 %v4696_v2, 16  ;;  %v1522_v38 = vshll.u32 %v4696_v2, 16  ;;  %2508 = vmatprep.subr.bf16.mxu0 %v3904_v49  ;;  %v1518_v43 = vsel %vm517_vm0, %v1513_v20, %v1517_v0  ;;  %v3911_v39 = vld [vmem:[%s5889_s1 + $0xa0] ss:$8 sps:$4 sm:$0xff]  }
  0x72   : > { %1647 = vrot.lane.b32.xlu0 %v1506_v56, %s4185_s28  ;;  %v1529_v56 = vrot.slane %v1527_v42, 1  ;;  %v245_v36 = vld [vmem:[%s4285_s19 + $0x60] sm:$0xe]  ;;  %v3377_v49 = vld [vmem:[%s4285_s19 + $0x6c] sm:$0xf]  ;;  %v1260_v20 = vrot.slane %v3514_v5, 1 }
  0x73   : > { %v1256_v61 = vsel %vm790_vm1, %v1254_v28, %v1255_v24  ;;  %v3913_v28 = vld [vmem:[%s5889_s1 + $0x94] ss:$8 sps:$4 sm:$0xff]   ;;  %v1524_v21 = vrot.slane %v1522_v38, 1  ;;  %3725 = vmatpush2.bf16.msra.mxu1 %v3906_v26  ;;  %v3378_v44 = vld [vmem:[%s4285_s19 + $0x70] sm:$0xf] }
  0x74   : > { %1295 = vrot.lane.b32.xlu1 %v1253_v35, %s4185_s28  ;;  %v3922_v35 = vld [vmem:[%s4285_s19 + $0x5c] ss:$0 sps:$4 sm:$0x11]   ;;  %2509 = vmatpush2.bf16.msra.mxu0 %v3906_v26  ;;  %v3931_v24 = vld [vmem:[%s4285_s19 + $0x74] ss:$0 sps:$4 sm:$0x11]   ;;  %v4727_v29 = vcombine.low %v3377_v49, %v3378_v44 }
  0x75   : > { %v1258_v31 = vrot.slane %v3922_v35, 1  ;;  %3710 = vmatprep.subr.bf16.mxu1 %v3907_v1  ;;  %v1525_v9 = vor.u32 %v1524_v21, %v1520_v7  ;;  %2510 = vmatprep.subr.bf16.mxu0 %v3907_v1  ;;  %v237_v55 = vld [vmem:[%s4285_s19] sm:$0xe]  ;;  %v1539_v26 = vshll.u32 %v3931_v24, 16  ;;  %v1098_v7 = vshll.u32 %v4292_v8, 16 }
  0x76   : > { %1649 = vrot.lane.b32.xlu0 %v1518_v43, %s4185_s28  ;;  %5941 = vst [vmem:[#allocation19_spill] sm:$0xff] %v4727_v29  ;;  %v3935_v35 = vld [vmem:[%s4285_s19 + $0x68] ss:$0 sps:$4 sm:$0x11]   ;;  %v4042_v1 = vld [vmem:[%s4285_s19 + $0x64] sm:$0xf] }
  0x77   : > { %v1259_v0 = vsel %vm790_vm1, %v1257_v53, %v1258_v31  ;;  %v1530_v42 = vsel %vm517_vm0, %v1525_v9, %v1529_v56  ;;  %3726 = vmatpush2.bf16.msra.mxu1 %v3911_v39  ;;  %v3915_v53 = vld [vmem:[%s5889_s1 + $0x90] ss:$8 sps:$4 sm:$0xff]   ;;  %v3467_v5 = vcombine.low %v245_v36, %v4042_v1  ;;  %v1534_v43 = vshll.u32 %v4727_v29, 16  ;;  %v3916_v21 = vld [vmem:[%s5889_s1 + $0x84] ss:$8 sps:$4 sm:$0xff]  }
  0x78   : > { %1297 = vrot.lane.b32.xlu1 %v1256_v61, %s4185_s28  ;;  %v4041_v61 = vld [vmem:[%s4285_s19 + $0x70] sm:$0xf]  ;;  %2511 = vmatpush2.bf16.msra.mxu0 %v3911_v39  ;;  %v4043_v56 = vld [vmem:[%s4285_s19 + $0x68] ss:$0 sps:$4 sm:$0x11]   ;;  %v1541_v9 = vrot.slane %v1539_v26, 1 }
  0x79   : > { %v3515_v38 = vcombine.low %v3355_v17, %v4041_v61  ;;  %v1532_v17 = vshrl.u32 %v4727_v29, 16  ;;  %3711 = vmatprep.subr.bf16.mxu1 %v3913_v28  ;;  %v816_v31 = vrot.slane %v4043_v56, 1  ;;  %v4044_v49 = vld [vmem:[%s4285_s19 + $0x8] ss:$0 sps:$4 sm:$0x11]   ;;  %2512 = vmatprep.subr.bf16.mxu0 %v3913_v28 }
  0x7a   : > { %1651 = vrot.lane.b32.xlu0 %v1530_v42, %s4185_s28  ;;  %v792_v44 = vrot.slane %v4044_v49, 1  ;;  %v3356_v36 = vld [vmem:[%s4285_s19 + $0x78] sm:$0xe]  ;;  %v4045_v24 = vld [vmem:[%s4285_s19 + $0x4] sm:$0xf]  ;;  %v1536_v42 = vrot.slane %v1534_v43, 1 }
  0x7b   : > { %v3459_v61 = vcombine.low %v237_v55, %v4045_v24  ;;  %v3379_v1 = vld [vmem:[%s4285_s19 + $0x78] sm:$0xf]  ;;  %v3380_v29 = vld [vmem:[%s4285_s19 + $0x7c] sm:$0xf]  ;;  %v1263_v14 = vrot.slane %v3515_v38, 1  ;;  %3727 = vmatpush2.bf16.msra.mxu1 %v3915_v53  ;;  %v1551_v38 = vshll.u32 %v3942_v48, 16 }
  0x7c   : > { %1299 = vrot.lane.b32.xlu1 %v1259_v0, %s4185_s28  ;;  %v1261_v0 = vrot.slane %v3935_v35, 1  ;;  %v4750_v2 = vcombine.low %v3379_v1, %v3380_v29  ;;  %v3920_v26 = vld [vmem:[%s5889_s1 + $0x80] ss:$8 sps:$4 sm:$0xff]   ;;  %v815_v35 = vrot.slane %v3467_v5, 1  ;;  %v3926_v28 = vld [vmem:[%s5889_s1 + $0x174] ss:$8 sps:$4 sm:$0xff]   ;;  %v1537_v55 = vor.u32 %v1536_v42, %v1532_v17  ;;  %2513 = vmatpush2.bf16.msra.mxu0 %v3915_v53 }
  0x7d   : > { %3712 = vmatprep.subr.bf16.mxu1 %v3916_v21  ;;  %2514 = vmatprep.subr.bf16.mxu0 %v3916_v21  ;;  %v791_v43 = vrot.slane %v3459_v61, 1  ;;  %v3929_v5 = vld [vmem:[%s5889_s1 + $0x234] ss:$8 sps:$4 sm:$0xff]   ;;  %v1553_v24 = vrot.slane %v1551_v38, 1  ;;  %v1002_v61 = vshll.u32 %v4302_v12, 16  ;;  %v4775_v42 = vrot.slane %v1098_v7, 1 }
  0x7e   : > { %v1262_v39 = vsel %vm790_vm1, %v1260_v20, %v1261_v0  ;;  %5942 = vst [vmem:[#allocation20_spill] sm:$0xff] %v4750_v2  ;;  %v1544_v29 = vshrl.u32 %v4750_v2, 16  ;;  %v1546_v20 = vshll.u32 %v4750_v2, 16  ;;  %v1542_v56 = vsel %vm517_vm0, %v1537_v55, %v1541_v9  ;;  %v4767_v49 = vld [vmem:[%s4285_s19 + $0x74] ss:$0 sps:$4 sm:$0x11]  }
  0x7f   : > { %v4046_v17 = vld [vmem:[%s4285_s19 + $0x7c] sm:$0xf]  ;;  %1653 = vrot.lane.b32.xlu0 %v1542_v56, %s4185_s28  ;;  %3728 = vmatpush2.bf16.msra.mxu1 %v3920_v26  ;;  %v1264_v9 = vrot.slane %v4767_v49, 1  ;;  %v817_v1 = vsel %vm790_vm1, %v815_v35, %v816_v31  ;;  %v3381_v55 = vld [vmem:[%s4285_s19 + $0x84] sm:$0xf] }
  0x80   : > { %1301 = vrot.lane.b32.xlu1 %v1262_v39, %s4185_s28  ;;  %v3516_v0 = vcombine.low %v3356_v36, %v4046_v17  ;;  %v1548_v53 = vrot.slane %v1546_v20, 1  ;;  %v1110_v36 = vshll.u32 %v4344_v45, 16  ;;  %2515 = vmatpush2.bf16.msra.mxu0 %v3920_v26  ;;  %v793_v20 = vsel %vm790_vm1, %v791_v43, %v792_v44  ;;  %v246_v38 = vld [vmem:[%s4285_s19 + $0x6c] sm:$0xe]  ;;  %v4784_v17 = vld [vmem:[%s4285_s19 + $0x88] sm:$0xf] }
  0x81   : > { %2677 = vmatprep.subr.bf16.mxu1 %v3926_v28  ;;  %2878 = vmatprep.subr.bf16.mxu0 %v3929_v5  ;;  %v1265_v56 = vsel %vm790_vm1, %v1263_v14, %v1264_v9  ;;  %v3357_v7 = vld [vmem:[%s4285_s19 + $0x84] sm:$0xe]  ;;  %v4790_v31 = vcombine.low %v3381_v55, %v4784_v17  ;;  %v4793_v26 = vld [vmem:[%s4285_s19 + $0x8c] ss:$0 sps:$4 sm:$0x11]  }
  0x82   : > { %v1549_v39 = vor.u32 %v1548_v53, %v1544_v29  ;;  %v1266_v44 = vrot.slane %v3516_v0, 1  ;;  %v4798_v14 = vld [vmem:[%s4285_s19 + $0x80] ss:$0 sps:$4 sm:$0x11]   ;;  %v4047_v43 = vld [vmem:[%s4285_s19 + $0x70] sm:$0xf] }
  0x83   : > { %5943 = vst [vmem:[#allocation21_spill] sm:$0xff] %v4790_v31  ;;  %v3468_v5 = vcombine.low %v246_v38, %v4047_v43  ;;  %v1556_v53 = vshrl.u32 %v4790_v31, 16  ;;  %v1558_v0 = vshll.u32 %v4790_v31, 16  ;;  %v1563_v9 = vshll.u32 %v4793_v26, 16  ;;  %v4048_v55 = vld [vmem:[%s4285_s19 + $0x88] sm:$0xf] }
  0x84   : > { %v1554_v21 = vsel %vm517_vm0, %v1549_v39, %v1553_v24  ;;  %1303 = vrot.lane.b32.xlu1 %v1265_v56, %s4185_s28  ;;  %v4804_v24 = vrot.slane %v1002_v61, 1  ;;  %v4810_v39 = vrot.slane %v1110_v36, 1  ;;  %v3383_v56 = vld [vmem:[%s4285_s19 + $0x90] sm:$0xf]  ;;  %v4815_v61 = vld [vmem:[%s4285_s19 + $0x94] sm:$0xf] }
  0x85   : > { %1655 = vrot.lane.b32.xlu0 %v1554_v21, %s4185_s28  ;;  %v238_v21 = vld [vmem:[%s4285_s19 + $0xc] sm:$0xe]  ;;  %v1560_v38 = vrot.slane %v1558_v0, 1  ;;  %v3924_v36 = vld [vmem:[%s5889_s1 + $0x170] ss:$8 sps:$4 sm:$0xff]   ;;  %v818_v31 = vrot.slane %v3468_v5, 1 }
  0x86   : > { %v4827_v0 = vld [vmem:[%s4285_s19 + $0x98] ss:$0 sps:$4 sm:$0x11]   ;;  %v247_v2 = vld [vmem:[%s4285_s19 + $0x78] sm:$0xe] }
  0x87   : > { %v1575_v5 = vshll.u32 %v4827_v0, 16 }
  0x89   : > { %v1577_v13 = vrot.slane %v1575_v5, 1 }
  0x90   : > { %v936_v48 = vpop.permute.xlu0 %935 }
  0x91   : > { %v920_v35 = vpop.permute.xlu1 %919  ;;  %v1850_v28 = vsel %vm1767_vm2, %v817_v1, %v936_v48  ;;  %v1267_v1 = vrot.slane %v4798_v14, 1  ;;  %v4820_v48 = vcombine.low %v3383_v56, %v4815_v61 }
  0x92   : > { %2596 = vmatprep.mubr.bf16.mxu1 %v1850_v28  ;;  %v1818_v29 = vsel %vm1767_vm2, %v793_v20, %v920_v35  ;;  %v3517_v20 = vcombine.low %v3357_v7, %v4048_v55  ;;  %v4049_v35 = vld [vmem:[%s4285_s19 + $0x74] ss:$0 sps:$4 sm:$0x11]   ;;  %v1561_v7 = vor.u32 %v1560_v38, %v1556_v53  ;;  %v4830_v55 = vld [vmem:[%s4285_s19 + $0x90] sm:$0xe] }
  0x93   : > { %2516 = vmatprep.mubr.bf16.mxu0 %v1818_v29  ;;  %v819_v28 = vrot.slane %v4049_v35, 1  ;;  %v1565_v29 = vrot.slane %v1563_v9, 1  ;;  %v1268_v43 = vsel %vm790_vm1, %v1266_v44, %v1267_v1  ;;  %5944 = vst [vmem:[#allocation22_spill] sm:$0xff] %v4820_v48  ;;  %v4050_v9 = vld [vmem:[%s4285_s19 + $0x10] sm:$0xf]  ;;  %v1568_v44 = vshrl.u32 %v4820_v48, 16 }
  0x94   : > { %1305 = vrot.lane.b32.xlu1 %v1268_v43, %s4185_s28  ;;  %v3460_v35 = vcombine.low %v238_v21, %v4050_v9  ;;  %v1570_v1 = vshll.u32 %v4820_v48, 16  ;;  %v4839_v53 = vld [vmem:[%s4285_s19 + $0x8c] ss:$0 sps:$4 sm:$0x11]   ;;  %v1269_v38 = vrot.slane %v3517_v20, 1  ;;  %v1014_v43 = vshll.u32 %v4360_v58, 16 }
  0x95   : > { %v1566_v56 = vsel %vm517_vm0, %v1561_v7, %v1565_v29  ;;  %v3934_v21 = vld [vmem:[%s5889_s1 + $0x164] ss:$8 sps:$4 sm:$0xff]   ;;  %v4051_v9 = vld [vmem:[%s4285_s19 + $0x14] ss:$0 sps:$4 sm:$0x11]   ;;  %v1270_v46 = vrot.slane %v4839_v53, 1  ;;  %v820_v32 = vsel %vm790_vm1, %v818_v31, %v819_v28  ;;  %v3518_v5 = vcombine.low %v4830_v55, %v4053_v57 }
  0x96   : > { %v795_v47 = vrot.slane %v4051_v9, 1  ;;  %1657 = vrot.lane.b32.xlu0 %v1566_v56, %s4185_s28  ;;  %v1572_v48 = vrot.slane %v1570_v1, 1  ;;  %v3927_v20 = vld [vmem:[%s5889_s1 + $0x230] ss:$8 sps:$4 sm:$0xff]   ;;  %v3932_v9 = vld [vmem:[%s5889_s1 + $0x160] ss:$8 sps:$4 sm:$0xff]  }
  0x97   : > { %v239_v7 = vld [vmem:[%s4285_s19 + $0x18] sm:$0xe]  ;;  %v794_v1 = vrot.slane %v3460_v35, 1  ;;  %v4052_v56 = vld [vmem:[%s4285_s19 + $0x7c] sm:$0xf] }
  0x98   : > { %v727_v60 = vpop.permute.xlu0 %726  ;;  %v3469_v59 = vcombine.low %v247_v2, %v4052_v56  ;;  %v3954_v31 = vld [vmem:[%s5889_s1 + $0x224] ss:$8 sps:$4 sm:$0xff]   ;;  %v1271_v2 = vsel %vm790_vm1, %v1269_v38, %v1270_v46  ;;  %v4054_v57 = vld [vmem:[%s4285_s19 + $0x1c] sm:$0xf]  ;;  %v4878_v56 = vrot.slane %v1014_v43, 1 }
  0x99   : > { %v1793_v29 = vsel %vm1767_vm2, %v4308_v15, %v727_v60  ;;  %v1573_v15 = vor.u32 %v1572_v48, %v1568_v44  ;;  %v3461_v55 = vcombine.low %v239_v7, %v4054_v57  ;;  %1307 = vrot.lane.b32.xlu1 %v1271_v2, %s4185_s28  ;;  %v3385_v35 = vld [vmem:[%s4285_s19 + $0x9c] sm:$0xf]  ;;  %v4876_v44 = vld [vmem:[%s4285_s19 + $0xa0] sm:$0xf] }
  0x9a   : > { %2597 = vmatmul.mubr.bf16.vlgmr.msra.gmra.mxu1 %v1793_v29  ;;  %v711_v10 = vpop.permute.xlu1 %710  ;;  %v3939_v29 = vld [vmem:[%s5889_s1 + $0x154] ss:$8 sps:$4 sm:$0xff]   ;;  %5945 = vst [vmem:[#allocation23_spill] sm:$0xff] %v4876_v44  ;;  %v4889_v46 = vcombine.low %v3385_v35, %v4876_v44  ;;  %v4892_v38 = vld [vmem:[%s4285_s19 + $0xa4] ss:$0 sps:$4 sm:$0x11]  }
  0x9b   : > { %2678 = vmatpush1.bf16.msra.mxu1 %v3924_v36  ;;  %v1769_v48 = vsel %vm1767_vm2, %v4320_v23, %v711_v10  ;;  %v1578_v36 = vsel %vm517_vm0, %v1573_v15, %v1577_v13  ;;  %v3937_v10 = vld [vmem:[%s5889_s1 + $0x150] ss:$8 sps:$4 sm:$0xff]   ;;  %v3952_v13 = vld [vmem:[%s5889_s1 + $0x220] ss:$8 sps:$4 sm:$0xff]   ;;  %5947 = vst [vmem:[#allocation25_spill] sm:$0xff] %v4892_v38  ;;  %v821_v7 = vrot.slane %v3469_v59, 1 }
  0x9c   : > { %v938_v28 = vpop.permute.xlu0 %937  ;;  %2679 = vmatprep.subr.bf16.mxu1 %v3934_v21  ;;  %2517 = vmatmul.mubr.bf16.vlgmr.msra.gmra.mxu0 %v1769_v48  ;;  %5946 = vst [vmem:[#allocation24_spill] sm:$0xff] %v4889_v46  ;;  %v4895_v43 = vld [vmem:[%s4285_s19 + $0x9c] sm:$0xe]  ;;  %v3945_v21 = vld [vmem:[%s5889_s1 + $0x144] ss:$8 sps:$4 sm:$0xff]   ;;  %v1582_v57 = vshll.u32 %v4889_v46, 16 }
  0x9d   : > { %v1854_v23 = vsel %vm1767_vm2, %v820_v32, %v938_v28  ;;  %1659 = vrot.lane.b32.xlu0 %v1578_v36, %s4185_s28  ;;  %2879 = vmatpush1.bf16.msra.mxu0 %v3927_v20  ;;  %v796_v32 = vsel %vm790_vm1, %v794_v1, %v795_v47  ;;  %v4055_v15 = vld [vmem:[%s4285_s19 + $0x80] ss:$0 sps:$4 sm:$0x11]   ;;  %v248_v48 = vld [vmem:[%s4285_s19 + $0x84] sm:$0xe]  ;;  %v1580_v28 = vshrl.u32 %v4889_v46, 16 }
  0x9e   : > { %2606 = vmatprep.mubr.bf16.mxu1 %v1854_v23  ;;  %v822_v2 = vrot.slane %v4055_v15, 1  ;;  %2880 = vmatprep.subr.bf16.mxu0 %v3954_v31  ;;  %v1587_v20 = vshll.u32 %v4892_v38, 16  ;;  %v4907_v36 = vld [vmem:[%s4285_s19 + $0x98] ss:$0 sps:$4 sm:$0x11]   ;;  %v729_v47 = vpop.permute.xlu1 %728  ;;  %v797_v35 = vrot.slane %v3461_v55, 1  ;;  %v3519_v38 = vcombine.low %v4895_v43, %v4058_v27 }
  0x9f   : > { %2680 = vmatpush1.bf16.msra.mxu1 %v3932_v9  ;;  %v4056_v59 = vld [vmem:[%s4285_s19 + $0x20] ss:$0 sps:$4 sm:$0x11]   ;;  %v3979_v9 = vld [vmem:[%s5889_s1 + $0x214] ss:$8 sps:$4 sm:$0xff]   ;;  %v1272_v31 = vrot.slane %v3518_v5, 1  ;;  %v1796_v60 = vsel %vm1767_vm2, %v4336_v40, %v729_v47 }
  0xa0   : > { %v922_v1 = vpop.permute.xlu0 %921  ;;  %2681 = vmatprep.subr.bf16.mxu1 %v3939_v29  ;;  %v798_v23 = vrot.slane %v4056_v59, 1  ;;  %v3943_v29 = vld [vmem:[%s5889_s1 + $0x140] ss:$8 sps:$4 sm:$0xff]   ;;  %v4920_v55 = vld [vmem:[%s4285_s19 + $0x24] sm:$0xe]  ;;  %v1584_v46 = vrot.slane %v1582_v57, 1  ;;  %v823_v5 = vsel %vm790_vm1, %v821_v7, %v822_v2 }
  0xa1   : > { %v1822_v15 = vsel %vm1767_vm2, %v796_v32, %v922_v1  ;;  %v3977_v59 = vld [vmem:[%s5889_s1 + $0x210] ss:$8 sps:$4 sm:$0xff]   ;;  %v1589_v19 = vrot.slane %v1587_v20, 1  ;;  %v4057_v32 = vld [vmem:[%s4285_s19 + $0x88] sm:$0xf]  ;;  %v1273_v40 = vrot.slane %v4907_v36, 1  ;;  %2881 = vmatpush1.bf16.msra.mxu0 %v3952_v13 }
  0xa2   : > { %2526 = vmatprep.mubr.bf16.mxu0 %v1822_v15  ;;  %2607 = vmatmul.mubr.bf16.gmra.mxu1 %v1796_v60  ;;  %v3470_v1 = vcombine.low %v248_v48, %v4057_v32  ;;  %v3387_v47 = vld [vmem:[%s4285_s19 + $0xa8] sm:$0xf]  ;;  %v1585_v57 = vor.u32 %v1584_v46, %v1580_v28  ;;  %v4938_v7 = vld [vmem:[%s4285_s19 + $0xb0] ss:$0 sps:$4 sm:$0x11]   ;;  %v1122_v2 = vshll.u32 %v4370_v6, 16  ;;  %v713_v48 = vpop.permute.xlu1 %712 }
  0xa3   : > { %2682 = vmatpush1.bf16.msra.mxu1 %v3937_v10  ;;  %v4935_v60 = vcombine.low %v3387_v47, %v4930_v63  ;;  %v3950_v27 = vld [vmem:[%s5889_s1 + $0x134] ss:$8 sps:$4 sm:$0xff]   ;;  %v799_v10 = vsel %vm790_vm1, %v797_v35, %v798_v23  ;;  %v4059_v13 = vld [vmem:[%s4285_s19 + $0x8c] ss:$0 sps:$4 sm:$0x11]   ;;  %2882 = vmatprep.subr.bf16.mxu0 %v3979_v9  ;;  %v1274_v28 = vsel %vm790_vm1, %v1272_v31, %v1273_v40 }
  0xa4   : > { %v940_v20 = vpop.permute.xlu0 %939  ;;  %2683 = vmatprep.subr.bf16.mxu1 %v3945_v21  ;;  %v825_v46 = vrot.slane %v4059_v13, 1  ;;  %v249_v43 = vld [vmem:[%s4285_s19 + $0x90] sm:$0xe]  ;;  %v4949_v15 = vld [vmem:[%s4285_s19 + $0xa8] sm:$0xe]  ;;  %v1772_v32 = vsel %vm1767_vm2, %v4351_v52, %v713_v48  ;;  %v1590_v44 = vsel %vm517_vm0, %v1585_v57, %v1589_v19  ;;  %1309 = vrot.lane.b32.xlu1 %v1274_v28, %s4185_s28  ;;  %v824_v23 = vrot.slane %v3470_v1, 1 }
  0xa5   : > { %5949 = vst [vmem:[#allocation27_spill] sm:$0xff] %v4935_v60  ;;  %v1858_v47 = vsel %vm1767_vm2, %v823_v5, %v940_v20  ;;  %v4060_v21 = vld [vmem:[%s4285_s19 + $0x28] sm:$0xf]  ;;  %v4959_v35 = vld [vmem:[%s4285_s19 + $0xa4] ss:$0 sps:$4 sm:$0x11]   ;;  %2527 = vmatmul.mubr.bf16.gmra.mxu0 %v1772_v32  ;;  %1661 = vrot.lane.b32.xlu0 %v1590_v44, %s4185_s28 }
  0xa6   : > { %v3462_v63 = vcombine.low %v4920_v55, %v4060_v21  ;;  %2616 = vmatprep.mubr.bf16.mxu1 %v1858_v47  ;;  %v1592_v9 = vshrl.u32 %v4935_v60, 16  ;;  %v1594_v31 = vshll.u32 %v4935_v60, 16  ;;  %v1599_v52 = vshll.u32 %v4938_v7, 16  ;;  %v3948_v19 = vld [vmem:[%s5889_s1 + $0x130] ss:$8 sps:$4 sm:$0xff]   ;;  %2883 = vmatpush1.bf16.msra.mxu0 %v3977_v59  ;;  %v731_v57 = vpop.permute.xlu1 %730 }
  0xa7   : > { %2684 = vmatpush1.bf16.msra.mxu1 %v3943_v29  ;;  %v1275_v55 = vrot.slane %v3519_v38, 1  ;;  %v1276_v40 = vrot.slane %v4959_v35, 1  ;;  %v4969_v1 = vrot.slane %v1122_v2, 1  ;;  %v3959_v29 = vld [vmem:[%s5889_s1 + $0x124] ss:$8 sps:$4 sm:$0xff]   ;;  %v1799_v2 = vsel %vm1767_vm2, %v4366_v3, %v731_v57 }
  0xa8   : > { %v924_v48 = vpop.permute.xlu0 %923  ;;  %2685 = vmatprep.subr.bf16.mxu1 %v3950_v27  ;;  %v4061_v20 = vld [vmem:[%s4285_s19 + $0x94] sm:$0xf]  ;;  %v1596_v59 = vrot.slane %v1594_v31, 1  ;;  %v1601_v28 = vrot.slane %v1599_v52, 1  ;;  %v3957_v27 = vld [vmem:[%s5889_s1 + $0x120] ss:$8 sps:$4 sm:$0xff]   ;;  %v826_v52 = vsel %vm790_vm1, %v824_v23, %v825_v46 }
  0xa9   : > { %v3471_v13 = vcombine.low %v249_v43, %v4061_v20  ;;  %v1826_v38 = vsel %vm1767_vm2, %v799_v10, %v924_v48  ;;  %v4062_v32 = vld [vmem:[%s4285_s19 + $0x2c] ss:$0 sps:$4 sm:$0x11]   ;;  %v4984_v21 = vld [vmem:[%s4285_s19 + $0x30] sm:$0xe]  ;;  %v1277_v44 = vsel %vm790_vm1, %v1275_v55, %v1276_v40  ;;  %v800_v57 = vrot.slane %v3462_v63, 1 }
  0xaa   : > { %v801_v47 = vrot.slane %v4062_v32, 1  ;;  %v4002_v10 = vld [vmem:[%s5889_s1 + $0x200] ss:$8 sps:$4 sm:$0xff]   ;;  %v4004_v3 = vld [vmem:[%s5889_s1 + $0x204] ss:$8 sps:$4 sm:$0xff]   ;;  %2536 = vmatprep.mubr.bf16.mxu0 %v1826_v38  ;;  %2617 = vmatmul.mubr.bf16.gmra.mxu1 %v1799_v2  ;;  %v1597_v48 = vor.u32 %v1596_v59, %v1592_v9  ;;  %v715_v38 = vpop.permute.xlu1 %714 }
  0xab   : > { %v4063_v43 = vld [vmem:[%s4285_s19 + $0xac] sm:$0xf]  ;;  %v3389_v55 = vld [vmem:[%s4285_s19 + $0xb4] sm:$0xf]  ;;  %v4998_v40 = vld [vmem:[%s4285_s19 + $0xb8] sm:$0xf]  ;;  %2686 = vmatpush1.bf16.msra.mxu1 %v3948_v19  ;;  %1311 = vrot.lane.b32.xlu1 %v1277_v44, %s4185_s28  ;;  %v1775_v59 = vsel %vm1767_vm2, %v4384_v22, %v715_v38 }
  0xac   : > { %v3520_v31 = vcombine.low %v4949_v15, %v4063_v43  ;;  %v5002_v20 = vcombine.low %v3389_v55, %v4998_v40  ;;  %v5005_v32 = vld [vmem:[%s4285_s19 + $0xbc] ss:$0 sps:$4 sm:$0x11]   ;;  %v5008_v15 = vld [vmem:[%s4285_s19 + $0xb4] sm:$0xe]  ;;  %v942_v2 = vpop.permute.xlu0 %941  ;;  %2687 = vmatprep.subr.bf16.mxu1 %v3959_v29  ;;  %v827_v46 = vrot.slane %v3471_v13, 1  ;;  %v1602_v19 = vsel %vm517_vm0, %v1597_v48, %v1601_v28  ;;  %2884 = vmatprep.subr.bf16.mxu0 %v4004_v3 }
  0xad   : > { %v3964_v63 = vld [vmem:[%s5889_s1 + $0x114] ss:$8 sps:$4 sm:$0xff]   ;;  %v4064_v23 = vld [vmem:[%s4285_s19 + $0x98] ss:$0 sps:$4 sm:$0x11]   ;;  %v1862_v44 = vsel %vm1767_vm2, %v826_v52, %v942_v2  ;;  %1663 = vrot.lane.b32.xlu0 %v1602_v19, %s4185_s28  ;;  %2885 = vmatpush1.bf16.msra.mxu0 %v4002_v10  ;;  %v802_v13 = vsel %vm790_vm1, %v800_v57, %v801_v47  ;;  %v1611_v3 = vshll.u32 %v5005_v32, 16 }
  0xae   : > { %5950 = vst [vmem:[#allocation28_spill] sm:$0xff] %v5002_v20  ;;  %v828_v9 = vrot.slane %v4064_v23, 1  ;;  %v250_v43 = vld [vmem:[%s4285_s19 + $0x9c] sm:$0xe]  ;;  %v1604_v29 = vshrl.u32 %v5002_v20, 16  ;;  %v1606_v55 = vshll.u32 %v5002_v20, 16  ;;  %2537 = vmatmul.mubr.bf16.gmra.mxu0 %v1775_v59  ;;  %2626 = vmatprep.mubr.bf16.mxu1 %v1862_v44  ;;  %v733_v57 = vpop.permute.xlu1 %732 }
  0xaf   : > { %v4065_v28 = vld [vmem:[%s4285_s19 + $0x34] sm:$0xf]  ;;  %v5027_v52 = vld [vmem:[%s4285_s19 + $0xb0] ss:$0 sps:$4 sm:$0x11]   ;;  %v1278_v10 = vrot.slane %v3520_v31, 1  ;;  %2688 = vmatpush1.bf16.msra.mxu1 %v3957_v27  ;;  %v1802_v20 = vsel %vm1767_vm2, %v4400_v37, %v733_v57 }
  0xb0   : > { %v3463_v22 = vcombine.low %v4984_v21, %v4065_v28  ;;  %v3962_v48 = vld [vmem:[%s5889_s1 + $0x110] ss:$8 sps:$4 sm:$0xff]   ;;  %v3970_v38 = vld [vmem:[%s5889_s1 + $0x104] ss:$8 sps:$4 sm:$0xff]   ;;  %v1608_v47 = vrot.slane %v1606_v55, 1  ;;  %v926_v21 = vpop.permute.xlu0 %925  ;;  %2689 = vmatprep.subr.bf16.mxu1 %v3964_v63  ;;  %v1613_v59 = vrot.slane %v1611_v3, 1  ;;  %v829_v3 = vsel %vm790_vm1, %v827_v46, %v828_v9 }
  0xb1   : > { %v4066_v2 = vld [vmem:[%s4285_s19 + $0x38] ss:$0 sps:$4 sm:$0x11]   ;;  %v4067_v19 = vld [vmem:[%s4285_s19 + $0xa0] sm:$0xf]  ;;  %v1279_v44 = vrot.slane %v5027_v52, 1  ;;  %v1830_v55 = vsel %vm1767_vm2, %v802_v13, %v926_v21 }
  0xb2   : > { %v804_v23 = vrot.slane %v4066_v2, 1  ;;  %v3472_v31 = vcombine.low %v250_v43, %v4067_v19  ;;  %v242_v27 = vld [vmem:[%s4285_s19 + $0x3c] sm:$0xe]  ;;  %v4068_v28 = vld [vmem:[%s4285_s19 + $0xb8] sm:$0xf]  ;;  %v1609_v60 = vor.u32 %v1608_v47, %v1604_v29  ;;  %2546 = vmatprep.mubr.bf16.mxu0 %v1830_v55  ;;  %2627 = vmatmul.mubr.bf16.gmra.mxu1 %v1802_v20  ;;  %v803_v19 = vrot.slane %v3463_v22, 1  ;;  %v717_v57 = vpop.permute.xlu1 %716 }
  0xb3   : > { %v3521_v5 = vcombine.low %v5008_v15, %v4068_v28  ;;  %v3391_v63 = vld [vmem:[%s4285_s19 + $0xc0] sm:$0xf]  ;;  %v5046_v2 = vld [vmem:[%s4285_s19 + $0xc4] sm:$0xf]  ;;  %v1280_v15 = vsel %vm790_vm1, %v1278_v10, %v1279_v44  ;;  %2690 = vmatpush1.bf16.msra.mxu1 %v3962_v48  ;;  %v3975_v29 = vld [vmem:[%s5889_s1 + $0x1f4] ss:$8 sps:$4 sm:$0xff]  }
  0xb4   : > { %5951 = vst [vmem:[#allocation29_spill] sm:$0xff] %v5046_v2  ;;  %v5049_v43 = vld [vmem:[%s4285_s19 + $0xc0] sm:$0xe]  ;;  %v5054_v13 = vcombine.low %v3391_v63, %v5046_v2  ;;  %v5057_v21 = vld [vmem:[%s4285_s19 + $0xc8] ss:$0 sps:$4 sm:$0x11]   ;;  %v1614_v48 = vsel %vm517_vm0, %v1609_v60, %v1613_v59  ;;  %1313 = vrot.lane.b32.xlu1 %v1280_v15, %s4185_s28  ;;  %v944_v44 = vpop.permute.xlu0 %943  ;;  %2691 = vmatprep.subr.bf16.mxu1 %v3970_v38 }
  0xb5   : > { %5953 = vst [vmem:[#allocation31_spill] sm:$0xff] %v5057_v21  ;;  %v3968_v37 = vld [vmem:[%s5889_s1 + $0x100] ss:$8 sps:$4 sm:$0xff]   ;;  %v4069_v20 = vld [vmem:[%s4285_s19 + $0xa4] ss:$0 sps:$4 sm:$0x11]   ;;  %1665 = vrot.lane.b32.xlu0 %v1614_v48, %s4185_s28  ;;  %v1778_v60 = vsel %vm1767_vm2, %v4417_v54, %v717_v57  ;;  %v1866_v59 = vsel %vm1767_vm2, %v829_v3, %v944_v44 }
  0xb6   : > { %5952 = vst [vmem:[#allocation30_spill] sm:$0xff] %v5054_v13  ;;  %v831_v47 = vrot.slane %v4069_v20, 1  ;;  %v4070_v46 = vld [vmem:[%s4285_s19 + $0x40] sm:$0xf]  ;;  %v830_v28 = vrot.slane %v3472_v31, 1  ;;  %v1616_v55 = vshrl.u32 %v5054_v13, 16  ;;  %2547 = vmatmul.mubr.bf16.gmra.mxu0 %v1778_v60  ;;  %2636 = vmatprep.mubr.bf16.mxu1 %v1866_v59 }
  0xb7   : > { %v3464_v9 = vcombine.low %v242_v27, %v4070_v46  ;;  %v5068_v22 = vld [vmem:[%s4285_s19 + $0x44] ss:$0 sps:$4 sm:$0x11]   ;;  %v1618_v27 = vshll.u32 %v5054_v13, 16  ;;  %v1623_v63 = vshll.u32 %v5057_v21, 16  ;;  %v1281_v20 = vrot.slane %v3521_v5, 1  ;;  %2692 = vmatpush1.bf16.msra.mxu1 %v3968_v37 }
  0xb8   : > { %v3973_v38 = vld [vmem:[%s5889_s1 + $0x1f0] ss:$8 sps:$4 sm:$0xff]   ;;  %v251_v31 = vld [vmem:[%s4285_s19 + $0xa8] sm:$0xe]  ;;  %v805_v46 = vsel %vm790_vm1, %v803_v19, %v804_v23  ;;  %v3984_v48 = vld [vmem:[%s5889_s1 + $0x1e4] ss:$8 sps:$4 sm:$0xff]   ;;  %v735_v19 = vpop.permute.xlu1 %734  ;;  %v928_v59 = vpop.permute.xlu0 %927  ;;  %2693 = vmatprep.subr.bf16.mxu1 %v3975_v29 }
  0xb9   : > { %v5085_v15 = vld [vmem:[%s4285_s19 + $0xbc] ss:$0 sps:$4 sm:$0x11]   ;;  %v1620_v54 = vrot.slane %v1618_v27, 1  ;;  %v1625_v3 = vrot.slane %v1623_v63, 1  ;;  %v832_v27 = vsel %vm790_vm1, %v830_v28, %v831_v47  ;;  %v806_v63 = vrot.slane %v3464_v9, 1 }
  0xba   : > { %v3393_v57 = vld [vmem:[%s4285_s19 + $0xcc] sm:$0xf]  ;;  %v5093_v44 = vld [vmem:[%s4285_s19 + $0xd0] sm:$0xf]  ;;  %v4072_v10 = vld [vmem:[%s4285_s19 + $0xc4] sm:$0xf]  ;;  %v1805_v37 = vsel %vm1767_vm2, %v4433_v11, %v735_v19 }
  0xbb   : > { %5954 = vst [vmem:[#allocation32_spill] sm:$0xff] %v5093_v44  ;;  %v3522_v13 = vcombine.low %v5049_v43, %v4072_v10  ;;  %v1282_v5 = vrot.slane %v5085_v15, 1  ;;  %v5099_v60 = vcombine.low %v3393_v57, %v5093_v44  ;;  %v5102_v23 = vld [vmem:[%s4285_s19 + $0xd4] ss:$0 sps:$4 sm:$0x11]   ;;  %v1621_v21 = vor.u32 %v1620_v54, %v1616_v55  ;;  %2637 = vmatmul.mubr.bf16.gmra.mxu1 %v1805_v37 }
  0xbc   : > { %v5106_v2 = vld [vmem:[%s4285_s19 + $0xc8] ss:$0 sps:$4 sm:$0x11]   ;;  %v1834_v43 = vsel %vm1767_vm2, %v805_v46, %v928_v59  ;;  %v4073_v10 = vld [vmem:[%s4285_s19 + $0xac] sm:$0xf]  ;;  %v1635_v28 = vshll.u32 %v5102_v23, 16  ;;  %2694 = vmatpush2.bf16.msra.mxu1 %v3973_v38  ;;  %v719_v54 = vpop.permute.xlu1 %718 }
  0xbd   : > { %v3473_v57 = vcombine.low %v251_v31, %v4073_v10  ;;  %v1283_v44 = vsel %vm790_vm1, %v1281_v20, %v1282_v5  ;;  %2556 = vmatprep.mubr.bf16.mxu0 %v1834_v43  ;;  %v1626_v29 = vsel %vm517_vm0, %v1621_v21, %v1625_v3  ;;  %v1628_v47 = vshrl.u32 %v5099_v60, 16  ;;  %v3982_v55 = vld [vmem:[%s5889_s1 + $0x1e0] ss:$8 sps:$4 sm:$0xff]   ;;  %v946_v3 = vpop.permute.xlu0 %945  ;;  %2695 = vmatprep.subr.bf16.mxu1 %v3984_v48  ;;  %v3989_v38 = vld [vmem:[%s5889_s1 + $0x1d4] ss:$8 sps:$4 sm:$0xff]  }
  0xbe   : > { %v1630_v9 = vshll.u32 %v5099_v60, 16  ;;  %v243_v11 = vld [vmem:[%s4285_s19 + $0x48] sm:$0xe]  ;;  %1667 = vrot.lane.b32.xlu0 %v1626_v29, %s4185_s28  ;;  %v1284_v31 = vrot.slane %v3522_v13, 1  ;;  %v1285_v20 = vrot.slane %v5106_v2, 1  ;;  %v1134_v21 = vshll.u32 %v4406_v41, 16  ;;  %1315 = vrot.lane.b32.xlu1 %v1283_v44, %s4185_s28 }
  0xbf   : > { %v1637_v19 = vrot.slane %v1635_v28, 1  ;;  %v1781_v13 = vsel %vm1767_vm2, %v4450_v30, %v719_v54  ;;  %v1870_v59 = vsel %vm1767_vm2, %v832_v27, %v946_v3  ;;  %v5955_v43 = vrot.slane %v5068_v22, 1  ;;  %v4074_v29 = vld [vmem:[%s4285_s19 + $0xb0] ss:$0 sps:$4 sm:$0x11]  }
  0xc0   : > { %v1632_v5 = vrot.slane %v1630_v9, 1  ;;  %v1286_v48 = vsel %vm790_vm1, %v1284_v31, %v1285_v20  ;;  %2557 = vmatmul.mubr.bf16.gmra.mxu0 %v1781_v13  ;;  %2646 = vmatprep.mubr.bf16.mxu1 %v1870_v59  ;;  %v833_v10 = vrot.slane %v3473_v57, 1  ;;  %v834_v44 = vrot.slane %v4074_v29, 1  ;;  %v4075_v9 = vld [vmem:[%s4285_s19 + $0x4c] sm:$0xf]  ;;  %v737_v31 = vpop.permute.xlu1 %736 }
  0xc1   : > { %v808_v37 = vsel %vm790_vm1, %v806_v63, %v5955_v43  ;;  %v3465_v28 = vcombine.low %v243_v11, %v4075_v9  ;;  %v1132_v30 = vshrl.u32 %v4406_v41, 16  ;;  %v1146_v54 = vshll.u32 %v4439_v16, 16  ;;  %2696 = vmatpush2.bf16.msra.mxu1 %v3982_v55  ;;  %v3987_v22 = vld [vmem:[%s5889_s1 + $0x1d0] ss:$8 sps:$4 sm:$0xff]   ;;  %v252_v27 = vld [vmem:[%s4285_s19 + $0xb4] sm:$0xe]  ;;  %v930_v20 = vpop.permute.xlu0 %929 }
  0xc2   : > { %v1633_v46 = vor.u32 %v1632_v5, %v1628_v47  ;;  %v1158_v63 = vshll.u32 %v4471_v51, 16  ;;  %v1170_v57 = vshll.u32 %v4502_v33, 16  ;;  %2697 = vmatprep.subr.bf16.mxu1 %v3989_v38  ;;  %v3995_v47 = vld [vmem:[%s5889_s1 + $0x1c4] ss:$8 sps:$4 sm:$0xff]   ;;  %v244_v11 = vld [vmem:[%s4285_s19 + $0x54] sm:$0xe]  ;;  %1317 = vrot.lane.b32.xlu1 %v1286_v48, %s4185_s28  ;;  %v1838_v13 = vsel %vm1767_vm2, %v808_v37, %v930_v20 }
  0xc3   : > { %v5152_v3 = vrot.slane %v1134_v21, 1  ;;  %v1182_v5 = vshll.u32 %v4531_v18, 16  ;;  %v1808_v38 = vsel %vm1767_vm2, %v4466_v50, %v737_v31  ;;  %2566 = vmatprep.mubr.bf16.mxu0 %v1838_v13  ;;  %v835_v59 = vsel %vm790_vm1, %v833_v10, %v834_v44  ;;  %v4077_v21 = vld [vmem:[%s4285_s19 + $0xb8] sm:$0xf]  ;;  %v3993_v50 = vld [vmem:[%s5889_s1 + $0x1c0] ss:$8 sps:$4 sm:$0xff]  }
  0xc4   : > { %v1638_v55 = vsel %vm517_vm0, %v1633_v46, %v1637_v19  ;;  %2647 = vmatmul.mubr.bf16.gmra.mxu1 %v1808_v38  ;;  %v809_v46 = vrot.slane %v3465_v28, 1  ;;  %v4076_v19 = vld [vmem:[%s4285_s19 + $0x50] ss:$0 sps:$4 sm:$0x11]   ;;  %v3474_v48 = vcombine.low %v252_v27, %v4077_v21  ;;  %v1144_v29 = vshrl.u32 %v4439_v16, 16  ;;  %v721_v16 = vpop.permute.xlu1 %720 }
  0xc5   : > { %1669 = vrot.lane.b32.xlu0 %v1638_v55, %s4185_s28  ;;  %v810_v43 = vrot.slane %v4076_v19, 1  ;;  %v1148_v9 = vrot.slane %v1146_v54, 1  ;;  %2698 = vmatpush2.bf16.msra.mxu1 %v3987_v22  ;;  %v4078_v37 = vld [vmem:[%s4285_s19 + $0x58] sm:$0xf]  ;;  %v1156_v10 = vshrl.u32 %v4471_v51, 16  ;;  %v5169_v44 = vrot.slane %v1158_v63, 1  ;;  %v948_v54 = vpop.permute.xlu0 %947 }
  0xc6   : > { %v3466_v31 = vcombine.low %v244_v11, %v4078_v37  ;;  %v4079_v20 = vld [vmem:[%s4285_s19 + $0x14] ss:$0 sps:$4 sm:$0x11]   ;;  %v5172_v27 = vrot.slane %v1170_v57, 1  ;;  %2699 = vmatprep.subr.bf16.mxu1 %v3995_v47  ;;  %v5178_v13 = vrot.slane %v1182_v5, 1  ;;  %v1784_v63 = vsel %vm1767_vm2, %v4483_v4, %v721_v16 }
  0xc7   : > { %v1007_v55 = vshll.u32 %v4079_v20, 16  ;;  %v4000_v22 = vld [vmem:[%s5889_s1 + $0x1b4] ss:$8 sps:$4 sm:$0xff]   ;;  %v1874_v38 = vsel %vm1767_vm2, %v835_v59, %v948_v54  ;;  %v3411_v57 = vld [vmem:[%s4285_s19 + $0x18] sm:$0xe]  ;;  %v811_v47 = vsel %vm790_vm1, %v809_v46, %v810_v43  ;;  %v836_v19 = vrot.slane %v3474_v48, 1 }
  0xc8   : > { %2567 = vmatmul.mubr.bf16.gmra.mxu0 %v1784_v63  ;;  %2656 = vmatprep.mubr.bf16.mxu1 %v1874_v38  ;;  %v4080_v21 = vld [vmem:[%s4285_s19 + $0xbc] ss:$0 sps:$4 sm:$0x11]   ;;  %v5956_v20 = vshrl.u32 %v4302_v12, 16  ;;  %v812_v4 = vrot.slane %v3466_v31, 1  ;;  %v5959_v38 = vshrl.u32 %v4344_v45, 16 }
  0xc9   : > { %v837_v37 = vrot.slane %v4080_v21, 1  ;;  %v5190_v5 = vld [vmem:[%s4285_s19 + $0x20] ss:$0 sps:$4 sm:$0x11]   ;;  %2700 = vmatpush2.bf16.msra.mxu1 %v3993_v50  ;;  %v1009_v54 = vrot.slane %v1007_v55, 1  ;;  %v932_v63 = vpop.permute.xlu0 %931  ;;  %v5958_v50 = vshrl.u32 %v4292_v8, 16  ;;  %v739_v21 = vpop.permute.xlu1 %738 }
  0xca   : > { %v1005_v11 = vor.u32 %v4804_v24, %v5956_v20  ;;  %v1720_v28 = vrot.slane %v5190_v5, 1  ;;  %v4082_v59 = vld [vmem:[%s4285_s19 + $0x5c] ss:$0 sps:$4 sm:$0x11]   ;;  %v3998_v46 = vld [vmem:[%s5889_s1 + $0x1b0] ss:$8 sps:$4 sm:$0xff]   ;;  %2701 = vmatprep.subr.bf16.mxu1 %v4000_v22  ;;  %v1113_v55 = vor.u32 %v4810_v39, %v5959_v38  ;;  %v1842_v20 = vsel %vm1767_vm2, %v811_v47, %v932_v63 }
  0xcb   : > { %v813_v16 = vrot.slane %v4082_v59, 1  ;;  %v4083_v12 = vld [vmem:[%s4285_s19 + $0x1c] sm:$0xf]  ;;  %v5957_v24 = vshrl.u32 %v4360_v58, 16  ;;  %v1101_v31 = vor.u32 %v4775_v42, %v5958_v50  ;;  %v4009_v22 = vld [vmem:[%s5889_s1 + $0x1a4] ss:$8 sps:$4 sm:$0xff]   ;;  %2576 = vmatprep.mubr.bf16.mxu0 %v1842_v20  ;;  %v1811_v45 = vsel %vm1767_vm2, %v4504_v34, %v739_v21 }
  0xcc   : > { %v3555_v43 = vcombine.low %v3411_v57, %v4083_v12  ;;  %v4084_v58 = vld [vmem:[%s4285_s19 + $0x20] ss:$0 sps:$4 sm:$0x11]   ;;  %v3420_v59 = vld [vmem:[%s4285_s19 + $0x84] sm:$0xe]  ;;  %v5960_v8 = vshrl.u32 %v4370_v6, 16  ;;  %v838_v39 = vsel %vm790_vm1, %v836_v19, %v837_v37  ;;  %v1137_v47 = vor.u32 %v5152_v3, %v1132_v30  ;;  %2657 = vmatmul.mubr.bf16.gmra.mxu1 %v1811_v45 }
  0xcd   : > { %v5201_v48 = vor.u32 %v4878_v56, %v5957_v24  ;;  %v1019_v57 = vshll.u32 %v4084_v58, 16  ;;  %v1103_v56 = vshll.u32 %v4767_v49, 16  ;;  %v4007_v49 = vld [vmem:[%s5889_s1 + $0x1a0] ss:$8 sps:$4 sm:$0xff]   ;;  %v814_v6 = vsel %vm790_vm1, %v812_v4, %v813_v16  ;;  %v3421_v12 = vld [vmem:[%s4285_s19 + $0x90] sm:$0xe]  ;;  %2702 = vmatpush2.bf16.msra.mxu1 %v3998_v46  ;;  %v950_v19 = vpop.permute.xlu0 %949  ;;  %v723_v50 = vpop.permute.xlu1 %722 }
  0xce   : > { %v1125_v42 = vor.u32 %v4969_v1, %v5960_v8  ;;  %v5230_v1 = vsel %vm517_vm0, %v1005_v11, %v1009_v54  ;;  %v5233_v34 = vor.u32 %v1148_v9, %v1144_v29  ;;  %v5235_v37 = vrot.slane %v3555_v43, 1  ;;  %v3422_v24 = vld [vmem:[%s4285_s19 + $0x9c] sm:$0xe]  ;;  %2703 = vmatprep.subr.bf16.mxu1 %v4009_v22  ;;  %v5961_v21 = vld [vmem:[#allocation23_spill] sm:$0xff]  ;;  %v5962_v58 = vld [vmem:[#allocation25_spill] sm:$0xff] }
  0xcf   : > { %v1105_v63 = vrot.slane %v1103_v56, 1  ;;  %v1115_v41 = vshll.u32 %v4798_v14, 16  ;;  %v3564_v30 = vcombine.low %v3420_v59, %v4784_v17  ;;  %v1747_v3 = vrot.slane %v4793_v26, 1  ;;  %v4014_v29 = vld [vmem:[%s5889_s1 + $0x194] ss:$8 sps:$4 sm:$0xff]  }
  0xd0   : > { %v1878_v11 = vsel %vm1767_vm2, %v838_v39, %v950_v19  ;;  %v5245_v9 = vrot.slane %v1019_v57, 1  ;;  %v1127_v14 = vshll.u32 %v4839_v53, 16  ;;  %v1787_v17 = vsel %vm1767_vm2, %v4523_v62, %v723_v50  ;;  %v4012_v62 = vld [vmem:[%s5889_s1 + $0x190] ss:$8 sps:$4 sm:$0xff]   ;;  %v4020_v59 = vld [vmem:[%s5889_s1 + $0x184] ss:$8 sps:$4 sm:$0xff]  }
  0xd1   : > { %v5248_v4 = vsel %vm517_vm0, %v1101_v31, %v1105_v63  ;;  %2666 = vmatprep.mubr.bf16.mxu1 %v1878_v11  ;;  %v1117_v26 = vrot.slane %v1115_v41, 1  ;;  %v1746_v16 = vrot.slane %v3564_v30, 1  ;;  %v3565_v54 = vcombine.low %v3421_v12, %v4815_v61  ;;  %2577 = vmatmul.mubr.bf16.gmra.mxu0 %v1787_v17  ;;  %v3423_v31 = vld [vmem:[%s4285_s19 + $0xa8] sm:$0xe]  ;;  %v934_v53 = vpop.permute.xlu0 %933  ;;  %v741_v57 = vpop.permute.xlu1 %740  ;;  %v3424_v39 = vld [vmem:[%s4285_s19 + $0xb4] sm:$0xe] }
  0xd2   : > { %v1129_v46 = vrot.slane %v1127_v14, 1  ;;  %v1750_v43 = vrot.slane %v4827_v0, 1  ;;  %v1139_v38 = vshll.u32 %v4907_v36, 16  ;;  %v3566_v20 = vcombine.low %v3422_v24, %v5961_v21  ;;  %2704 = vmatpush2.bf16.msra.mxu1 %v4007_v49  ;;  %v5963_v49 = vld [vmem:[#allocation9_spill] sm:$0xff] }
  0xd3   : > { %v5262_v22 = vsel %vm517_vm0, %v1113_v55, %v1117_v26  ;;  %v5265_v61 = vsel %vm790_vm1, %v1746_v16, %v1747_v3  ;;  %v1749_v0 = vrot.slane %v3565_v54, 1  ;;  %v1753_v36 = vrot.slane %v5962_v58, 1  ;;  %2705 = vmatprep.subr.bf16.mxu1 %v4014_v29  ;;  %v3425_v30 = vld [vmem:[%s4285_s19 + $0xc0] sm:$0xe]  ;;  %v3426_v54 = vld [vmem:[%s4285_s19 + $0xcc] sm:$0xe] }
  0xd4   : > { %v1846_v56 = vsel %vm1767_vm2, %v814_v6, %v934_v53  ;;  %v5273_v8 = vsel %vm517_vm0, %v1125_v42, %v1129_v46  ;;  %v1141_v55 = vrot.slane %v1139_v38, 1  ;;  %v1752_v45 = vrot.slane %v3566_v20, 1  ;;  %v5964_v6 = vld [vmem:[#allocation26_spill] sm:$0xff]  ;;  %v5967_v46 = vld [vmem:[#allocation11_spill] sm:$0xff]  ;;  %v5970_v58 = vld [vmem:[#allocation32_spill] sm:$0xff] }
  0xd5   : > { %2586 = vmatprep.mubr.bf16.mxu0 %v1846_v56  ;;  %v1814_v63 = vsel %vm1767_vm2, %v5963_v49, %v741_v57  ;;  %v5279_v12 = vsel %vm790_vm1, %v1749_v0, %v1750_v43  ;;  %v1151_v19 = vshll.u32 %v4959_v35, 16  ;;  %v3567_v41 = vcombine.low %v3423_v31, %v5964_v6  ;;  %v4018_v35 = vld [vmem:[%s5889_s1 + $0x180] ss:$8 sps:$4 sm:$0xff]   ;;  %v725_v17 = vpop.permute.xlu1 %724  ;;  %v1640_v20 = vpop.permute.xlu0 %1639  ;;  %v5971_v56 = vld [vmem:[#allocation12_spill] sm:$0xff] }
  0xd6   : > { %2667 = vmatmul.mubr.bf16.gmra.mxu1 %v1814_v63  ;;  %v5285_v3 = vsel %vm517_vm0, %v1137_v47, %v1141_v55  ;;  %v5288_v42 = vsel %vm790_vm1, %v1752_v45, %v1753_v36  ;;  %v1756_v24 = vrot.slane %v4938_v7, 1  ;;  %v1161_v50 = vor.u32 %v5169_v44, %v1156_v10  ;;  %v5966_v44 = vld [vmem:[#allocation29_spill] sm:$0xff] }
  0xd7   : > { %2706 = vmatpush2.bf16.msra.mxu1 %v4012_v62  ;;  %v1153_v11 = vrot.slane %v1151_v19, 1  ;;  %v1755_v29 = vrot.slane %v3567_v41, 1  ;;  %v1163_v47 = vshll.u32 %v5027_v52, 16  ;;  %v3568_v14 = vcombine.low %v3424_v39, %v4998_v40  ;;  %v3412_v55 = vld [vmem:[%s4285_s19 + $0x24] sm:$0xe] }
  0xd8   : > { %2707 = vmatprep.subr.bf16.mxu1 %v4020_v59  ;;  %v1759_v26 = vrot.slane %v5005_v32, 1  ;;  %v5965_v7 = vshrl.u32 %v4502_v33, 16  ;;  %v1175_v10 = vshll.u32 %v5085_v15, 16  ;;  %v3569_v16 = vcombine.low %v3425_v30, %v5966_v44  ;;  %v5968_v15 = vld [vmem:[#allocation31_spill] sm:$0xff]  ;;  %v4085_v30 = vld [vmem:[%s4285_s19 + $0x28] sm:$0xf] }
  0xd9   : > { %v1790_v43 = vsel %vm1767_vm2, %v5967_v46, %v725_v17  ;;  %v5310_v52 = vsel %vm517_vm0, %v5233_v34, %v1153_v11  ;;  %v5313_v40 = vsel %vm790_vm1, %v1755_v29, %v1756_v24  ;;  %v1165_v32 = vrot.slane %v1163_v47, 1  ;;  %v1288_v57 = vpop.permute.xlu1 %1287  ;;  %v1642_v41 = vpop.permute.xlu0 %1641  ;;  %v5973_v29 = vld [vmem:[#allocation13_spill] sm:$0xff]  ;;  %v4087_v17 = vld [vmem:[%s4285_s19 + $0x2c] ss:$0 sps:$4 sm:$0x11]  }
  0xda   : > { %v1173_v51 = vor.u32 %v5172_v27, %v5965_v7  ;;  %2587 = vmatmul.mubr.bf16.gmra.mxu0 %v1790_v43  ;;  %v1758_v33 = vrot.slane %v3568_v14, 1  ;;  %v1177_v27 = vrot.slane %v1175_v10, 1  ;;  %v1761_v38 = vrot.slane %v3569_v16, 1  ;;  %v5974_v7 = vld [vmem:[#allocation5_spill] sm:$0xff]  ;;  %v3413_v16 = vld [vmem:[%s4285_s19 + $0x30] sm:$0xe] }
  0xdb   : > { %v1762_v21 = vrot.slane %v5968_v15, 1  ;;  %2708 = vmatpush2.bf16.msra.mxu1 %v4018_v35  ;;  %v4186_v31 = vmov 0   ;;  %v5318_v53 = vsel %vm517_vm0, %v1161_v50, %v1165_v32  ;;  %v5969_v34 = vshrl.u32 %v4531_v18, 16  ;;  %v4088_v43 = vld [vmem:[%s4285_s19 + $0x34] sm:$0xf] }
  0xdc   : > { %2902 = vmatprep.mubr.bf16.mxu0 %v4186_v31  ;;  %v1187_v0 = vshll.u32 %v5106_v2, 16  ;;  %v3570_v36 = vcombine.low %v3426_v54, %v5970_v58  ;;  %v1945_v59 = vsel %vm1767_vm2, %v5971_v56, %v1640_v20  ;;  %v5329_v45 = vsel %vm790_vm1, %v1758_v33, %v1759_v26  ;;  %v4090_v58 = vld [vmem:[%s4285_s19 + $0x38] ss:$0 sps:$4 sm:$0x11]  }
  0xdd   : > { %v1185_v62 = vor.u32 %v5178_v13, %v5969_v34  ;;  %v5332_v39 = vsel %vm517_vm0, %v1173_v51, %v1177_v27  ;;  %v5335_v18 = vsel %vm790_vm1, %v1761_v38, %v1762_v21  ;;  %v1882_v2 = vsel %vm1767_vm2, %v5230_v1, %v1288_v57  ;;  %2709 = vmatprep.mubr.bf16.mxu1 %v1945_v59  ;;  %v1290_v11 = vpop.permute.xlu1 %1289  ;;  %v4089_v21 = vld [vmem:[%s4285_s19 + $0x38] ss:$0 sps:$4 sm:$0x11]   ;;  %v5976_v57 = vld [vmem:[#allocation6_spill] sm:$0xff]  ;;  %v5977_v59 = vld [vmem:[#allocation15_spill] sm:$0xff] }
  0xde   : > { %v1189_v13 = vrot.slane %v1187_v0, 1  ;;  %v1764_v49 = vrot.slane %v3570_v36, 1  ;;  %v1765_v63 = vrot.slane %v5102_v23, 1  ;;  %v1024_v19 = vshrl.u32 %v4388_v25, 16  ;;  %2710 = vmatmul.mubr.bf16.vlgmr.msra.gmra.mxu1 %v1882_v2 }
  0xdf   : > { %v1721_v6 = vsel %vm790_vm1, %v5235_v37, %v1720_v28  ;;  %v3556_v24 = vcombine.low %v3412_v55, %v4085_v30  ;;  %v5972_v23 = vshll.u32 %v4388_v25, 16  ;;  %v1948_v5 = vsel %vm1767_vm2, %v5973_v29, %v1642_v41  ;;  %v4086_v37 = vld [vmem:[%s4285_s19 + $0x2c] ss:$0 sps:$4 sm:$0x11]  }
  0xe0   : > { %v5347_v1 = vsel %vm517_vm0, %v1185_v62, %v1189_v13  ;;  %v5350_v50 = vsel %vm790_vm1, %v1764_v49, %v1765_v63  ;;  %v1022_v28 = vsel %vm517_vm0, %v5201_v48, %v5245_v9  ;;  %v1031_v47 = vshll.u32 %v4086_v37, 16  ;;  %2719 = vmatprep.mubr.bf16.mxu1 %v1948_v5  ;;  %v1644_v48 = vpop.permute.xlu0 %1643  ;;  %v5975_v9 = vld [vmem:[#allocation14_spill] sm:$0xff]  ;;  %v3414_v49 = vld [vmem:[%s4285_s19 + $0x3c] sm:$0xe] }
  0xe1   : > { %v1028_v35 = vrot.slane %v5972_v23, 1  ;;  %v1886_v14 = vsel %vm1767_vm2, %v1022_v28, %v1290_v11  ;;  %v1722_v25 = vrot.slane %v3556_v24, 1  ;;  %v1723_v26 = vrot.slane %v4087_v17, 1  ;;  %v1292_v38 = vpop.permute.xlu1 %1291  ;;  %v4093_v37 = vld [vmem:[%s4285_s19 + $0x44] ss:$0 sps:$4 sm:$0x11]  }
  0xe2   : > { %3643 = vmatmul.mubr.msk.bf16.vlgmr.msra.gmra.mxu0 %vm1767_vm2, %v1721_v6  ;;  %v1038_v51 = vshll.u32 %v5974_v7, 16  ;;  %v1033_v44 = vrot.slane %v1031_v47, 1  ;;  %v1951_v54 = vsel %vm1767_vm2, %v5975_v9, %v1644_v48  ;;  %v3557_v32 = vcombine.low %v3413_v16, %v4088_v43  ;;  %v5979_v17 = vld [vmem:[#allocation16_spill] sm:$0xff]  ;;  %v4094_v16 = vld [vmem:[%s4285_s19 + $0x4c] sm:$0xf] }
  0xe3   : > { %2912 = vmatprep.mubr.bf16.mxu0 %v4186_v31  ;;  %v1029_v10 = vor.u32 %v1028_v35, %v1024_v19  ;;  %v1724_v46 = vsel %vm790_vm1, %v1722_v25, %v1723_v26  ;;  %v1036_v33 = vshrl.u32 %v5974_v7, 16  ;;  %v1043_v20 = vshll.u32 %v4089_v21, 16  ;;  %v4091_v19 = vld [vmem:[%s4285_s19 + $0x40] sm:$0xf] }
  0xe4   : > { %v1040_v27 = vrot.slane %v1038_v51, 1  ;;  %v1646_v34 = vpop.permute.xlu0 %1645  ;;  %v1725_v0 = vrot.slane %v3557_v32, 1  ;;  %v1726_v36 = vrot.slane %v4090_v58, 1  ;;  %v1050_v56 = vshll.u32 %v5976_v57, 16 }
  0xe5   : > { %v1034_v15 = vsel %vm517_vm0, %v1029_v10, %v1033_v44  ;;  %v1954_v55 = vsel %vm1767_vm2, %v5977_v59, %v1646_v34  ;;  %v1045_v13 = vrot.slane %v1043_v20, 1  ;;  %v3558_v6 = vcombine.low %v3414_v49, %v4091_v19  ;;  %v1294_v24 = vpop.permute.xlu1 %1293  ;;  %v4092_v35 = vld [vmem:[%s4285_s19 + $0x44] ss:$0 sps:$4 sm:$0x11]   ;;  %v3415_v10 = vld [vmem:[%s4285_s19 + $0x48] sm:$0xe] }
  0xe6   : > { %2720 = vmatmul.mubr.bf16.gmra.mxu1 %v1886_v14  ;;  %v1890_v62 = vsel %vm1767_vm2, %v1034_v15, %v1292_v38  ;;  %v1041_v2 = vor.u32 %v1040_v27, %v1036_v33  ;;  %v1727_v63 = vsel %vm790_vm1, %v1725_v0, %v1726_v36  ;;  %v1048_v41 = vshrl.u32 %v5976_v57, 16  ;;  %v5978_v14 = vld [vmem:[#allocation7_spill] sm:$0xff]  ;;  %v5980_v34 = vld [vmem:[#allocation8_spill] sm:$0xff]  ;;  %v5981_v0 = vld [vmem:[#allocation17_spill] sm:$0xff] }
  0xe7   : > { %2729 = vmatprep.mubr.bf16.mxu1 %v1951_v54  ;;  %v1052_v30 = vrot.slane %v1050_v56, 1  ;;  %v1055_v11 = vshll.u32 %v4092_v35, 16  ;;  %v1728_v28 = vrot.slane %v3558_v6, 1  ;;  %v1729_v47 = vrot.slane %v4093_v37, 1  ;;  %v3416_v56 = vld [vmem:[%s4285_s19 + $0x54] sm:$0xe] }
  0xe8   : > { %v1046_v23 = vsel %vm517_vm0, %v1041_v2, %v1045_v13  ;;  %v1648_v29 = vpop.permute.xlu0 %1647  ;;  %v1062_v25 = vshll.u32 %v5978_v14, 16  ;;  %v3559_v48 = vcombine.low %v3415_v10, %v4094_v16  ;;  %v1060_v9 = vshrl.u32 %v5978_v14, 16  ;;  %v4095_v32 = vld [vmem:[%s4285_s19 + $0x50] ss:$0 sps:$4 sm:$0x11]  }
  0xe9   : > { %v1894_v5 = vsel %vm1767_vm2, %v1046_v23, %v1294_v24  ;;  %v1957_v26 = vsel %vm1767_vm2, %v5979_v17, %v1648_v29  ;;  %v1053_v7 = vor.u32 %v1052_v30, %v1048_v41  ;;  %v1057_v51 = vrot.slane %v1055_v11, 1  ;;  %v4096_v21 = vld [vmem:[%s4285_s19 + $0x50] ss:$0 sps:$4 sm:$0x11]   ;;  %v5982_v29 = vld [vmem:[#allocation10_spill] sm:$0xff] }
  0xea   : > { %3644 = vmatmul.mubr.msk.bf16.gmra.mxu0 %vm1767_vm2, %v1724_v46  ;;  %v1730_v44 = vsel %vm790_vm1, %v1728_v28, %v1729_v47  ;;  %v1064_v54 = vrot.slane %v1062_v25, 1  ;;  %v1296_v46 = vpop.permute.xlu1 %1295  ;;  %v1067_v33 = vshll.u32 %v4095_v32, 16  ;;  %v1731_v15 = vrot.slane %v3559_v48, 1  ;;  %v4098_v6 = vld [vmem:[%s4285_s19 + $0x5c] ss:$0 sps:$4 sm:$0x11]  }
  0xeb   : > { %2922 = vmatprep.mubr.bf16.mxu0 %v4186_v31  ;;  %v1058_v43 = vsel %vm517_vm0, %v1053_v7, %v1057_v51  ;;  %v1732_v20 = vrot.slane %v4096_v21, 1  ;;  %v1072_v13 = vshrl.u32 %v5980_v34, 16  ;;  %v1079_v41 = vshll.u32 %v4098_v6, 16  ;;  %v4099_v35 = vld [vmem:[%s4285_s19 + $0x5c] ss:$0 sps:$4 sm:$0x11]  }
  0xec   : > { %v1650_v27 = vpop.permute.xlu0 %1649  ;;  %v1898_v38 = vsel %vm1767_vm2, %v1058_v43, %v1296_v46  ;;  %v1065_v36 = vor.u32 %v1064_v54, %v1060_v9  ;;  %v1069_v57 = vrot.slane %v1067_v33, 1  ;;  %v1735_v11 = vrot.slane %v4099_v35, 1  ;;  %v5983_v28 = vld [vmem:[#allocation18_spill] sm:$0xff]  ;;  %v3417_v25 = vld [vmem:[%s4285_s19 + $0x60] sm:$0xe] }
  0xed   : > { %v1960_v58 = vsel %vm1767_vm2, %v5981_v0, %v1650_v27  ;;  %v1733_v59 = vsel %vm790_vm1, %v1731_v15, %v1732_v20  ;;  %v1081_v14 = vrot.slane %v1079_v41, 1  ;;  %v1084_v51 = vshrl.u32 %v5982_v29, 16  ;;  %v4101_v48 = vld [vmem:[%s4285_s19 + $0x68] ss:$0 sps:$4 sm:$0x11]   ;;  %v5984_v27 = vld [vmem:[#allocation19_spill] sm:$0xff] }
  0xee   : > { %2730 = vmatmul.mubr.bf16.gmra.mxu1 %v1890_v62  ;;  %v1074_v62 = vshll.u32 %v5980_v34, 16  ;;  %v1070_v19 = vsel %vm517_vm0, %v1065_v36, %v1069_v57  ;;  %v1091_v9 = vshll.u32 %v4101_v48, 16  ;;  %v4102_v32 = vld [vmem:[%s4285_s19 + $0x68] ss:$0 sps:$4 sm:$0x11]  }
  0xef   : > { %2739 = vmatprep.mubr.bf16.mxu1 %v1954_v55  ;;  %v4097_v55 = vld [vmem:[%s4285_s19 + $0x58] sm:$0xf]  ;;  %v1738_v33 = vrot.slane %v4102_v32, 1  ;;  %v3418_v20 = vld [vmem:[%s4285_s19 + $0x6c] sm:$0xe] }
  0xf0   : > { %v3560_v2 = vcombine.low %v3416_v56, %v4097_v55  ;;  %v1076_v49 = vrot.slane %v1074_v62, 1  ;;  %v1652_v30 = vpop.permute.xlu0 %1651  ;;  %v1093_v21 = vrot.slane %v1091_v9, 1  ;;  %v4103_v62 = vld [vmem:[%s4285_s19 + $0x70] sm:$0xf]  ;;  %v4105_v6 = vld [vmem:[%s4285_s19 + $0x7c] sm:$0xf] }
  0xf1   : > { %v1963_v37 = vsel %vm1767_vm2, %v5983_v28, %v1652_v30  ;;  %v3562_v0 = vcombine.low %v3418_v20, %v4103_v62  ;;  %v4104_v55 = vld [vmem:[%s4285_s19 + $0x74] ss:$0 sps:$4 sm:$0x11]  }
  0xf2   : > { %3645 = vmatmul.mubr.msk.bf16.gmra.mxu0 %vm1767_vm2, %v1727_v63  ;;  %v1298_v63 = vpop.permute.xlu1 %1297  ;;  %v1734_v23 = vrot.slane %v3560_v2, 1  ;;  %v1077_v47 = vor.u32 %v1076_v49, %v1072_v13  ;;  %v1741_v2 = vrot.slane %v4104_v55, 1  ;;  %v5985_v13 = vld [vmem:[#allocation20_spill] sm:$0xff] }
  0xf3   : > { %2932 = vmatprep.mubr.bf16.mxu0 %v4186_v31  ;;  %v1902_v24 = vsel %vm1767_vm2, %v1070_v19, %v1298_v63  ;;  %v3419_v63 = vld [vmem:[%s4285_s19 + $0x78] sm:$0xe] }
  0xf4   : > { %v1736_v17 = vsel %vm790_vm1, %v1734_v23, %v1735_v11  ;;  %v1082_v16 = vsel %vm517_vm0, %v1077_v47, %v1081_v14  ;;  %v1654_v54 = vpop.permute.xlu0 %1653  ;;  %v3563_v41 = vcombine.low %v3419_v63, %v4105_v6  ;;  %v4106_v11 = vld [vmem:[%s4285_s19 + $0x80] ss:$0 sps:$4 sm:$0x11]  }
  0xf6   : > { %2740 = vmatmul.mubr.bf16.gmra.mxu1 %v1894_v5  ;;  %v1086_v5 = vshll.u32 %v5982_v29, 16  ;;  %v1743_v35 = vrot.slane %v3563_v41, 1  ;;  %v1744_v29 = vrot.slane %v4106_v11, 1 }
  0xf7   : > { %2749 = vmatprep.mubr.bf16.mxu1 %v1957_v26  ;;  %v4100_v26 = vld [vmem:[%s4285_s19 + $0x64] sm:$0xf] }
  0xf8   : > { %v3561_v7 = vcombine.low %v3417_v25, %v4100_v26  ;;  %v1088_v10 = vrot.slane %v1086_v5, 1  ;;  %v1656_v57 = vpop.permute.xlu0 %1655  ;;  %v5986_v5 = vld [vmem:[#allocation21_spill] sm:$0xff] }
  0xf9   : > { %v1969_v49 = vsel %vm1767_vm2, %v5985_v13, %v1656_v57 }
  0xfa   : > { %3646 = vmatmul.mubr.msk.bf16.gmra.mxu0 %vm1767_vm2, %v1730_v44  ;;  %v1300_v44 = vpop.permute.xlu1 %1299  ;;  %v1737_v43 = vrot.slane %v3561_v7, 1  ;;  %v1089_v15 = vor.u32 %v1088_v10, %v1084_v51  ;;  %v5988_v10 = vld [vmem:[#allocation24_spill] sm:$0xff] }
  0xfb   : > { %2942 = vmatprep.mubr.bf16.mxu0 %v4186_v31  ;;  %v1906_v46 = vsel %vm1767_vm2, %v1082_v16, %v1300_v44 }
  0xfc   : > { %v1739_v34 = vsel %vm790_vm1, %v1737_v43, %v1738_v33  ;;  %v1094_v36 = vsel %vm517_vm0, %v1089_v15, %v1093_v21 }
  0xfe   : > { %2750 = vmatmul.mubr.bf16.gmra.mxu1 %v1898_v38  ;;  %v1966_v38 = vsel %vm1767_vm2, %v5984_v27, %v1654_v54 }
  0xff   : > { %2759 = vmatprep.mubr.bf16.mxu1 %v1960_v58  ;;  %v1302_v58 = vpop.permute.xlu1 %1301 }
 0x100   : > { %v1910_v56 = vsel %vm1767_vm2, %v1094_v36, %v1302_v58 }
 0x102   : > { %3647 = vmatmul.mubr.msk.bf16.gmra.mxu0 %vm1767_vm2, %v1733_v59  ;;  %v1740_v59 = vrot.slane %v3562_v0, 1 }
 0x103   : > { %2952 = vmatprep.mubr.bf16.mxu0 %v4186_v31  ;;  %v1304_v30 = vpop.permute.xlu1 %1303 }
 0x104   : > { %v1742_v19 = vsel %vm790_vm1, %v1740_v59, %v1741_v2  ;;  %v1914_v23 = vsel %vm1767_vm2, %v5248_v4, %v1304_v30  ;;  %v5987_v4 = vld [vmem:[#allocation22_spill] sm:$0xff] }
 0x106   : > { %2760 = vmatmul.mubr.bf16.gmra.mxu1 %v1902_v24 }
 0x107   : > { %2769 = vmatprep.mubr.bf16.mxu1 %v1963_v37  ;;  %v1745_v37 = vsel %vm790_vm1, %v1743_v35, %v1744_v29  ;;  %v1306_v47 = vpop.permute.xlu1 %1305 }
 0x108   : > { %v1658_v24 = vpop.permute.xlu0 %1657  ;;  %v1918_v25 = vsel %vm1767_vm2, %v5262_v22, %v1306_v47 }
 0x109   : > { %v1972_v28 = vsel %vm1767_vm2, %v5986_v5, %v1658_v24 }
 0x10a   : > { %3648 = vmatmul.mubr.msk.bf16.gmra.mxu0 %vm1767_vm2, %v1736_v17 }
 0x10b   : > { %2962 = vmatprep.mubr.bf16.mxu0 %v4186_v31  ;;  %v1308_v26 = vpop.permute.xlu1 %1307 }
 0x10c   : > { %v1922_v51 = vsel %vm1767_vm2, %v5273_v8, %v1308_v26 }
 0x10e   : > { %2770 = vmatmul.mubr.bf16.gmra.mxu1 %v1906_v46 }
 0x10f   : > { %2779 = vmatprep.mubr.bf16.mxu1 %v1966_v38  ;;  %v1660_v14 = vpop.permute.xlu0 %1659 }
 0x110   : > { %v1975_v17 = vsel %vm1767_vm2, %v5987_v4, %v1660_v14 }
 0x112   : > { %3649 = vmatmul.mubr.msk.bf16.gmra.mxu0 %vm1767_vm2, %v1739_v34 }
 0x113   : > { %2972 = vmatprep.mubr.bf16.mxu0 %v4186_v31 }
 0x116   : > { %2780 = vmatmul.mubr.bf16.gmra.mxu1 %v1910_v56  ;;  %v1310_v44 = vpop.permute.xlu1 %1309 }
 0x117   : > { %2789 = vmatprep.mubr.bf16.mxu1 %v1969_v49  ;;  %v1662_v7 = vpop.permute.xlu0 %1661  ;;  %v1926_v48 = vsel %vm1767_vm2, %v5285_v3, %v1310_v44 }
 0x118   : > { %v1978_v22 = vsel %vm1767_vm2, %v5988_v10, %v1662_v7 }
 0x11a   : > { %3650 = vmatmul.mubr.msk.bf16.gmra.mxu0 %vm1767_vm2, %v1742_v19 }
 0x11b   : > { %2982 = vmatprep.mubr.bf16.mxu0 %v4186_v31 }
 0x11d   : > { %v1312_v9 = vpop.permute.xlu1 %1311 }
 0x11e   : > { %2790 = vmatmul.mubr.bf16.gmra.mxu1 %v1914_v23  ;;  %v1930_v46 = vsel %vm1767_vm2, %v5310_v52, %v1312_v9  ;;  %v2066_v9 = vlaneseq }
 0x11f   : > { %2799 = vmatprep.mubr.bf16.mxu1 %v1972_v28  ;;  %v1664_v16 = vpop.permute.xlu0 %1663 }
 0x122   : > { %3651 = vmatmul.mubr.msk.bf16.gmra.mxu0 %vm1767_vm2, %v1745_v37 }
 0x123   : > { %2992 = vmatprep.mubr.bf16.mxu0 %v4186_v31 }
 0x126   : > { %2800 = vmatmul.mubr.bf16.gmra.mxu1 %v1918_v25  ;;  %v1314_v43 = vpop.permute.xlu1 %1313 }
 0x127   : > { %2809 = vmatprep.mubr.bf16.mxu1 %v1975_v17  ;;  %v1666_v54 = vpop.permute.xlu0 %1665  ;;  %v1934_v33 = vsel %vm1767_vm2, %v5318_v53, %v1314_v43  ;;  %v2067_v43 = vshrl.u32 %v2066_v9, 7 }
 0x12a   : > { %3652 = vmatmul.mubr.msk.bf16.gmra.mxu0 %vm1767_vm2, %v5265_v61  ;;  %v5989_v61 = vld [vmem:[#allocation27_spill] sm:$0xff] }
 0x12b   : > { %3002 = vmatprep.mubr.bf16.mxu0 %v4186_v31  ;;  %v1981_v8 = vsel %vm1767_vm2, %v5989_v61, %v1664_v16 }
 0x12e   : > { %2810 = vmatmul.mubr.bf16.gmra.mxu1 %v1922_v51 }
 0x12f   : > { %2819 = vmatprep.mubr.bf16.mxu1 %v1978_v22 }
 0x130   : > { %v1668_v32 = vpop.permute.xlu0 %1667  ;;  %v1316_v27 = vpop.permute.xlu1 %1315 }
 0x131   : > { %v1938_v15 = vsel %vm1767_vm2, %v5332_v39, %v1316_v27  ;;  %v2068_v27 = vsub.s32 0, %v2067_v43 }
 0x132   : > { %3653 = vmatmul.mubr.msk.bf16.gmra.mxu0 %vm1767_vm2, %v5279_v12  ;;  %v5990_v12 = vld [vmem:[#allocation28_spill] sm:$0xff] }
 0x133   : > { %3012 = vmatprep.mubr.bf16.mxu0 %v4186_v31  ;;  %v1984_v3 = vsel %vm1767_vm2, %v5990_v12, %v1666_v54 }
 0x134   : > { %v1318_v53 = vpop.permute.xlu1 %1317 }
 0x135   : > { %v1942_v21 = vsel %vm1767_vm2, %v5347_v1, %v1318_v53 }
 0x136   : > { %2820 = vmatmul.mubr.bf16.gmra.mxu1 %v1926_v48 }
 0x137   : > { %2829 = vmatprep.mubr.bf16.mxu1 %v1981_v8  ;;  %v1670_v38 = vpop.permute.xlu0 %1669 }
 0x13a   : > { %3654 = vmatmul.mubr.msk.bf16.gmra.mxu0 %vm1767_vm2, %v5288_v42  ;;  %v5991_v42 = vld [vmem:[#allocation30_spill] sm:$0xff] }
 0x13b   : > { %3022 = vmatprep.mubr.bf16.mxu0 %v4186_v31  ;;  %v1987_v52 = vsel %vm1767_vm2, %v5991_v42, %v1668_v32 }
 0x13e   : > { %2830 = vmatmul.mubr.bf16.gmra.mxu1 %v1930_v46 }
 0x13f   : > { %2839 = vmatprep.mubr.bf16.mxu1 %v1984_v3 }
 0x142   : > { %3655 = vmatmul.mubr.msk.bf16.gmra.mxu0 %vm1767_vm2, %v5313_v40  ;;  %v1990_v40 = vsel %vm1767_vm2, %v5099_v60, %v1670_v38  ;;  %v2072_v38 = vsub.s32 1, %v2067_v43 }
 0x143   : > { %3032 = vmatprep.mubr.bf16.mxu0 %v4186_v31 }
 0x146   : > { %2840 = vmatmul.mubr.bf16.gmra.mxu1 %v1934_v33 }
 0x147   : > { %2849 = vmatprep.mubr.bf16.mxu1 %v1987_v52 }
 0x14a   : > { %3656 = vmatmul.mubr.msk.bf16.gmra.mxu0 %vm1767_vm2, %v5329_v45 }
 0x14b   : > { %3042 = vmatprep.mubr.bf16.mxu0 %v4186_v31 }
 0x14e   : > { %2850 = vmatmul.mubr.bf16.gmra.mxu1 %v1938_v15  ;;  %v2064_v15 = vld [vmem:[%s5890_s2] sm:$0x3] }
 0x14f   : > { %2859 = vmatprep.mubr.bf16.mxu1 %v1990_v40 }
 0x152   : > { %3657 = vmatmul.mubr.msk.bf16.gmra.mxu0 %vm1767_vm2, %v5335_v18 }
 0x153   : > { %3052 = vmatprep.mubr.bf16.mxu0 %v4186_v31 }
 0x156   : > { %2860 = vmatmul.mubr.bf16.gmra.mxu1 %v1942_v21 }
 0x15a   : > { %3658 = vmatmul.mubr.msk.bf16.gmra.mxu0 %vm1767_vm2, %v5350_v50  ;;  %v5500_v45 = vpop.f32.mrf.mxu1 }
 0x15c   : > { %v5502_v39 = vpop.f32.mrf.mxu1  ;;  %v5504_v60 = vpop.f32.mrf.mxu0 }
 0x15e   : > { %v5506_v20 = vpop.f32.mrf.mxu1  ;;  %v5508_v34 = vpop.f32.mrf.mxu0 }
 0x160   : > { %v5510_v18 = vpop.f32.mrf.mxu1  ;;  %v5512_v62 = vpop.f32.mrf.mxu0 }
 0x162   : > { %v5514_v1 = vpop.f32.mrf.mxu1  ;;  %v5516_v31 = vpop.f32.mrf.mxu0 }
 0x164   : > { %v5518_v0 = vpop.f32.mrf.mxu1 }
 0x165   : > { %v5520_v50 = vpop.f32.mrf.mxu0 }
 0x166   : > { %v5522_v58 = vpop.f32.mrf.mxu1 }
 0x167   : > { %v5524_v36 = vpop.f32.mrf.mxu0 }
 0x168   : > { %v5526_v57 = vpop.f32.mrf.mxu1 }
 0x169   : > { %v5528_v56 = vpop.f32.mrf.mxu0 }
 0x16a   : > { %v5530_v59 = vpop.f32.mrf.mxu1 }
 0x16b   : > { %v5532_v55 = vpop.f32.mrf.mxu0 }
 0x16c   : > { %v5534_v2 = vpop.f32.mrf.mxu1 }
 0x16e   : > { %v5536_v13 = vpop.f32.mrf.mxu0  ;;  %v5538_v49 = vpop.f32.mrf.mxu1 }
 0x170   : > { %v5540_v63 = vpop.f32.mrf.mxu0  ;;  %v5542_v19 = vpop.f32.mrf.mxu1 }
 0x172   : > { %v5544_v6 = vpop.f32.mrf.mxu0  ;;  %v5546_v41 = vpop.f32.mrf.mxu1 }
 0x174   : > { %v5548_v30 = vpop.f32.mrf.mxu0  ;;  %v5550_v24 = vpop.f32.mrf.mxu1 }
 0x176   : > { %v5552_v23 = vpop.f32.mrf.mxu0  ;;  %v5554_v35 = vpop.f32.mrf.mxu1 }
 0x178   : > { %v5556_v11 = vpop.f32.mrf.mxu0  ;;  %v5558_v29 = vpop.f32.mrf.mxu1 }
 0x179   : > { %5992 = vst [vmem:[#allocation23_spill] sm:$0xff] %v5558_v29 }
 0x17a   : > { %v5560_v5 = vpop.f32.mrf.mxu0 }
 0x17b   : > { %v5562_v28 = vpop.f32.mrf.mxu1 }
 0x17c   : > { %5993 = vst [vmem:[#allocation25_spill] sm:$0xff] %v5562_v28  ;;  %v5564_v37 = vpop.f32.mrf.mxu0 }
 0x17d   : > { %v5566_v47 = vpop.f32.mrf.mxu1 }
 0x17e   : > { %5994 = vst [vmem:[#allocation9_spill] sm:$0xff] %v5566_v47 }
 0x17f   : > { %v5570_v25 = vpop.f32.mrf.mxu1 }
 0x180   : > { %v5568_v14 = vpop.f32.mrf.mxu0  ;;  %5995 = vst [vmem:[#allocation26_spill] sm:$0xff] %v5570_v25 }
 0x181   : > { %v5574_v17 = vpop.f32.mrf.mxu1 }
 0x182   : > { %v5572_v4 = vpop.f32.mrf.mxu0  ;;  %5996 = vst [vmem:[#allocation29_spill] sm:$0xff] %v5574_v17 }
 0x184   : > { %v5576_v26 = vpop.f32.mrf.mxu0  ;;  %v5578_v7 = vpop.f32.mrf.mxu1 }
 0x185   : > { %5997 = vst [vmem:[#allocation11_spill] sm:$0xff] %v5578_v7 }
 0x186   : > { %v5580_v51 = vpop.f32.mrf.mxu0  ;;  %v5582_v10 = vpop.f32.mrf.mxu1 }
 0x187   : > { %5998 = vst [vmem:[#allocation31_spill] sm:$0xff] %v5582_v10 }
 0x188   : > { %v5584_v22 = vpop.f32.mrf.mxu0  ;;  %v5586_v44 = vpop.f32.mrf.mxu1 }
 0x189   : > { %5999 = vst [vmem:[#allocation32_spill] sm:$0xff] %v5586_v44 }
 0x18a   : > { %v5588_v16 = vpop.f32.mrf.mxu0  ;;  %v5590_v48 = vpop.f32.mrf.mxu1 }
 0x18b   : > { %6000 = vst [vmem:[#allocation12_spill] sm:$0xff] %v5590_v48 }
 0x18c   : > { %v5592_v61 = vpop.f32.mrf.mxu0  ;;  %v5594_v8 = vpop.f32.mrf.mxu1 }
 0x18d   : > { %6001 = vst [vmem:[#allocation13_spill] sm:$0xff] %v5594_v8 }
 0x18e   : > { %v5596_v54 = vpop.f32.mrf.mxu0  ;;  %v5598_v46 = vpop.f32.mrf.mxu1 }
 0x18f   : > { %6002 = vst [vmem:[#allocation5_spill] sm:$0xff] %v5598_v46 }
 0x190   : > { %v5602_v3 = vpop.f32.mrf.mxu1 }
 0x191   : > { %v5600_v12 = vpop.f32.mrf.mxu0  ;;  %6003 = vst [vmem:[#allocation14_spill] sm:$0xff] %v5602_v3  ;;  %v5625_v3 = vrot.slane %v2064_v15, %v2072_v38 }
 0x192   : > { %v5606_v33 = vpop.f32.mrf.mxu1 }
 0x193   : > { %v5604_v32 = vpop.f32.mrf.mxu0  ;;  %6004 = vst [vmem:[#allocation6_spill] sm:$0xff] %v5606_v33  ;;  %v5623_v33 = vrot.slane %v2064_v15, %v2068_v27 }
 0x195   : > { %v5608_v42 = vpop.f32.mrf.mxu0  ;;  %v2519_v46 = vadd.f32 %v5504_v60, %v5623_v33  ;;  %v2523_v38 = vadd.f32 %v5512_v62, %v5623_v33  ;;  %v2525_v60 = vadd.f32 %v5516_v31, %v5625_v3 }
 0x196   : > { %v5610_v52 = vpop.f32.mrf.mxu1 }
 0x197   : > { %6005 = vst [vmem:[#allocation15_spill] sm:$0xff] %v5610_v52  ;;  %v5615_v40 = vpop.f32.mrf.mxu0 }
 0x198   : > { %v5617_v53 = vpop.f32.mrf.mxu1 }
 0x199   : > { %6006 = vst [vmem:[#allocation7_spill] sm:$0xff] %v5617_v53  ;;  %v2521_v53 = vadd.f32 %v5508_v34, %v5625_v3  ;;  %v2529_v34 = vadd.f32 %v5520_v50, %v5623_v33  ;;  %v2533_v50 = vadd.f32 %v5528_v56, %v5623_v33  ;;  %v2539_v56 = vadd.f32 %v5536_v13, %v5623_v33 }
 0x19a   : > { %v5619_v21 = vpop.f32.mrf.mxu0  ;;  %v5621_v9 = vpop.f32.mrf.mxu1  ;;  %v2543_v13 = vadd.f32 %v5544_v6, %v5623_v33  ;;  %v2549_v6 = vadd.f32 %v5552_v23, %v5623_v33  ;;  %v2553_v23 = vadd.f32 %v5560_v5, %v5623_v33  ;;  %v2559_v5 = vadd.f32 %v5568_v14, %v5623_v33 }
 0x19b   : > { %6007 = vst [vmem:[#allocation16_spill] sm:$0xff] %v5621_v9  ;;  %v2563_v14 = vadd.f32 %v5576_v26, %v5623_v33  ;;  %v2569_v26 = vadd.f32 %v5584_v22, %v5623_v33  ;;  %v2573_v22 = vadd.f32 %v5592_v61, %v5623_v33  ;;  %v2579_v61 = vadd.f32 %v5600_v12, %v5623_v33 }
 0x19c   : > { %v5627_v52 = vpop.f32.mrf.mxu0  ;;  %v5629_v43 = vpop.f32.mrf.mxu1  ;;  %v2583_v12 = vadd.f32 %v5608_v42, %v5623_v33  ;;  %v2589_v42 = vadd.f32 %v5619_v21, %v5623_v33 }
 0x19d   : > { %6008 = vst [vmem:[#allocation8_spill] sm:$0xff] %v5629_v43 }
 0x19e   : > { %v5633_v8 = vpop.f32.mrf.mxu0  ;;  %v2711_v48 = vpop.f32.mrf.mxu1 }
 0x19f   : > { %v2712_v44 = vadd.f32 %v2711_v48, %v2519_v46  ;;  %v2593_v21 = vadd.f32 %v5633_v8, %v5623_v33  ;;  %v2599_v8 = vadd.f32 %v5500_v45, %v5623_v33  ;;  %v2603_v45 = vadd.f32 %v5506_v20, %v5623_v33 }
 0x1a0   : > { %v5638_v9 = vpop.f32.mrf.mxu0  ;;  %v2713_v27 = vpop.f32.mrf.mxu1  ;;  %v2609_v20 = vadd.f32 %v5514_v1, %v5623_v33  ;;  %v2613_v1 = vadd.f32 %v5522_v58, %v5623_v33  ;;  %v2619_v58 = vadd.f32 %v5530_v59, %v5623_v33  ;;  %v2623_v59 = vadd.f32 %v5538_v49, %v5623_v33 }
 0x1a1   : > { %v2714_v15 = vadd.f32 %v2713_v27, %v2521_v53  ;;  %v2531_v53 = vadd.f32 %v5524_v36, %v5625_v3  ;;  %v2629_v49 = vadd.f32 %v5546_v41, %v5623_v33  ;;  %v2633_v41 = vadd.f32 %v5554_v35, %v5623_v33 }
 0x1a2   : > { %v2904_v43 = vpop.f32.mrf.mxu0  ;;  %v2715_v10 = vpop.f32.mrf.mxu1 }
 0x1a3   : > { %v2905_v7 = vadd.f32 %v2904_v43, %v2712_v44  ;;  %v2716_v17 = vadd.f32 %v2715_v10, %v2523_v38 }
 0x1a4   : > { %v2906_v25 = vpop.f32.mrf.mxu0  ;;  %v2717_v47 = vpop.f32.mrf.mxu1 }
 0x1a5   : > { %v3063_v48 = vmax.f32 %v2905_v7, 0.0  ;;  %v2907_v46 = vadd.f32 %v2906_v25, %v2714_v15  ;;  %v2718_v28 = vadd.f32 %v2717_v47, %v2525_v60  ;;  %v2535_v15 = vadd.f32 %v5532_v55, %v5625_v3 }
 0x1a6   : > { %v2908_v29 = vpop.f32.mrf.mxu0  ;;  %v2721_v62 = vpop.f32.mrf.mxu1  ;;  %v2541_v55 = vadd.f32 %v5540_v63, %v5625_v3  ;;  %v2545_v63 = vadd.f32 %v5548_v30, %v5625_v3  ;;  %v2551_v30 = vadd.f32 %v5556_v11, %v5625_v3  ;;  %v2555_v11 = vadd.f32 %v5564_v37, %v5625_v3 }
 0x1a7   : > { %3127 = vst [vmem:[%s5650_s21] sm:$0xff] %v3063_v48  ;;  %v3064_v31 = vmax.f32 %v2907_v46, 0.0  ;;  %v2909_v10 = vadd.f32 %v2908_v29, %v2716_v17  ;;  %v2722_v44 = vadd.f32 %v2721_v62, %v2529_v34  ;;  %v2561_v37 = vadd.f32 %v5572_v4, %v5625_v3 }
 0x1a8   : > { %v2910_v43 = vpop.f32.mrf.mxu0  ;;  %v2723_v27 = vpop.f32.mrf.mxu1  ;;  %v2565_v4 = vadd.f32 %v5580_v51, %v5625_v3  ;;  %v2571_v51 = vadd.f32 %v5588_v16, %v5625_v3  ;;  %v2575_v16 = vadd.f32 %v5596_v54, %v5625_v3  ;;  %v2581_v54 = vadd.f32 %v5604_v32, %v5625_v3 }
 0x1a9   : > { %3659 = vst [vmem:[%s5650_s21 + $0x10] sm:$0xff] %v3064_v31  ;;  %v3065_v47 = vmax.f32 %v2909_v10, 0.0  ;;  %v2911_v25 = vadd.f32 %v2910_v43, %v2718_v28  ;;  %v2724_v7 = vadd.f32 %v2723_v27, %v2531_v53  ;;  %v2585_v32 = vadd.f32 %v5615_v40, %v5625_v3 }
 0x1aa   : > { %v2914_v36 = vpop.f32.mrf.mxu0  ;;  %v2725_v38 = vpop.f32.mrf.mxu1  ;;  %v2591_v40 = vadd.f32 %v5627_v52, %v5625_v3  ;;  %v2595_v52 = vadd.f32 %v5638_v9, %v5625_v3  ;;  %v2601_v9 = vadd.f32 %v5502_v39, %v5625_v3  ;;  %v2605_v39 = vadd.f32 %v5510_v18, %v5625_v3 }
 0x1ab   : > { %3128 = vst [vmem:[%s5650_s21 + $0x8] sm:$0xff] %v3065_v47  ;;  %v3066_v60 = vmax.f32 %v2911_v25, 0.0  ;;  %v2915_v29 = vadd.f32 %v2914_v36, %v2722_v44  ;;  %v2726_v17 = vadd.f32 %v2725_v38, %v2533_v50  ;;  %v2611_v18 = vadd.f32 %v5518_v0, %v5625_v3 }
 0x1ac   : > { %v2916_v34 = vpop.f32.mrf.mxu0  ;;  %v2727_v48 = vpop.f32.mrf.mxu1  ;;  %v2615_v0 = vadd.f32 %v5526_v57, %v5625_v3  ;;  %v2621_v57 = vadd.f32 %v5534_v2, %v5625_v3  ;;  %v2625_v2 = vadd.f32 %v5542_v19, %v5625_v3  ;;  %v2631_v19 = vadd.f32 %v5550_v24, %v5625_v3 }
 0x1ad   : > { %3660 = vst [vmem:[%s5650_s21 + $0x18] sm:$0xff] %v3066_v60  ;;  %v3067_v46 = vmax.f32 %v2915_v29, 0.0  ;;  %v2917_v28 = vadd.f32 %v2916_v34, %v2724_v7  ;;  %v2728_v62 = vadd.f32 %v2727_v48, %v2535_v15 }
 0x1ae   : > { %v2918_v53 = vpop.f32.mrf.mxu0  ;;  %v2731_v31 = vpop.f32.mrf.mxu1 }
 0x1af   : > { %3129 = vst [vmem:[%s5650_s21 + $0x20] sm:$0xff] %v3067_v46  ;;  %v3068_v10 = vmax.f32 %v2917_v28, 0.0  ;;  %v2919_v44 = vadd.f32 %v2918_v53, %v2726_v17  ;;  %v2732_v43 = vadd.f32 %v2731_v31, %v2539_v56 }
 0x1b0   : > { %v2920_v27 = vpop.f32.mrf.mxu0  ;;  %v2733_v50 = vpop.f32.mrf.mxu1 }
 0x1b1   : > { %3661 = vst [vmem:[%s5650_s21 + $0x30] sm:$0xff] %v3068_v10  ;;  %v3069_v47 = vmax.f32 %v2919_v44, 0.0  ;;  %v2921_v25 = vadd.f32 %v2920_v27, %v2728_v62  ;;  %v2734_v7 = vadd.f32 %v2733_v50, %v2541_v55 }
 0x1b2   : > { %v2924_v36 = vpop.f32.mrf.mxu0  ;;  %v2735_v38 = vpop.f32.mrf.mxu1 }
 0x1b3   : > { %3130 = vst [vmem:[%s5650_s21 + $0x28] sm:$0xff] %v3069_v47  ;;  %v3070_v15 = vmax.f32 %v2921_v25, 0.0  ;;  %v2925_v60 = vadd.f32 %v2924_v36, %v2732_v43  ;;  %v2736_v29 = vadd.f32 %v2735_v38, %v2543_v13 }
 0x1b4   : > { %v2926_v17 = vpop.f32.mrf.mxu0  ;;  %v2737_v34 = vpop.f32.mrf.mxu1 }
 0x1b5   : > { %3662 = vst [vmem:[%s5650_s21 + $0x38] sm:$0xff] %v3070_v15  ;;  %v3071_v48 = vmax.f32 %v2925_v60, 0.0  ;;  %v2927_v56 = vadd.f32 %v2926_v17, %v2734_v7  ;;  %v2738_v46 = vadd.f32 %v2737_v34, %v2545_v63 }
 0x1b6   : > { %v2928_v28 = vpop.f32.mrf.mxu0  ;;  %v2741_v62 = vpop.f32.mrf.mxu1 }
 0x1b7   : > { %3131 = vst [vmem:[%s5650_s21 + $0x40] sm:$0xff] %v3071_v48  ;;  %v3072_v53 = vmax.f32 %v2927_v56, 0.0  ;;  %v2929_v31 = vadd.f32 %v2928_v28, %v2736_v29  ;;  %v2742_v55 = vadd.f32 %v2741_v62, %v2549_v6 }
 0x1b8   : > { %v2930_v10 = vpop.f32.mrf.mxu0  ;;  %v2743_v44 = vpop.f32.mrf.mxu1 }
 0x1b9   : > { %3663 = vst [vmem:[%s5650_s21 + $0x50] sm:$0xff] %v3072_v53  ;;  %v3073_v43 = vmax.f32 %v2929_v31, 0.0  ;;  %v2931_v27 = vadd.f32 %v2930_v10, %v2738_v46  ;;  %v2744_v50 = vadd.f32 %v2743_v44, %v2551_v30 }
 0x1ba   : > { %v2934_v13 = vpop.f32.mrf.mxu0  ;;  %v2745_v47 = vpop.f32.mrf.mxu1 }
 0x1bb   : > { %3132 = vst [vmem:[%s5650_s21 + $0x48] sm:$0xff] %v3073_v43  ;;  %v3074_v25 = vmax.f32 %v2931_v27, 0.0  ;;  %v2935_v7 = vadd.f32 %v2934_v13, %v2742_v55  ;;  %v2746_v36 = vadd.f32 %v2745_v47, %v2553_v23 }
 0x1bc   : > { %v2936_v38 = vpop.f32.mrf.mxu0  ;;  %v2747_v63 = vpop.f32.mrf.mxu1 }
 0x1bd   : > { %3664 = vst [vmem:[%s5650_s21 + $0x58] sm:$0xff] %v3074_v25  ;;  %v3075_v15 = vmax.f32 %v2935_v7, 0.0  ;;  %v2937_v60 = vadd.f32 %v2936_v38, %v2744_v50  ;;  %v2748_v29 = vadd.f32 %v2747_v63, %v2555_v11 }
 0x1be   : > { %v2938_v17 = vpop.f32.mrf.mxu0  ;;  %v2751_v34 = vpop.f32.mrf.mxu1 }
 0x1bf   : > { %3133 = vst [vmem:[%s5650_s21 + $0x60] sm:$0xff] %v3075_v15  ;;  %v3076_v6 = vmax.f32 %v2937_v60, 0.0  ;;  %v2939_v48 = vadd.f32 %v2938_v17, %v2746_v36  ;;  %v2752_v56 = vadd.f32 %v2751_v34, %v2559_v5 }
 0x1c0   : > { %v2940_v46 = vpop.f32.mrf.mxu0  ;;  %v2753_v28 = vpop.f32.mrf.mxu1 }
 0x1c1   : > { %3665 = vst [vmem:[%s5650_s21 + $0x70] sm:$0xff] %v3076_v6  ;;  %v3077_v62 = vmax.f32 %v2939_v48, 0.0  ;;  %v2941_v30 = vadd.f32 %v2940_v46, %v2748_v29  ;;  %v2754_v53 = vadd.f32 %v2753_v28, %v2561_v37 }
 0x1c2   : > { %v2944_v31 = vpop.f32.mrf.mxu0  ;;  %v2755_v55 = vpop.f32.mrf.mxu1 }
 0x1c3   : > { %3134 = vst [vmem:[%s5650_s21 + $0x68] sm:$0xff] %v3077_v62  ;;  %v3078_v10 = vmax.f32 %v2941_v30, 0.0  ;;  %v2945_v44 = vadd.f32 %v2944_v31, %v2752_v56  ;;  %v2756_v23 = vadd.f32 %v2755_v55, %v2563_v14 }
 0x1c4   : > { %v2946_v43 = vpop.f32.mrf.mxu0  ;;  %v2757_v27 = vpop.f32.mrf.mxu1 }
 0x1c5   : > { %3666 = vst [vmem:[%s5650_s21 + $0x78] sm:$0xff] %v3078_v10  ;;  %v3079_v50 = vmax.f32 %v2945_v44, 0.0  ;;  %v2947_v13 = vadd.f32 %v2946_v43, %v2754_v53  ;;  %v2758_v47 = vadd.f32 %v2757_v27, %v2565_v4 }
 0x1c6   : > { %v2948_v11 = vpop.f32.mrf.mxu0  ;;  %v2761_v25 = vpop.f32.mrf.mxu1 }
 0x1c7   : > { %3135 = vst [vmem:[%s5650_s21 + $0x80] sm:$0xff] %v3079_v50  ;;  %v3080_v7 = vmax.f32 %v2947_v13, 0.0  ;;  %v2949_v36 = vadd.f32 %v2948_v11, %v2756_v23  ;;  %v2762_v38 = vadd.f32 %v2761_v25, %v2569_v26 }
 0x1c8   : > { %v2950_v63 = vpop.f32.mrf.mxu0  ;;  %v2763_v5 = vpop.f32.mrf.mxu1 }
 0x1c9   : > { %3667 = vst [vmem:[%s5650_s21 + $0x90] sm:$0xff] %v3080_v7  ;;  %v3081_v15 = vmax.f32 %v2949_v36, 0.0  ;;  %v2951_v60 = vadd.f32 %v2950_v63, %v2758_v47  ;;  %v2764_v29 = vadd.f32 %v2763_v5, %v2571_v51 }
 0x1ca   : > { %v2954_v17 = vpop.f32.mrf.mxu0  ;;  %v2765_v34 = vpop.f32.mrf.mxu1 }
 0x1cb   : > { %3136 = vst [vmem:[%s5650_s21 + $0x88] sm:$0xff] %v3081_v15  ;;  %v3082_v37 = vmax.f32 %v2951_v60, 0.0  ;;  %v2955_v6 = vadd.f32 %v2954_v17, %v2762_v38  ;;  %v2766_v48 = vadd.f32 %v2765_v34, %v2573_v22 }
 0x1cc   : > { %v2956_v56 = vpop.f32.mrf.mxu0  ;;  %v2767_v46 = vpop.f32.mrf.mxu1 }
 0x1cd   : > { %3668 = vst [vmem:[%s5650_s21 + $0x98] sm:$0xff] %v3082_v37  ;;  %v3083_v28 = vmax.f32 %v2955_v6, 0.0  ;;  %v2957_v14 = vadd.f32 %v2956_v56, %v2764_v29  ;;  %v2768_v62 = vadd.f32 %v2767_v46, %v2575_v16 }
 0x1ce   : > { %v2958_v30 = vpop.f32.mrf.mxu0  ;;  %v2771_v53 = vpop.f32.mrf.mxu1 }
 0x1cf   : > { %3137 = vst [vmem:[%s5650_s21 + $0xa0] sm:$0xff] %v3083_v28  ;;  %v3084_v31 = vmax.f32 %v2957_v14, 0.0  ;;  %v2959_v55 = vadd.f32 %v2958_v30, %v2766_v48  ;;  %v2772_v4 = vadd.f32 %v2771_v53, %v2579_v61 }
 0x1d0   : > { %v2960_v10 = vpop.f32.mrf.mxu0  ;;  %v2773_v44 = vpop.f32.mrf.mxu1 }
 0x1d1   : > { %3669 = vst [vmem:[%s5650_s21 + $0xb0] sm:$0xff] %v3084_v31  ;;  %v3085_v23 = vmax.f32 %v2959_v55, 0.0  ;;  %v2961_v43 = vadd.f32 %v2960_v10, %v2768_v62  ;;  %v2774_v27 = vadd.f32 %v2773_v44, %v2581_v54 }
 0x1d2   : > { %v2964_v26 = vpop.f32.mrf.mxu0  ;;  %v2775_v50 = vpop.f32.mrf.mxu1 }
 0x1d3   : > { %3138 = vst [vmem:[%s5650_s21 + $0xa8] sm:$0xff] %v3085_v23  ;;  %v3086_v13 = vmax.f32 %v2961_v43, 0.0  ;;  %v2965_v47 = vadd.f32 %v2964_v26, %v2772_v4  ;;  %v2776_v11 = vadd.f32 %v2775_v50, %v2583_v12 }
 0x1d4   : > { %v2966_v25 = vpop.f32.mrf.mxu0  ;;  %v2777_v51 = vpop.f32.mrf.mxu1 }
 0x1d5   : > { %3670 = vst [vmem:[%s5650_s21 + $0xb8] sm:$0xff] %v3086_v13  ;;  %v3087_v7 = vmax.f32 %v2965_v47, 0.0  ;;  %v2967_v36 = vadd.f32 %v2966_v25, %v2774_v27  ;;  %v2778_v38 = vadd.f32 %v2777_v51, %v2585_v32 }
 0x1d6   : > { %v2968_v63 = vpop.f32.mrf.mxu0  ;;  %v2781_v5 = vpop.f32.mrf.mxu1 }
 0x1d7   : > { %3139 = vst [vmem:[%s5650_s21 + $0xc0] sm:$0xff] %v3087_v7  ;;  %v3088_v22 = vmax.f32 %v2967_v36, 0.0  ;;  %v2969_v15 = vadd.f32 %v2968_v63, %v2776_v11  ;;  %v2782_v60 = vadd.f32 %v2781_v5, %v2589_v42 }
 0x1d8   : > { %v2970_v29 = vpop.f32.mrf.mxu0  ;;  %v2783_v17 = vpop.f32.mrf.mxu1 }
 0x1d9   : > { %3671 = vst [vmem:[%s5650_s21 + $0xd0] sm:$0xff] %v3088_v22  ;;  %v3089_v34 = vmax.f32 %v2969_v15, 0.0  ;;  %v2971_v16 = vadd.f32 %v2970_v29, %v2778_v38  ;;  %v2784_v37 = vadd.f32 %v2783_v17, %v2591_v40 }
 0x1da   : > { %v2974_v6 = vpop.f32.mrf.mxu0  ;;  %v2785_v48 = vpop.f32.mrf.mxu1 }
 0x1db   : > { %3140 = vst [vmem:[%s5650_s21 + $0xc8] sm:$0xff] %v3089_v34  ;;  %v3090_v56 = vmax.f32 %v2971_v16, 0.0  ;;  %v2975_v46 = vadd.f32 %v2974_v6, %v2782_v60  ;;  %v2786_v61 = vadd.f32 %v2785_v48, %v2593_v21 }
 0x1dc   : > { %v2976_v28 = vpop.f32.mrf.mxu0  ;;  %v2787_v14 = vpop.f32.mrf.mxu1 }
 0x1dd   : > { %3672 = vst [vmem:[%s5650_s21 + $0xd8] sm:$0xff] %v3090_v56  ;;  %v3091_v62 = vmax.f32 %v2975_v46, 0.0  ;;  %v2977_v30 = vadd.f32 %v2976_v28, %v2784_v37  ;;  %v2788_v53 = vadd.f32 %v2787_v14, %v2595_v52 }
 0x1de   : > { %v2978_v54 = vpop.f32.mrf.mxu0  ;;  %v2791_v31 = vpop.f32.mrf.mxu1 }
 0x1df   : > { %3141 = vst [vmem:[%s5650_s21 + $0xe0] sm:$0xff] %v3091_v62  ;;  %v3092_v55 = vmax.f32 %v2977_v30, 0.0  ;;  %v2979_v4 = vadd.f32 %v2978_v54, %v2786_v61  ;;  %v2792_v10 = vadd.f32 %v2791_v31, %v2599_v8 }
 0x1e0   : > { %v2980_v44 = vpop.f32.mrf.mxu0  ;;  %v2793_v12 = vpop.f32.mrf.mxu1 }
 0x1e1   : > { %3673 = vst [vmem:[%s5650_s21 + $0xf0] sm:$0xff] %v3092_v55  ;;  %v3093_v23 = vmax.f32 %v2979_v4, 0.0  ;;  %v2981_v43 = vadd.f32 %v2980_v44, %v2788_v53  ;;  %v2794_v27 = vadd.f32 %v2793_v12, %v2601_v9 }
 0x1e2   : > { %v2984_v26 = vpop.f32.mrf.mxu0  ;;  %v2795_v50 = vpop.f32.mrf.mxu1 }
 0x1e3   : > { %3142 = vst [vmem:[%s5650_s21 + $0xe8] sm:$0xff] %v3093_v23  ;;  %v3094_v32 = vmax.f32 %v2981_v43, 0.0  ;;  %v2985_v13 = vadd.f32 %v2984_v26, %v2792_v10  ;;  %v2796_v47 = vadd.f32 %v2795_v50, %v2603_v45 }
 0x1e4   : > { %v2986_v11 = vpop.f32.mrf.mxu0  ;;  %v2797_v25 = vpop.f32.mrf.mxu1 }
 0x1e5   : > { %3674 = vst [vmem:[%s5650_s21 + $0xf8] sm:$0xff] %v3094_v32  ;;  %v3095_v51 = vmax.f32 %v2985_v13, 0.0  ;;  %v2987_v42 = vadd.f32 %v2986_v11, %v2794_v27  ;;  %v2798_v7 = vadd.f32 %v2797_v25, %v2605_v39 }
 0x1e6   : > { %v2988_v36 = vpop.f32.mrf.mxu0  ;;  %v2801_v38 = vpop.f32.mrf.mxu1 }
 0x1e7   : > { %3143 = vst [vmem:[%s5650_s21 + $0x100] sm:$0xff] %v3095_v51  ;;  %v3096_v63 = vmax.f32 %v2987_v42, 0.0  ;;  %v2989_v5 = vadd.f32 %v2988_v36, %v2796_v47  ;;  %v2802_v40 = vadd.f32 %v2801_v38, %v2609_v20 }
 0x1e8   : > { %v2990_v22 = vpop.f32.mrf.mxu0  ;;  %v2803_v15 = vpop.f32.mrf.mxu1 }
 0x1e9   : > { %3675 = vst [vmem:[%s5650_s21 + $0x110] sm:$0xff] %v3096_v63  ;;  %v3097_v60 = vmax.f32 %v2989_v5, 0.0  ;;  %v2991_v29 = vadd.f32 %v2990_v22, %v2798_v7  ;;  %v2804_v17 = vadd.f32 %v2803_v15, %v2611_v18  ;;  %v6009_v18 = vld [vmem:[#allocation23_spill] sm:$0xff] }
 0x1ea   : > { %v2994_v21 = vpop.f32.mrf.mxu0  ;;  %v2805_v34 = vpop.f32.mrf.mxu1  ;;  %v2635_v24 = vadd.f32 %v6009_v18, %v5625_v3 }
 0x1eb   : > { %3144 = vst [vmem:[%s5650_s21 + $0x108] sm:$0xff] %v3097_v60  ;;  %v3098_v16 = vmax.f32 %v2991_v29, 0.0  ;;  %v2995_v37 = vadd.f32 %v2994_v21, %v2802_v40  ;;  %v2806_v6 = vadd.f32 %v2805_v34, %v2613_v1  ;;  %v6010_v1 = vld [vmem:[#allocation25_spill] sm:$0xff] }
 0x1ec   : > { %v2996_v48 = vpop.f32.mrf.mxu0  ;;  %v2807_v52 = vpop.f32.mrf.mxu1  ;;  %v2639_v35 = vadd.f32 %v6010_v1, %v5623_v33 }
 0x1ed   : > { %3676 = vst [vmem:[%s5650_s21 + $0x118] sm:$0xff] %v3098_v16  ;;  %v3099_v56 = vmax.f32 %v2995_v37, 0.0  ;;  %v2997_v46 = vadd.f32 %v2996_v48, %v2804_v17  ;;  %v2808_v61 = vadd.f32 %v2807_v52, %v2615_v0  ;;  %v6011_v0 = vld [vmem:[#allocation9_spill] sm:$0xff] }
 0x1ee   : > { %v2998_v28 = vpop.f32.mrf.mxu0  ;;  %v2811_v14 = vpop.f32.mrf.mxu1  ;;  %v2641_v16 = vadd.f32 %v6011_v0, %v5625_v3 }
 0x1ef   : > { %3145 = vst [vmem:[%s5650_s21 + $0x120] sm:$0xff] %v3099_v56  ;;  %v3100_v8 = vmax.f32 %v2997_v46, 0.0  ;;  %v2999_v62 = vadd.f32 %v2998_v28, %v2806_v6  ;;  %v2812_v30 = vadd.f32 %v2811_v14, %v2619_v58  ;;  %v6012_v56 = vld [vmem:[#allocation26_spill] sm:$0xff] }
 0x1f0   : > { %v3000_v53 = vpop.f32.mrf.mxu0  ;;  %v2813_v54 = vpop.f32.mrf.mxu1  ;;  %v2643_v46 = vadd.f32 %v6012_v56, %v5623_v33 }
 0x1f1   : > { %3677 = vst [vmem:[%s5650_s21 + $0x130] sm:$0xff] %v3100_v8  ;;  %v3101_v31 = vmax.f32 %v2999_v62, 0.0  ;;  %v3001_v9 = vadd.f32 %v3000_v53, %v2808_v61  ;;  %v2814_v55 = vadd.f32 %v2813_v54, %v2621_v57  ;;  %v6013_v62 = vld [vmem:[#allocation29_spill] sm:$0xff] }
 0x1f2   : > { %v3004_v4 = vpop.f32.mrf.mxu0  ;;  %v2815_v10 = vpop.f32.mrf.mxu1 }
 0x1f3   : > { %3146 = vst [vmem:[%s5650_s21 + $0x128] sm:$0xff] %v3101_v31  ;;  %v3102_v44 = vmax.f32 %v3001_v9, 0.0  ;;  %v3005_v12 = vadd.f32 %v3004_v4, %v2812_v30  ;;  %v2816_v45 = vadd.f32 %v2815_v10, %v2623_v59  ;;  %v2645_v30 = vadd.f32 %v6013_v62, %v5625_v3 }
 0x1f4   : > { %v3006_v23 = vpop.f32.mrf.mxu0  ;;  %v2817_v43 = vpop.f32.mrf.mxu1 }
 0x1f5   : > { %3678 = vst [vmem:[%s5650_s21 + $0x138] sm:$0xff] %v3102_v44  ;;  %v3103_v27 = vmax.f32 %v3005_v12, 0.0  ;;  %v3007_v26 = vadd.f32 %v3006_v23, %v2814_v55  ;;  %v2818_v50 = vadd.f32 %v2817_v43, %v2625_v2  ;;  %v6014_v55 = vld [vmem:[#allocation11_spill] sm:$0xff] }
 0x1f6   : > { %v3008_v39 = vpop.f32.mrf.mxu0  ;;  %v2821_v32 = vpop.f32.mrf.mxu1  ;;  %v2649_v4 = vadd.f32 %v6014_v55, %v5623_v33  ;;  %v6015_v23 = vld [vmem:[#allocation31_spill] sm:$0xff] }
 0x1f7   : > { %3147 = vst [vmem:[%s5650_s21 + $0x140] sm:$0xff] %v3103_v27  ;;  %v3104_v13 = vmax.f32 %v3007_v26, 0.0  ;;  %v3009_v47 = vadd.f32 %v3008_v39, %v2816_v45  ;;  %v2822_v11 = vadd.f32 %v2821_v32, %v2629_v49  ;;  %v2651_v43 = vadd.f32 %v6015_v23, %v5625_v3  ;;  %v6016_v32 = vld [vmem:[#allocation32_spill] sm:$0xff] }
 0x1f8   : > { %v3010_v25 = vpop.f32.mrf.mxu0  ;;  %v2823_v20 = vpop.f32.mrf.mxu1 }
 0x1f9   : > { %3679 = vst [vmem:[%s5650_s21 + $0x150] sm:$0xff] %v3104_v13  ;;  %v3105_v51 = vmax.f32 %v3009_v47, 0.0  ;;  %v3011_v42 = vadd.f32 %v3010_v25, %v2818_v50  ;;  %v2824_v7 = vadd.f32 %v2823_v20, %v2631_v19  ;;  %v2653_v19 = vadd.f32 %v6016_v32, %v5623_v33 }
 0x1fa   : > { %v3014_v36 = vpop.f32.mrf.mxu0  ;;  %v2825_v38 = vpop.f32.mrf.mxu1 }
 0x1fb   : > { %3148 = vst [vmem:[%s5650_s21 + $0x148] sm:$0xff] %v3105_v51  ;;  %v3106_v63 = vmax.f32 %v3011_v42, 0.0  ;;  %v3015_v5 = vadd.f32 %v3014_v36, %v2822_v11  ;;  %v2826_v40 = vadd.f32 %v2825_v38, %v2633_v41  ;;  %v6017_v41 = vld [vmem:[#allocation12_spill] sm:$0xff] }
 0x1fc   : > { %v3016_v22 = vpop.f32.mrf.mxu0  ;;  %v2827_v15 = vpop.f32.mrf.mxu1  ;;  %v2655_v51 = vadd.f32 %v6017_v41, %v5625_v3 }
 0x1fd   : > { %3680 = vst [vmem:[%s5650_s21 + $0x158] sm:$0xff] %v3106_v63  ;;  %v3107_v60 = vmax.f32 %v3015_v5, 0.0  ;;  %v3017_v29 = vadd.f32 %v3016_v22, %v2824_v7  ;;  %v2828_v17 = vadd.f32 %v2827_v15, %v2635_v24  ;;  %v6018_v24 = vld [vmem:[#allocation13_spill] sm:$0xff] }
 0x1fe   : > { %v3018_v21 = vpop.f32.mrf.mxu0  ;;  %v2831_v34 = vpop.f32.mrf.mxu1  ;;  %v2659_v63 = vadd.f32 %v6018_v24, %v5623_v33 }
 0x1ff   : > { %3149 = vst [vmem:[%s5650_s21 + $0x160] sm:$0xff] %v3107_v60  ;;  %v3108_v37 = vmax.f32 %v3017_v29, 0.0  ;;  %v3019_v6 = vadd.f32 %v3018_v21, %v2826_v40  ;;  %v2832_v48 = vadd.f32 %v2831_v34, %v2639_v35  ;;  %v6019_v35 = vld [vmem:[#allocation5_spill] sm:$0xff] }
 0x200   : > { %v3020_v52 = vpop.f32.mrf.mxu0  ;;  %v2833_v58 = vpop.f32.mrf.mxu1  ;;  %v2661_v60 = vadd.f32 %v6019_v35, %v5625_v3 }
 0x201   : > { %3681 = vst [vmem:[%s5650_s21 + $0x170] sm:$0xff] %v3108_v37  ;;  %v3109_v61 = vmax.f32 %v3019_v6, 0.0  ;;  %v3021_v28 = vadd.f32 %v3020_v52, %v2828_v17  ;;  %v2834_v14 = vadd.f32 %v2833_v58, %v2641_v16  ;;  %v6020_v16 = vld [vmem:[#allocation14_spill] sm:$0xff] }
 0x202   : > { %v3024_v57 = vpop.f32.mrf.mxu0  ;;  %v2835_v8 = vpop.f32.mrf.mxu1  ;;  %v2663_v37 = vadd.f32 %v6020_v16, %v5623_v33 }
 0x203   : > { %3150 = vst [vmem:[%s5650_s21 + $0x168] sm:$0xff] %v3109_v61  ;;  %v3110_v53 = vmax.f32 %v3021_v28, 0.0  ;;  %v3025_v54 = vadd.f32 %v3024_v57, %v2832_v48  ;;  %v2836_v59 = vadd.f32 %v2835_v8, %v2643_v46  ;;  %v6021_v46 = vld [vmem:[#allocation6_spill] sm:$0xff] }
 0x204   : > { %v3026_v31 = vpop.f32.mrf.mxu0  ;;  %v2837_v9 = vpop.f32.mrf.mxu1  ;;  %v2665_v61 = vadd.f32 %v6021_v46, %v5625_v3 }
 0x205   : > { %3682 = vst [vmem:[%s5650_s21 + $0x178] sm:$0xff] %v3110_v53  ;;  %v3111_v10 = vmax.f32 %v3025_v54, 0.0  ;;  %v3027_v2 = vadd.f32 %v3026_v31, %v2834_v14  ;;  %v2838_v44 = vadd.f32 %v2837_v9, %v2645_v30  ;;  %v6022_v30 = vld [vmem:[#allocation15_spill] sm:$0xff] }
 0x206   : > { %v3028_v12 = vpop.f32.mrf.mxu0  ;;  %v2841_v45 = vpop.f32.mrf.mxu1  ;;  %v2669_v53 = vadd.f32 %v6022_v30, %v5623_v33 }
 0x207   : > { %3151 = vst [vmem:[%s5650_s21 + $0x180] sm:$0xff] %v3111_v10  ;;  %v3112_v49 = vmax.f32 %v3027_v2, 0.0  ;;  %v3029_v27 = vadd.f32 %v3028_v12, %v2836_v59  ;;  %v2842_v26 = vadd.f32 %v2841_v45, %v2649_v4  ;;  %v6023_v4 = vld [vmem:[#allocation7_spill] sm:$0xff] }
 0x208   : > { %v3030_v50 = vpop.f32.mrf.mxu0  ;;  %v2843_v39 = vpop.f32.mrf.mxu1  ;;  %v2671_v10 = vadd.f32 %v6023_v4, %v5625_v3 }
 0x209   : > { %3683 = vst [vmem:[%s5650_s21 + $0x190] sm:$0xff] %v3112_v49  ;;  %v3113_v13 = vmax.f32 %v3029_v27, 0.0  ;;  %v3031_v47 = vadd.f32 %v3030_v50, %v2838_v44  ;;  %v2844_v11 = vadd.f32 %v2843_v39, %v2651_v43  ;;  %v6024_v43 = vld [vmem:[#allocation16_spill] sm:$0xff] }
 0x20a   : > { %v3034_v25 = vpop.f32.mrf.mxu0  ;;  %v2845_v20 = vpop.f32.mrf.mxu1  ;;  %v2673_v49 = vadd.f32 %v6024_v43, %v5623_v33 }
 0x20b   : > { %3152 = vst [vmem:[%s5650_s21 + $0x188] sm:$0xff] %v3113_v13  ;;  %v3114_v42 = vmax.f32 %v3031_v47, 0.0  ;;  %v3035_v7 = vadd.f32 %v3034_v25, %v2842_v26  ;;  %v2846_v36 = vadd.f32 %v2845_v20, %v2653_v19  ;;  %v6025_v19 = vld [vmem:[#allocation8_spill] sm:$0xff] }
 0x20c   : > { %v3036_v38 = vpop.f32.mrf.mxu0  ;;  %v2847_v18 = vpop.f32.mrf.mxu1  ;;  %v2675_v13 = vadd.f32 %v6025_v19, %v5625_v3 }
 0x20d   : > { %3684 = vst [vmem:[%s5650_s21 + $0x198] sm:$0xff] %v3114_v42  ;;  %v3115_v5 = vmax.f32 %v3035_v7, 0.0  ;;  %v3037_v40 = vadd.f32 %v3036_v38, %v2844_v11  ;;  %v2848_v22 = vadd.f32 %v2847_v18, %v2655_v51 }
 0x20e   : > { %v3038_v15 = vpop.f32.mrf.mxu0  ;;  %v2851_v1 = vpop.f32.mrf.mxu1 }
 0x20f   : > { %3153 = vst [vmem:[%s5650_s21 + $0x1a0] sm:$0xff] %v3115_v5  ;;  %v3116_v29 = vmax.f32 %v3037_v40, 0.0  ;;  %v3039_v17 = vadd.f32 %v3038_v15, %v2846_v36  ;;  %v2852_v21 = vadd.f32 %v2851_v1, %v2659_v63 }
 0x210   : > { %v3040_v34 = vpop.f32.mrf.mxu0  ;;  %v2853_v0 = vpop.f32.mrf.mxu1 }
 0x211   : > { %3685 = vst [vmem:[%s5650_s21 + $0x1b0] sm:$0xff] %v3116_v29  ;;  %v3117_v6 = vmax.f32 %v3039_v17, 0.0  ;;  %v3041_v48 = vadd.f32 %v3040_v34, %v2848_v22  ;;  %v2854_v52 = vadd.f32 %v2853_v0, %v2661_v60 }
 0x212   : > { %v3044_v58 = vpop.f32.mrf.mxu0  ;;  %v2855_v56 = vpop.f32.mrf.mxu1 }
 0x213   : > { %3154 = vst [vmem:[%s5650_s21 + $0x1a8] sm:$0xff] %v3117_v6  ;;  %v3118_v28 = vmax.f32 %v3041_v48, 0.0  ;;  %v3045_v14 = vadd.f32 %v3044_v58, %v2852_v21  ;;  %v2856_v57 = vadd.f32 %v2855_v56, %v2663_v37 }
 0x214   : > { %v3046_v8 = vpop.f32.mrf.mxu0  ;;  %v2857_v62 = vpop.f32.mrf.mxu1 }
 0x215   : > { %3686 = vst [vmem:[%s5650_s21 + $0x1b8] sm:$0xff] %v3118_v28  ;;  %v3119_v54 = vmax.f32 %v3045_v14, 0.0  ;;  %v3047_v59 = vadd.f32 %v3046_v8, %v2854_v52  ;;  %v2858_v31 = vadd.f32 %v2857_v62, %v2665_v61 }
 0x216   : > { %v3048_v9 = vpop.f32.mrf.mxu0  ;;  %v2861_v55 = vpop.f32.mrf.mxu1 }
 0x217   : > { %3155 = vst [vmem:[%s5650_s21 + $0x1c0] sm:$0xff] %v3119_v54  ;;  %v3120_v2 = vmax.f32 %v3047_v59, 0.0  ;;  %v3049_v44 = vadd.f32 %v3048_v9, %v2856_v57  ;;  %v2862_v12 = vadd.f32 %v2861_v55, %v2669_v53 }
 0x218   : > { %v3050_v45 = vpop.f32.mrf.mxu0  ;;  %v2863_v23 = vpop.f32.mrf.mxu1 }
 0x219   : > { %3687 = vst [vmem:[%s5650_s21 + $0x1d0] sm:$0xff] %v3120_v2  ;;  %v3121_v27 = vmax.f32 %v3049_v44, 0.0  ;;  %v3051_v26 = vadd.f32 %v3050_v45, %v2858_v31  ;;  %v2864_v50 = vadd.f32 %v2863_v23, %v2671_v10 }
 0x21a   : > { %v3054_v39 = vpop.f32.mrf.mxu0  ;;  %v2865_v32 = vpop.f32.mrf.mxu1 }
 0x21b   : > { %3156 = vst [vmem:[%s5650_s21 + $0x1c8] sm:$0xff] %v3121_v27  ;;  %v3122_v47 = vmax.f32 %v3051_v26, 0.0  ;;  %v3055_v11 = vadd.f32 %v3054_v39, %v2862_v12  ;;  %v2866_v25 = vadd.f32 %v2865_v32, %v2673_v49 }
 0x21c   : > { %v3056_v20 = vpop.f32.mrf.mxu0  ;;  %v2867_v41 = vpop.f32.mrf.mxu1 }
 0x21d   : > { %3688 = vst [vmem:[%s5650_s21 + $0x1d8] sm:$0xff] %v3122_v47  ;;  %v3123_v33 = vmax.f32 %v3055_v11, 0.0  ;;  %v3057_v51 = vadd.f32 %v3056_v20, %v2864_v50  ;;  %v2868_v42 = vadd.f32 %v2867_v41, %v2675_v13 }
 0x21e   : > { %v3058_v7 = vpop.f32.mrf.mxu0 }
 0x21f   : > { %3157 = vst [vmem:[%s5650_s21 + $0x1e0] sm:$0xff] %v3123_v33  ;;  %v3124_v36 = vmax.f32 %v3057_v51, 0.0  ;;  %v3059_v3 = vadd.f32 %v3058_v7, %v2866_v25 }
 0x220   : > { %v3060_v38 = vpop.f32.mrf.mxu0 }
 0x221   : > { %3689 = vst [vmem:[%s5650_s21 + $0x1f0] sm:$0xff] %v3124_v36  ;;  %v3125_v18 = vmax.f32 %v3059_v3, 0.0  ;;  %v3061_v24 = vadd.f32 %v3060_v38, %v2868_v42 }
 0x223   : > { %3158 = vst [vmem:[%s5650_s21 + $0x1e8] sm:$0xff] %v3125_v18  ;;  %v3126_v63 = vmax.f32 %v3061_v24, 0.0 }
 0x225   : > { %3690 = vst [vmem:[%s5650_s21 + $0x1f8] sm:$0xff] %v3126_v63 }
 0x226   : > { %4120 = shalt.err (!%p4117_p5)
}
 0x227   : > { %s4121_s8 = scalar_lea.hbm %s5835_s30, 8192  ;;  %s4125_s19 = scalar_lea.hbm %s5891_s3, 16384 }
 0x228   : > { %p4122_p6 = scmp.ne.s32.totalorder %s5835_s30, %s4121_s8  ;;  %p4126_p10 = scmp.lt.s32.totalorder %s5835_s30, %s5891_s3 }
 0x229   : > { %p4127_p11 = scmp.lt.s32.totalorder %s4125_s19, %s4121_s8 }
 0x22a   : > { %p4123_p7 = pnand %p4122_p6, %p4250_p4 }
 0x22b   : > { %p4128_p12 = por %p4127_p11, %p4126_p10 }
 0x22c   : > { %p4124_p9 = pneg %p4123_p7 }
 0x22e   : > { %p4129_p13 = pnand %p4128_p12, %p4124_p9 }
 0x230   : > { %4132 = shalt.err (!%p4129_p13)
}
 0x231   : > { %s4188_s18 = smov 128   ;;  %s4189_s21 = smov 8  }
 0x232   : > { %3730 = dma.vmem_to_hbm [thread:$0]  (%p4250_p4), %s5837_s26, 8192, %s5835_s30, %s5843_s15, %s4188_s18, %s4188_s18, %s4189_s21  }
 0x233 PF: > { %p3736_p0 = scmp.ge.s32.totalorder %s4183_s17, 2  ;;  %s3224_s23 = sand.u32 1, %s4163_s12  }
 0x234   : > { %s3225_s27 = scalar_lea.sflag [#allocation3], %s3224_s23 }
 0x235   : > { %p3733_p1 = pnand %p3736_p0, %p4257_p8 }
 0x237   : > { %p3734_p2 = pneg %p3733_p1 }
 0x239   : > { %4158 = dma.done.wait (%p3734_p2), %s3225_s27, 8192  }
 0x23a   : > { %4160 = vsyncadd (%p3734_p2), %s3225_s27, 4294959104  ;;  %s16_s17 = sadd.s32 1, %s4183_s17   ;;  %s6026_s12 = smov %s4167_s13 }
 0x23b   : > { %p13_p3 = scmp.ge.s32.totalorder %s16_s17, 4   ;;  %s6027_s13 = smov %s4171_s14 }
 0x23c   : > { %s6028_s14 = smov %s4263_s25  ;;  %s6029_s15 = smov %s4179_s16 }
 0x23d   : > { %s6030_s16 = smov %s6032_s20  ;;  %15 = sbr.rel (!%p13_p3) target bundleno = 4 (0x4), region = 71 }
 0x242   :  { %3230 = vsyncpa [#allocation3], 1 }
 0x243   :  { %3232 = vsyncpa [#allocation3 + $0x1], 1 }

</bundles_post_ra>
